<compile_context>
chip_gen: v5e
topology: v5e:2x2
jax: 0.10.0
libtpu: 0.0.40
codegen_flags: <defaults>
</compile_context>

<pallas_src>
import jax
import jax.numpy as jnp
from jax import lax
from jax.experimental import pallas as pl
from jax.experimental.pallas import tpu as pltpu


def row_attention_kernel(wf_ref, bf_ref, gamma_ref, x_ref, o_ref):
    # x_ref block: (1, C, H, W) -- one full image, NCHW, resident in VMEM.
    _, c, h, w = x_ref.shape
    qk = (wf_ref.shape[0] - c) // 2

    wf = wf_ref[...]          # (2*Qk + C, C)   fused [Wq; Wk; Wv]
    bf = bf_ref[...]          # (2*Qk + C, 1)   fused [bq; bk; bv]
    g = gamma_ref[0, 0]       # scalar (SMEM)

    # Unrolled static loop over image rows (row attention is strictly per-row).
    for hh in range(h):
        xr = x_ref[0, :, hh, :]                                       # (C, W)

        # Fused 1x1-conv projections: one MXU matmul, then static row slices.
        proj = jnp.dot(wf, xr, preferred_element_type=jnp.float32) + bf
        q = proj[:qk]                                                 # (Qk, W)
        k = proj[qk:2 * qk]                                           # (Qk, W)
        v = proj[2 * qk:]                                             # (C,  W)

        # logits[i, j] = sum_o q[o, i] * k[o, j]   (Q^T folded into the dot)
        logits = lax.dot_general(q, k, (((0,), (0,)), ((), ())),
                                 preferred_element_type=jnp.float32)  # (W, W)
        logits = logits - jnp.max(logits, axis=-1, keepdims=True)
        e = jnp.exp(logits)
        inv = pl.reciprocal(jnp.sum(e, axis=-1, keepdims=True), approx=False)
        attn = e * inv        # softmax over keys == torch Softmax(dim=2)

        # out[c, i] = sum_j v[c, j] * attn[i, j]   (attn^T folded into the dot)
        out_r = lax.dot_general(v, attn, (((1,), (1,)), ((), ())),
                                preferred_element_type=jnp.float32)   # (C, W)

        # gamma * out + x residual, written straight back in NCHW layout.
        o_ref[0, :, hh, :] = (g * out_r + xr).astype(o_ref.dtype)


def row_attention(x, wq, bq, wk, bk, wv, bv, gamma):
    """x: (b, C, H, W) float32 (NCHW, like the PyTorch module).

    wq, wk: (Qk, C) -- 1x1 conv weights (out_ch, in_ch), kernel dims squeezed.
    wv:     (C, C)
    bq, bk: (Qk,)   bv: (C,)   gamma: (1,)
    """
    b, c, h, w = x.shape
    qk = wq.shape[0]
    o_dim = 2 * qk + c

    # Fuse the three projection weights/biases (tiny arrays; negligible cost).
    wf = jnp.concatenate([wq, wk, wv], axis=0).astype(jnp.float32)    # (2Qk+C, C)
    bf = jnp.concatenate([bq, bk, bv], axis=0).reshape(o_dim, 1).astype(jnp.float32)
    g = gamma.reshape(1, 1).astype(jnp.float32)

    return pl.pallas_call(
        row_attention_kernel,
        out_shape=jax.ShapeDtypeStruct((b, c, h, w), x.dtype),
        grid=(b,),
        in_specs=[
            pl.BlockSpec((o_dim, c), lambda i: (0, 0)),           # fused weights
            pl.BlockSpec((o_dim, 1), lambda i: (0, 0)),           # fused biases
            pl.BlockSpec(memory_space=pltpu.MemorySpace.SMEM),    # gamma scalar
            pl.BlockSpec((1, c, h, w), lambda i: (i, 0, 0, 0)),   # x, whole image
        ],
        out_specs=pl.BlockSpec((1, c, h, w), lambda i: (i, 0, 0, 0)),
        # Per-image blocks are small here, so the default VMEM limit is fine on
        # v5e/v6e/v7x; "parallel" lets v7x spread images over its two TCs.
        compiler_params=pltpu.CompilerParams(
            dimension_semantics=("parallel",)),
    )(wf, bf, g, x)


def row_attention_ref(x, wq, bq, wk, bk, wv, bv, gamma):
    """Pure-JAX reference, mirrors the PyTorch forward exactly."""
    b, c, h, w = x.shape
    Q = jnp.einsum('oc,bchw->bohw', wq, x) + bq[None, :, None, None]
    K = jnp.einsum('oc,bchw->bohw', wk, x) + bk[None, :, None, None]
    V = jnp.einsum('oc,bchw->bohw', wv, x) + bv[None, :, None, None]
    Qr = jnp.transpose(Q, (0, 2, 1, 3)).reshape(b * h, -1, w).transpose(0, 2, 1)
    Kr = jnp.transpose(K, (0, 2, 1, 3)).reshape(b * h, -1, w)
    Vr = jnp.transpose(V, (0, 2, 1, 3)).reshape(b * h, -1, w)
    attn = jax.nn.softmax(jnp.einsum('nwq,nqv->nwv', Qr, Kr), axis=2)
    out = jnp.einsum('ncw,niw->nci', Vr, attn)     # V @ attn^T
    out = jnp.transpose(out.reshape(b, h, c, w), (0, 2, 1, 3))
    return gamma * out + x


if __name__ == "__main__":
    key = jax.random.PRNGKey(0)
    b, c, h, w, qk = 2, 4, 16, 16, 8
    ks = jax.random.split(key, 7)

    x = jax.random.normal(ks[0], (b, c, h, w), jnp.float32)
    wq = 0.1 * jax.random.normal(ks[1], (qk, c), jnp.float32)
    bq = 0.1 * jax.random.normal(ks[2], (qk,), jnp.float32)
    wk = 0.1 * jax.random.normal(ks[3], (qk, c), jnp.float32)
    bk = 0.1 * jax.random.normal(ks[4], (qk,), jnp.float32)
    wv = 0.1 * jax.random.normal(ks[5], (c, c), jnp.float32)
    bv = 0.1 * jax.random.normal(ks[6], (c,), jnp.float32)
    # Module inits gamma = zeros(1); use a nonzero value so the attention
    # branch actually contributes to the checked output.
    gamma = jnp.array([0.5], jnp.float32)

    out = jax.block_until_ready(row_attention(x, wq, bq, wk, bk, wv, bv, gamma))
    ref = row_attention_ref(x, wq, bq, wk, bk, wv, bv, gamma[0])
    err = float(jnp.max(jnp.abs(out - ref)))
    assert jnp.allclose(out, ref, atol=1e-5, rtol=1e-5), f"max abs err {err}"
    print("KERNEL_OK")
</pallas_src>

<mosaic_0001>
module attributes {stable_mosaic.version = 11 : i64} {
  func.func @row_attention_kernel(%arg0: i32, %arg1: memref<20x4xf32, #tpu.memory_space<vmem>>, %arg2: memref<20x1xf32, #tpu.memory_space<vmem>>, %arg3: memref<1x1xf32, #tpu.memory_space<smem>>, %arg4: memref<1x4x16x16xf32, #tpu.memory_space<vmem>>, %arg5: memref<1x4x16x16xf32, #tpu.memory_space<vmem>>) attributes {dimension_semantics = [#tpu.dimension_semantics<parallel>], iteration_bounds = array<i64: 2>, scalar_prefetch = 0 : i64, scratch_operands = 0 : i64, tpu.core_type = #tpu.core_type<tc>, window_params = [{pipeline_mode = #tpu.pipeline_mode<synchronous>, transform_indices = @transform_0, window_bounds = array<i64: 20, 4>}, {pipeline_mode = #tpu.pipeline_mode<synchronous>, transform_indices = @transform_1, window_bounds = array<i64: 20, 1>}, {transform_indices = @transform_2, window_bounds = array<i64: 1, 1>}, {transform_indices = @transform_3, window_bounds = array<i64: 1, 4, 16, 16>}, {transform_indices = @transform_4, window_bounds = array<i64: 1, 4, 16, 16>}]} {
    %c0 = arith.constant 0 : index
    %c0_0 = arith.constant 0 : index
    %0 = vector.load %arg1[%c0, %c0_0] : memref<20x4xf32, #tpu.memory_space<vmem>>, vector<20x4xf32>
    %c0_1 = arith.constant 0 : index
    %c0_2 = arith.constant 0 : index
    %1 = vector.load %arg2[%c0_1, %c0_2] : memref<20x1xf32, #tpu.memory_space<vmem>>, vector<20x1xf32>
    %c0_3 = arith.constant 0 : index
    %c0_4 = arith.constant 0 : index
    %2 = memref.load %arg3[%c0_3, %c0_4] : memref<1x1xf32, #tpu.memory_space<smem>>
    %c0_5 = arith.constant 0 : index
    %c0_6 = arith.constant 0 : index
    %c0_7 = arith.constant 0 : index
    %c0_8 = arith.constant 0 : index
    %3 = vector.load %arg4[%c0_5, %c0_6, %c0_7, %c0_8] : memref<1x4x16x16xf32, #tpu.memory_space<vmem>>, vector<1x4x1x16xf32>
    %4 = vector.shape_cast %3 : vector<1x4x1x16xf32> to vector<4x16xf32>
    %cst = arith.constant dense<0.000000e+00> : vector<20x16xf32>
    %5 = tpu.matmul %0, %4, %cst {dimension_numbers = #tpu.dot_dimension_numbers<[1], [0], [0], [1], [0, 0, 1, 1], [], []>} : vector<20x4xf32>, vector<4x16xf32>, vector<20x16xf32> -> vector<20x16xf32>
    %6 = vector.broadcast %1 : vector<20x1xf32> to vector<20x16xf32>
    %7 = arith.addf %5, %6 : vector<20x16xf32>
    %8 = vector.extract_strided_slice %7 {offsets = [0, 0], sizes = [8, 16], strides = [1, 1]} : vector<20x16xf32> to vector<8x16xf32>
    %9 = vector.extract_strided_slice %7 {offsets = [8, 0], sizes = [8, 16], strides = [1, 1]} : vector<20x16xf32> to vector<8x16xf32>
    %10 = vector.extract_strided_slice %7 {offsets = [16, 0], sizes = [4, 16], strides = [1, 1]} : vector<20x16xf32> to vector<4x16xf32>
    %cst_9 = arith.constant dense<0.000000e+00> : vector<16x16xf32>
    %11 = tpu.matmul %8, %9, %cst_9 {dimension_numbers = #tpu.dot_dimension_numbers<[0], [0], [1], [1], [0, 1, 1, 1], [], []>} : vector<8x16xf32>, vector<8x16xf32>, vector<16x16xf32> -> vector<16x16xf32>
    %cst_10 = arith.constant dense<0xFF800000> : vector<16xf32>
    %12 = vector.multi_reduction <maximumf>, %11, %cst_10 [1] : vector<16x16xf32> to vector<16xf32>
    %13 = vector.shape_cast %12 : vector<16xf32> to vector<16x1xf32>
    %14 = vector.broadcast %13 : vector<16x1xf32> to vector<16x16xf32>
    %15 = arith.subf %11, %14 : vector<16x16xf32>
    %16 = math.exp %15 : vector<16x16xf32>
    %cst_11 = arith.constant dense<0.000000e+00> : vector<16xf32>
    %17 = vector.multi_reduction <add>, %16, %cst_11 [1] : vector<16x16xf32> to vector<16xf32>
    %18 = vector.shape_cast %17 : vector<16xf32> to vector<16x1xf32>
    %19 = tpu.reciprocal %18 : vector<16x1xf32> -> vector<16x1xf32>
    %20 = vector.broadcast %19 : vector<16x1xf32> to vector<16x16xf32>
    %21 = arith.mulf %16, %20 : vector<16x16xf32>
    %cst_12 = arith.constant dense<0.000000e+00> : vector<4x16xf32>
    %22 = tpu.matmul %10, %21, %cst_12 {dimension_numbers = #tpu.dot_dimension_numbers<[1], [1], [0], [0], [0, 0, 1, 0], [], []>} : vector<4x16xf32>, vector<16x16xf32>, vector<4x16xf32> -> vector<4x16xf32>
    %23 = vector.broadcast %2 : f32 to vector<4x16xf32>
    %24 = arith.mulf %23, %22 : vector<4x16xf32>
    %25 = arith.addf %24, %4 : vector<4x16xf32>
    %c0_13 = arith.constant 0 : index
    %c0_14 = arith.constant 0 : index
    %c0_15 = arith.constant 0 : index
    %c0_16 = arith.constant 0 : index
    %26 = vector.load %arg5[%c0_13, %c0_14, %c0_15, %c0_16] : memref<1x4x16x16xf32, #tpu.memory_space<vmem>>, vector<1x4x1x16xf32>
    %27 = vector.shape_cast %26 : vector<1x4x1x16xf32> to vector<4x16xf32>
    %28 = vector.shape_cast %25 : vector<4x16xf32> to vector<1x4x1x16xf32>
    tpu.vector_store %arg5[%c0_13, %c0_14, %c0_15, %c0_16], %28 {strides = array<i32>} : memref<1x4x16x16xf32, #tpu.memory_space<vmem>>, vector<1x4x1x16xf32>,
    %c0_17 = arith.constant 0 : index
    %c0_18 = arith.constant 0 : index
    %c1 = arith.constant 1 : index
    %c0_19 = arith.constant 0 : index
    %29 = vector.load %arg4[%c0_17, %c0_18, %c1, %c0_19] : memref<1x4x16x16xf32, #tpu.memory_space<vmem>>, vector<1x4x1x16xf32>
    %30 = vector.shape_cast %29 : vector<1x4x1x16xf32> to vector<4x16xf32>
    %cst_20 = arith.constant dense<0.000000e+00> : vector<20x16xf32>
    %31 = tpu.matmul %0, %30, %cst_20 {dimension_numbers = #tpu.dot_dimension_numbers<[1], [0], [0], [1], [0, 0, 1, 1], [], []>} : vector<20x4xf32>, vector<4x16xf32>, vector<20x16xf32> -> vector<20x16xf32>
    %32 = vector.broadcast %1 : vector<20x1xf32> to vector<20x16xf32>
    %33 = arith.addf %31, %32 : vector<20x16xf32>
    %34 = vector.extract_strided_slice %33 {offsets = [0, 0], sizes = [8, 16], strides = [1, 1]} : vector<20x16xf32> to vector<8x16xf32>
    %35 = vector.extract_strided_slice %33 {offsets = [8, 0], sizes = [8, 16], strides = [1, 1]} : vector<20x16xf32> to vector<8x16xf32>
    %36 = vector.extract_strided_slice %33 {offsets = [16, 0], sizes = [4, 16], strides = [1, 1]} : vector<20x16xf32> to vector<4x16xf32>
    %cst_21 = arith.constant dense<0.000000e+00> : vector<16x16xf32>
    %37 = tpu.matmul %34, %35, %cst_21 {dimension_numbers = #tpu.dot_dimension_numbers<[0], [0], [1], [1], [0, 1, 1, 1], [], []>} : vector<8x16xf32>, vector<8x16xf32>, vector<16x16xf32> -> vector<16x16xf32>
    %cst_22 = arith.constant dense<0xFF800000> : vector<16xf32>
    %38 = vector.multi_reduction <maximumf>, %37, %cst_22 [1] : vector<16x16xf32> to vector<16xf32>
    %39 = vector.shape_cast %38 : vector<16xf32> to vector<16x1xf32>
    %40 = vector.broadcast %39 : vector<16x1xf32> to vector<16x16xf32>
    %41 = arith.subf %37, %40 : vector<16x16xf32>
    %42 = math.exp %41 : vector<16x16xf32>
    %cst_23 = arith.constant dense<0.000000e+00> : vector<16xf32>
    %43 = vector.multi_reduction <add>, %42, %cst_23 [1] : vector<16x16xf32> to vector<16xf32>
    %44 = vector.shape_cast %43 : vector<16xf32> to vector<16x1xf32>
    %45 = tpu.reciprocal %44 : vector<16x1xf32> -> vector<16x1xf32>
    %46 = vector.broadcast %45 : vector<16x1xf32> to vector<16x16xf32>
    %47 = arith.mulf %42, %46 : vector<16x16xf32>
    %cst_24 = arith.constant dense<0.000000e+00> : vector<4x16xf32>
    %48 = tpu.matmul %36, %47, %cst_24 {dimension_numbers = #tpu.dot_dimension_numbers<[1], [1], [0], [0], [0, 0, 1, 0], [], []>} : vector<4x16xf32>, vector<16x16xf32>, vector<4x16xf32> -> vector<4x16xf32>
    %49 = vector.broadcast %2 : f32 to vector<4x16xf32>
    %50 = arith.mulf %49, %48 : vector<4x16xf32>
    %51 = arith.addf %50, %30 : vector<4x16xf32>
    %c0_25 = arith.constant 0 : index
    %c0_26 = arith.constant 0 : index
    %c1_27 = arith.constant 1 : index
    %c0_28 = arith.constant 0 : index
    %52 = vector.load %arg5[%c0_25, %c0_26, %c1_27, %c0_28] : memref<1x4x16x16xf32, #tpu.memory_space<vmem>>, vector<1x4x1x16xf32>
    %53 = vector.shape_cast %52 : vector<1x4x1x16xf32> to vector<4x16xf32>
    %54 = vector.shape_cast %51 : vector<4x16xf32> to vector<1x4x1x16xf32>
    tpu.vector_store %arg5[%c0_25, %c0_26, %c1_27, %c0_28], %54 {strides = array<i32>} : memref<1x4x16x16xf32, #tpu.memory_space<vmem>>, vector<1x4x1x16xf32>,
    %c0_29 = arith.constant 0 : index
    %c0_30 = arith.constant 0 : index
    %c2 = arith.constant 2 : index
    %c0_31 = arith.constant 0 : index
    %55 = vector.load %arg4[%c0_29, %c0_30, %c2, %c0_31] : memref<1x4x16x16xf32, #tpu.memory_space<vmem>>, vector<1x4x1x16xf32>
    %56 = vector.shape_cast %55 : vector<1x4x1x16xf32> to vector<4x16xf32>
    %cst_32 = arith.constant dense<0.000000e+00> : vector<20x16xf32>
    %57 = tpu.matmul %0, %56, %cst_32 {dimension_numbers = #tpu.dot_dimension_numbers<[1], [0], [0], [1], [0, 0, 1, 1], [], []>} : vector<20x4xf32>, vector<4x16xf32>, vector<20x16xf32> -> vector<20x16xf32>
    %58 = vector.broadcast %1 : vector<20x1xf32> to vector<20x16xf32>
    %59 = arith.addf %57, %58 : vector<20x16xf32>
    %60 = vector.extract_strided_slice %59 {offsets = [0, 0], sizes = [8, 16], strides = [1, 1]} : vector<20x16xf32> to vector<8x16xf32>
    %61 = vector.extract_strided_slice %59 {offsets = [8, 0], sizes = [8, 16], strides = [1, 1]} : vector<20x16xf32> to vector<8x16xf32>
    %62 = vector.extract_strided_slice %59 {offsets = [16, 0], sizes = [4, 16], strides = [1, 1]} : vector<20x16xf32> to vector<4x16xf32>
    %cst_33 = arith.constant dense<0.000000e+00> : vector<16x16xf32>
    %63 = tpu.matmul %60, %61, %cst_33 {dimension_numbers = #tpu.dot_dimension_numbers<[0], [0], [1], [1], [0, 1, 1, 1], [], []>} : vector<8x16xf32>, vector<8x16xf32>, vector<16x16xf32> -> vector<16x16xf32>
    %cst_34 = arith.constant dense<0xFF800000> : vector<16xf32>
    %64 = vector.multi_reduction <maximumf>, %63, %cst_34 [1] : vector<16x16xf32> to vector<16xf32>
    %65 = vector.shape_cast %64 : vector<16xf32> to vector<16x1xf32>
    %66 = vector.broadcast %65 : vector<16x1xf32> to vector<16x16xf32>
    %67 = arith.subf %63, %66 : vector<16x16xf32>
    %68 = math.exp %67 : vector<16x16xf32>
    %cst_35 = arith.constant dense<0.000000e+00> : vector<16xf32>
    %69 = vector.multi_reduction <add>, %68, %cst_35 [1] : vector<16x16xf32> to vector<16xf32>
    %70 = vector.shape_cast %69 : vector<16xf32> to vector<16x1xf32>
    %71 = tpu.reciprocal %70 : vector<16x1xf32> -> vector<16x1xf32>
    %72 = vector.broadcast %71 : vector<16x1xf32> to vector<16x16xf32>
    %73 = arith.mulf %68, %72 : vector<16x16xf32>
    %cst_36 = arith.constant dense<0.000000e+00> : vector<4x16xf32>
    %74 = tpu.matmul %62, %73, %cst_36 {dimension_numbers = #tpu.dot_dimension_numbers<[1], [1], [0], [0], [0, 0, 1, 0], [], []>} : vector<4x16xf32>, vector<16x16xf32>, vector<4x16xf32> -> vector<4x16xf32>
    %75 = vector.broadcast %2 : f32 to vector<4x16xf32>
    %76 = arith.mulf %75, %74 : vector<4x16xf32>
    %77 = arith.addf %76, %56 : vector<4x16xf32>
    %c0_37 = arith.constant 0 : index
    %c0_38 = arith.constant 0 : index
    %c2_39 = arith.constant 2 : index
    %c0_40 = arith.constant 0 : index
    %78 = vector.load %arg5[%c0_37, %c0_38, %c2_39, %c0_40] : memref<1x4x16x16xf32, #tpu.memory_space<vmem>>, vector<1x4x1x16xf32>
    %79 = vector.shape_cast %78 : vector<1x4x1x16xf32> to vector<4x16xf32>
    %80 = vector.shape_cast %77 : vector<4x16xf32> to vector<1x4x1x16xf32>
    tpu.vector_store %arg5[%c0_37, %c0_38, %c2_39, %c0_40], %80 {strides = array<i32>} : memref<1x4x16x16xf32, #tpu.memory_space<vmem>>, vector<1x4x1x16xf32>,
    %c0_41 = arith.constant 0 : index
    %c0_42 = arith.constant 0 : index
    %c3 = arith.constant 3 : index
    %c0_43 = arith.constant 0 : index
    %81 = vector.load %arg4[%c0_41, %c0_42, %c3, %c0_43] : memref<1x4x16x16xf32, #tpu.memory_space<vmem>>, vector<1x4x1x16xf32>
    %82 = vector.shape_cast %81 : vector<1x4x1x16xf32> to vector<4x16xf32>
    %cst_44 = arith.constant dense<0.000000e+00> : vector<20x16xf32>
    %83 = tpu.matmul %0, %82, %cst_44 {dimension_numbers = #tpu.dot_dimension_numbers<[1], [0], [0], [1], [0, 0, 1, 1], [], []>} : vector<20x4xf32>, vector<4x16xf32>, vector<20x16xf32> -> vector<20x16xf32>
    %84 = vector.broadcast %1 : vector<20x1xf32> to vector<20x16xf32>
    %85 = arith.addf %83, %84 : vector<20x16xf32>
    %86 = vector.extract_strided_slice %85 {offsets = [0, 0], sizes = [8, 16], strides = [1, 1]} : vector<20x16xf32> to vector<8x16xf32>
    %87 = vector.extract_strided_slice %85 {offsets = [8, 0], sizes = [8, 16], strides = [1, 1]} : vector<20x16xf32> to vector<8x16xf32>
    %88 = vector.extract_strided_slice %85 {offsets = [16, 0], sizes = [4, 16], strides = [1, 1]} : vector<20x16xf32> to vector<4x16xf32>
    %cst_45 = arith.constant dense<0.000000e+00> : vector<16x16xf32>
    %89 = tpu.matmul %86, %87, %cst_45 {dimension_numbers = #tpu.dot_dimension_numbers<[0], [0], [1], [1], [0, 1, 1, 1], [], []>} : vector<8x16xf32>, vector<8x16xf32>, vector<16x16xf32> -> vector<16x16xf32>
    %cst_46 = arith.constant dense<0xFF800000> : vector<16xf32>
    %90 = vector.multi_reduction <maximumf>, %89, %cst_46 [1] : vector<16x16xf32> to vector<16xf32>
    %91 = vector.shape_cast %90 : vector<16xf32> to vector<16x1xf32>
    %92 = vector.broadcast %91 : vector<16x1xf32> to vector<16x16xf32>
    %93 = arith.subf %89, %92 : vector<16x16xf32>
    %94 = math.exp %93 : vector<16x16xf32>
    %cst_47 = arith.constant dense<0.000000e+00> : vector<16xf32>
    %95 = vector.multi_reduction <add>, %94, %cst_47 [1] : vector<16x16xf32> to vector<16xf32>
    %96 = vector.shape_cast %95 : vector<16xf32> to vector<16x1xf32>
    %97 = tpu.reciprocal %96 : vector<16x1xf32> -> vector<16x1xf32>
    %98 = vector.broadcast %97 : vector<16x1xf32> to vector<16x16xf32>
    %99 = arith.mulf %94, %98 : vector<16x16xf32>
    %cst_48 = arith.constant dense<0.000000e+00> : vector<4x16xf32>
    %100 = tpu.matmul %88, %99, %cst_48 {dimension_numbers = #tpu.dot_dimension_numbers<[1], [1], [0], [0], [0, 0, 1, 0], [], []>} : vector<4x16xf32>, vector<16x16xf32>, vector<4x16xf32> -> vector<4x16xf32>
    %101 = vector.broadcast %2 : f32 to vector<4x16xf32>
    %102 = arith.mulf %101, %100 : vector<4x16xf32>
    %103 = arith.addf %102, %82 : vector<4x16xf32>
    %c0_49 = arith.constant 0 : index
    %c0_50 = arith.constant 0 : index
    %c3_51 = arith.constant 3 : index
    %c0_52 = arith.constant 0 : index
    %104 = vector.load %arg5[%c0_49, %c0_50, %c3_51, %c0_52] : memref<1x4x16x16xf32, #tpu.memory_space<vmem>>, vector<1x4x1x16xf32>
    %105 = vector.shape_cast %104 : vector<1x4x1x16xf32> to vector<4x16xf32>
    %106 = vector.shape_cast %103 : vector<4x16xf32> to vector<1x4x1x16xf32>
    tpu.vector_store %arg5[%c0_49, %c0_50, %c3_51, %c0_52], %106 {strides = array<i32>} : memref<1x4x16x16xf32, #tpu.memory_space<vmem>>, vector<1x4x1x16xf32>,
    %c0_53 = arith.constant 0 : index
    %c0_54 = arith.constant 0 : index
    %c4 = arith.constant 4 : index
    %c0_55 = arith.constant 0 : index
    %107 = vector.load %arg4[%c0_53, %c0_54, %c4, %c0_55] : memref<1x4x16x16xf32, #tpu.memory_space<vmem>>, vector<1x4x1x16xf32>
    %108 = vector.shape_cast %107 : vector<1x4x1x16xf32> to vector<4x16xf32>
    %cst_56 = arith.constant dense<0.000000e+00> : vector<20x16xf32>
    %109 = tpu.matmul %0, %108, %cst_56 {dimension_numbers = #tpu.dot_dimension_numbers<[1], [0], [0], [1], [0, 0, 1, 1], [], []>} : vector<20x4xf32>, vector<4x16xf32>, vector<20x16xf32> -> vector<20x16xf32>
    %110 = vector.broadcast %1 : vector<20x1xf32> to vector<20x16xf32>
    %111 = arith.addf %109, %110 : vector<20x16xf32>
    %112 = vector.extract_strided_slice %111 {offsets = [0, 0], sizes = [8, 16], strides = [1, 1]} : vector<20x16xf32> to vector<8x16xf32>
    %113 = vector.extract_strided_slice %111 {offsets = [8, 0], sizes = [8, 16], strides = [1, 1]} : vector<20x16xf32> to vector<8x16xf32>
    %114 = vector.extract_strided_slice %111 {offsets = [16, 0], sizes = [4, 16], strides = [1, 1]} : vector<20x16xf32> to vector<4x16xf32>
    %cst_57 = arith.constant dense<0.000000e+00> : vector<16x16xf32>
    %115 = tpu.matmul %112, %113, %cst_57 {dimension_numbers = #tpu.dot_dimension_numbers<[0], [0], [1], [1], [0, 1, 1, 1], [], []>} : vector<8x16xf32>, vector<8x16xf32>, vector<16x16xf32> -> vector<16x16xf32>
    %cst_58 = arith.constant dense<0xFF800000> : vector<16xf32>
    %116 = vector.multi_reduction <maximumf>, %115, %cst_58 [1] : vector<16x16xf32> to vector<16xf32>
    %117 = vector.shape_cast %116 : vector<16xf32> to vector<16x1xf32>
    %118 = vector.broadcast %117 : vector<16x1xf32> to vector<16x16xf32>
    %119 = arith.subf %115, %118 : vector<16x16xf32>
    %120 = math.exp %119 : vector<16x16xf32>
    %cst_59 = arith.constant dense<0.000000e+00> : vector<16xf32>
    %121 = vector.multi_reduction <add>, %120, %cst_59 [1] : vector<16x16xf32> to vector<16xf32>
    %122 = vector.shape_cast %121 : vector<16xf32> to vector<16x1xf32>
    %123 = tpu.reciprocal %122 : vector<16x1xf32> -> vector<16x1xf32>
    %124 = vector.broadcast %123 : vector<16x1xf32> to vector<16x16xf32>
    %125 = arith.mulf %120, %124 : vector<16x16xf32>
    %cst_60 = arith.constant dense<0.000000e+00> : vector<4x16xf32>
    %126 = tpu.matmul %114, %125, %cst_60 {dimension_numbers = #tpu.dot_dimension_numbers<[1], [1], [0], [0], [0, 0, 1, 0], [], []>} : vector<4x16xf32>, vector<16x16xf32>, vector<4x16xf32> -> vector<4x16xf32>
    %127 = vector.broadcast %2 : f32 to vector<4x16xf32>
    %128 = arith.mulf %127, %126 : vector<4x16xf32>
    %129 = arith.addf %128, %108 : vector<4x16xf32>
    %c0_61 = arith.constant 0 : index
    %c0_62 = arith.constant 0 : index
    %c4_63 = arith.constant 4 : index
    %c0_64 = arith.constant 0 : index
    %130 = vector.load %arg5[%c0_61, %c0_62, %c4_63, %c0_64] : memref<1x4x16x16xf32, #tpu.memory_space<vmem>>, vector<1x4x1x16xf32>
    %131 = vector.shape_cast %130 : vector<1x4x1x16xf32> to vector<4x16xf32>
    %132 = vector.shape_cast %129 : vector<4x16xf32> to vector<1x4x1x16xf32>
    tpu.vector_store %arg5[%c0_61, %c0_62, %c4_63, %c0_64], %132 {strides = array<i32>} : memref<1x4x16x16xf32, #tpu.memory_space<vmem>>, vector<1x4x1x16xf32>,
    %c0_65 = arith.constant 0 : index
    %c0_66 = arith.constant 0 : index
    %c5 = arith.constant 5 : index
    %c0_67 = arith.constant 0 : index
    %133 = vector.load %arg4[%c0_65, %c0_66, %c5, %c0_67] : memref<1x4x16x16xf32, #tpu.memory_space<vmem>>, vector<1x4x1x16xf32>
    %134 = vector.shape_cast %133 : vector<1x4x1x16xf32> to vector<4x16xf32>
    %cst_68 = arith.constant dense<0.000000e+00> : vector<20x16xf32>
    %135 = tpu.matmul %0, %134, %cst_68 {dimension_numbers = #tpu.dot_dimension_numbers<[1], [0], [0], [1], [0, 0, 1, 1], [], []>} : vector<20x4xf32>, vector<4x16xf32>, vector<20x16xf32> -> vector<20x16xf32>
    %136 = vector.broadcast %1 : vector<20x1xf32> to vector<20x16xf32>
    %137 = arith.addf %135, %136 : vector<20x16xf32>
    %138 = vector.extract_strided_slice %137 {offsets = [0, 0], sizes = [8, 16], strides = [1, 1]} : vector<20x16xf32> to vector<8x16xf32>
    %139 = vector.extract_strided_slice %137 {offsets = [8, 0], sizes = [8, 16], strides = [1, 1]} : vector<20x16xf32> to vector<8x16xf32>
    %140 = vector.extract_strided_slice %137 {offsets = [16, 0], sizes = [4, 16], strides = [1, 1]} : vector<20x16xf32> to vector<4x16xf32>
    %cst_69 = arith.constant dense<0.000000e+00> : vector<16x16xf32>
    %141 = tpu.matmul %138, %139, %cst_69 {dimension_numbers = #tpu.dot_dimension_numbers<[0], [0], [1], [1], [0, 1, 1, 1], [], []>} : vector<8x16xf32>, vector<8x16xf32>, vector<16x16xf32> -> vector<16x16xf32>
    %cst_70 = arith.constant dense<0xFF800000> : vector<16xf32>
    %142 = vector.multi_reduction <maximumf>, %141, %cst_70 [1] : vector<16x16xf32> to vector<16xf32>
    %143 = vector.shape_cast %142 : vector<16xf32> to vector<16x1xf32>
    %144 = vector.broadcast %143 : vector<16x1xf32> to vector<16x16xf32>
    %145 = arith.subf %141, %144 : vector<16x16xf32>
    %146 = math.exp %145 : vector<16x16xf32>
    %cst_71 = arith.constant dense<0.000000e+00> : vector<16xf32>
    %147 = vector.multi_reduction <add>, %146, %cst_71 [1] : vector<16x16xf32> to vector<16xf32>
    %148 = vector.shape_cast %147 : vector<16xf32> to vector<16x1xf32>
    %149 = tpu.reciprocal %148 : vector<16x1xf32> -> vector<16x1xf32>
    %150 = vector.broadcast %149 : vector<16x1xf32> to vector<16x16xf32>
    %151 = arith.mulf %146, %150 : vector<16x16xf32>
    %cst_72 = arith.constant dense<0.000000e+00> : vector<4x16xf32>
    %152 = tpu.matmul %140, %151, %cst_72 {dimension_numbers = #tpu.dot_dimension_numbers<[1], [1], [0], [0], [0, 0, 1, 0], [], []>} : vector<4x16xf32>, vector<16x16xf32>, vector<4x16xf32> -> vector<4x16xf32>
    %153 = vector.broadcast %2 : f32 to vector<4x16xf32>
    %154 = arith.mulf %153, %152 : vector<4x16xf32>
    %155 = arith.addf %154, %134 : vector<4x16xf32>
    %c0_73 = arith.constant 0 : index
    %c0_74 = arith.constant 0 : index
    %c5_75 = arith.constant 5 : index
    %c0_76 = arith.constant 0 : index
    %156 = vector.load %arg5[%c0_73, %c0_74, %c5_75, %c0_76] : memref<1x4x16x16xf32, #tpu.memory_space<vmem>>, vector<1x4x1x16xf32>
    %157 = vector.shape_cast %156 : vector<1x4x1x16xf32> to vector<4x16xf32>
    %158 = vector.shape_cast %155 : vector<4x16xf32> to vector<1x4x1x16xf32>
    tpu.vector_store %arg5[%c0_73, %c0_74, %c5_75, %c0_76], %158 {strides = array<i32>} : memref<1x4x16x16xf32, #tpu.memory_space<vmem>>, vector<1x4x1x16xf32>,
    %c0_77 = arith.constant 0 : index
    %c0_78 = arith.constant 0 : index
    %c6 = arith.constant 6 : index
    %c0_79 = arith.constant 0 : index
    %159 = vector.load %arg4[%c0_77, %c0_78, %c6, %c0_79] : memref<1x4x16x16xf32, #tpu.memory_space<vmem>>, vector<1x4x1x16xf32>
    %160 = vector.shape_cast %159 : vector<1x4x1x16xf32> to vector<4x16xf32>
    %cst_80 = arith.constant dense<0.000000e+00> : vector<20x16xf32>
    %161 = tpu.matmul %0, %160, %cst_80 {dimension_numbers = #tpu.dot_dimension_numbers<[1], [0], [0], [1], [0, 0, 1, 1], [], []>} : vector<20x4xf32>, vector<4x16xf32>, vector<20x16xf32> -> vector<20x16xf32>
    %162 = vector.broadcast %1 : vector<20x1xf32> to vector<20x16xf32>
    %163 = arith.addf %161, %162 : vector<20x16xf32>
    %164 = vector.extract_strided_slice %163 {offsets = [0, 0], sizes = [8, 16], strides = [1, 1]} : vector<20x16xf32> to vector<8x16xf32>
    %165 = vector.extract_strided_slice %163 {offsets = [8, 0], sizes = [8, 16], strides = [1, 1]} : vector<20x16xf32> to vector<8x16xf32>
    %166 = vector.extract_strided_slice %163 {offsets = [16, 0], sizes = [4, 16], strides = [1, 1]} : vector<20x16xf32> to vector<4x16xf32>
    %cst_81 = arith.constant dense<0.000000e+00> : vector<16x16xf32>
    %167 = tpu.matmul %164, %165, %cst_81 {dimension_numbers = #tpu.dot_dimension_numbers<[0], [0], [1], [1], [0, 1, 1, 1], [], []>} : vector<8x16xf32>, vector<8x16xf32>, vector<16x16xf32> -> vector<16x16xf32>
    %cst_82 = arith.constant dense<0xFF800000> : vector<16xf32>
    %168 = vector.multi_reduction <maximumf>, %167, %cst_82 [1] : vector<16x16xf32> to vector<16xf32>
    %169 = vector.shape_cast %168 : vector<16xf32> to vector<16x1xf32>
    %170 = vector.broadcast %169 : vector<16x1xf32> to vector<16x16xf32>
    %171 = arith.subf %167, %170 : vector<16x16xf32>
    %172 = math.exp %171 : vector<16x16xf32>
    %cst_83 = arith.constant dense<0.000000e+00> : vector<16xf32>
    %173 = vector.multi_reduction <add>, %172, %cst_83 [1] : vector<16x16xf32> to vector<16xf32>
    %174 = vector.shape_cast %173 : vector<16xf32> to vector<16x1xf32>
    %175 = tpu.reciprocal %174 : vector<16x1xf32> -> vector<16x1xf32>
    %176 = vector.broadcast %175 : vector<16x1xf32> to vector<16x16xf32>
    %177 = arith.mulf %172, %176 : vector<16x16xf32>
    %cst_84 = arith.constant dense<0.000000e+00> : vector<4x16xf32>
    %178 = tpu.matmul %166, %177, %cst_84 {dimension_numbers = #tpu.dot_dimension_numbers<[1], [1], [0], [0], [0, 0, 1, 0], [], []>} : vector<4x16xf32>, vector<16x16xf32>, vector<4x16xf32> -> vector<4x16xf32>
    %179 = vector.broadcast %2 : f32 to vector<4x16xf32>
    %180 = arith.mulf %179, %178 : vector<4x16xf32>
    %181 = arith.addf %180, %160 : vector<4x16xf32>
    %c0_85 = arith.constant 0 : index
    %c0_86 = arith.constant 0 : index
    %c6_87 = arith.constant 6 : index
    %c0_88 = arith.constant 0 : index
    %182 = vector.load %arg5[%c0_85, %c0_86, %c6_87, %c0_88] : memref<1x4x16x16xf32, #tpu.memory_space<vmem>>, vector<1x4x1x16xf32>
    %183 = vector.shape_cast %182 : vector<1x4x1x16xf32> to vector<4x16xf32>
    %184 = vector.shape_cast %181 : vector<4x16xf32> to vector<1x4x1x16xf32>
    tpu.vector_store %arg5[%c0_85, %c0_86, %c6_87, %c0_88], %184 {strides = array<i32>} : memref<1x4x16x16xf32, #tpu.memory_space<vmem>>, vector<1x4x1x16xf32>,
    %c0_89 = arith.constant 0 : index
    %c0_90 = arith.constant 0 : index
    %c7 = arith.constant 7 : index
    %c0_91 = arith.constant 0 : index
    %185 = vector.load %arg4[%c0_89, %c0_90, %c7, %c0_91] : memref<1x4x16x16xf32, #tpu.memory_space<vmem>>, vector<1x4x1x16xf32>
    %186 = vector.shape_cast %185 : vector<1x4x1x16xf32> to vector<4x16xf32>
    %cst_92 = arith.constant dense<0.000000e+00> : vector<20x16xf32>
    %187 = tpu.matmul %0, %186, %cst_92 {dimension_numbers = #tpu.dot_dimension_numbers<[1], [0], [0], [1], [0, 0, 1, 1], [], []>} : vector<20x4xf32>, vector<4x16xf32>, vector<20x16xf32> -> vector<20x16xf32>
    %188 = vector.broadcast %1 : vector<20x1xf32> to vector<20x16xf32>
    %189 = arith.addf %187, %188 : vector<20x16xf32>
    %190 = vector.extract_strided_slice %189 {offsets = [0, 0], sizes = [8, 16], strides = [1, 1]} : vector<20x16xf32> to vector<8x16xf32>
    %191 = vector.extract_strided_slice %189 {offsets = [8, 0], sizes = [8, 16], strides = [1, 1]} : vector<20x16xf32> to vector<8x16xf32>
    %192 = vector.extract_strided_slice %189 {offsets = [16, 0], sizes = [4, 16], strides = [1, 1]} : vector<20x16xf32> to vector<4x16xf32>
    %cst_93 = arith.constant dense<0.000000e+00> : vector<16x16xf32>
    %193 = tpu.matmul %190, %191, %cst_93 {dimension_numbers = #tpu.dot_dimension_numbers<[0], [0], [1], [1], [0, 1, 1, 1], [], []>} : vector<8x16xf32>, vector<8x16xf32>, vector<16x16xf32> -> vector<16x16xf32>
    %cst_94 = arith.constant dense<0xFF800000> : vector<16xf32>
    %194 = vector.multi_reduction <maximumf>, %193, %cst_94 [1] : vector<16x16xf32> to vector<16xf32>
    %195 = vector.shape_cast %194 : vector<16xf32> to vector<16x1xf32>
    %196 = vector.broadcast %195 : vector<16x1xf32> to vector<16x16xf32>
    %197 = arith.subf %193, %196 : vector<16x16xf32>
    %198 = math.exp %197 : vector<16x16xf32>
    %cst_95 = arith.constant dense<0.000000e+00> : vector<16xf32>
    %199 = vector.multi_reduction <add>, %198, %cst_95 [1] : vector<16x16xf32> to vector<16xf32>
    %200 = vector.shape_cast %199 : vector<16xf32> to vector<16x1xf32>
    %201 = tpu.reciprocal %200 : vector<16x1xf32> -> vector<16x1xf32>
    %202 = vector.broadcast %201 : vector<16x1xf32> to vector<16x16xf32>
    %203 = arith.mulf %198, %202 : vector<16x16xf32>
    %cst_96 = arith.constant dense<0.000000e+00> : vector<4x16xf32>
    %204 = tpu.matmul %192, %203, %cst_96 {dimension_numbers = #tpu.dot_dimension_numbers<[1], [1], [0], [0], [0, 0, 1, 0], [], []>} : vector<4x16xf32>, vector<16x16xf32>, vector<4x16xf32> -> vector<4x16xf32>
    %205 = vector.broadcast %2 : f32 to vector<4x16xf32>
    %206 = arith.mulf %205, %204 : vector<4x16xf32>
    %207 = arith.addf %206, %186 : vector<4x16xf32>
    %c0_97 = arith.constant 0 : index
    %c0_98 = arith.constant 0 : index
    %c7_99 = arith.constant 7 : index
    %c0_100 = arith.constant 0 : index
    %208 = vector.load %arg5[%c0_97, %c0_98, %c7_99, %c0_100] : memref<1x4x16x16xf32, #tpu.memory_space<vmem>>, vector<1x4x1x16xf32>
    %209 = vector.shape_cast %208 : vector<1x4x1x16xf32> to vector<4x16xf32>
    %210 = vector.shape_cast %207 : vector<4x16xf32> to vector<1x4x1x16xf32>
    tpu.vector_store %arg5[%c0_97, %c0_98, %c7_99, %c0_100], %210 {strides = array<i32>} : memref<1x4x16x16xf32, #tpu.memory_space<vmem>>, vector<1x4x1x16xf32>,
    %c0_101 = arith.constant 0 : index
    %c0_102 = arith.constant 0 : index
    %c8 = arith.constant 8 : index
    %c0_103 = arith.constant 0 : index
    %211 = vector.load %arg4[%c0_101, %c0_102, %c8, %c0_103] : memref<1x4x16x16xf32, #tpu.memory_space<vmem>>, vector<1x4x1x16xf32>
    %212 = vector.shape_cast %211 : vector<1x4x1x16xf32> to vector<4x16xf32>
    %cst_104 = arith.constant dense<0.000000e+00> : vector<20x16xf32>
    %213 = tpu.matmul %0, %212, %cst_104 {dimension_numbers = #tpu.dot_dimension_numbers<[1], [0], [0], [1], [0, 0, 1, 1], [], []>} : vector<20x4xf32>, vector<4x16xf32>, vector<20x16xf32> -> vector<20x16xf32>
    %214 = vector.broadcast %1 : vector<20x1xf32> to vector<20x16xf32>
    %215 = arith.addf %213, %214 : vector<20x16xf32>
    %216 = vector.extract_strided_slice %215 {offsets = [0, 0], sizes = [8, 16], strides = [1, 1]} : vector<20x16xf32> to vector<8x16xf32>
    %217 = vector.extract_strided_slice %215 {offsets = [8, 0], sizes = [8, 16], strides = [1, 1]} : vector<20x16xf32> to vector<8x16xf32>
    %218 = vector.extract_strided_slice %215 {offsets = [16, 0], sizes = [4, 16], strides = [1, 1]} : vector<20x16xf32> to vector<4x16xf32>
    %cst_105 = arith.constant dense<0.000000e+00> : vector<16x16xf32>
    %219 = tpu.matmul %216, %217, %cst_105 {dimension_numbers = #tpu.dot_dimension_numbers<[0], [0], [1], [1], [0, 1, 1, 1], [], []>} : vector<8x16xf32>, vector<8x16xf32>, vector<16x16xf32> -> vector<16x16xf32>
    %cst_106 = arith.constant dense<0xFF800000> : vector<16xf32>
    %220 = vector.multi_reduction <maximumf>, %219, %cst_106 [1] : vector<16x16xf32> to vector<16xf32>
    %221 = vector.shape_cast %220 : vector<16xf32> to vector<16x1xf32>
    %222 = vector.broadcast %221 : vector<16x1xf32> to vector<16x16xf32>
    %223 = arith.subf %219, %222 : vector<16x16xf32>
    %224 = math.exp %223 : vector<16x16xf32>
    %cst_107 = arith.constant dense<0.000000e+00> : vector<16xf32>
    %225 = vector.multi_reduction <add>, %224, %cst_107 [1] : vector<16x16xf32> to vector<16xf32>
    %226 = vector.shape_cast %225 : vector<16xf32> to vector<16x1xf32>
    %227 = tpu.reciprocal %226 : vector<16x1xf32> -> vector<16x1xf32>
    %228 = vector.broadcast %227 : vector<16x1xf32> to vector<16x16xf32>
    %229 = arith.mulf %224, %228 : vector<16x16xf32>
    %cst_108 = arith.constant dense<0.000000e+00> : vector<4x16xf32>
    %230 = tpu.matmul %218, %229, %cst_108 {dimension_numbers = #tpu.dot_dimension_numbers<[1], [1], [0], [0], [0, 0, 1, 0], [], []>} : vector<4x16xf32>, vector<16x16xf32>, vector<4x16xf32> -> vector<4x16xf32>
    %231 = vector.broadcast %2 : f32 to vector<4x16xf32>
    %232 = arith.mulf %231, %230 : vector<4x16xf32>
    %233 = arith.addf %232, %212 : vector<4x16xf32>
    %c0_109 = arith.constant 0 : index
    %c0_110 = arith.constant 0 : index
    %c8_111 = arith.constant 8 : index
    %c0_112 = arith.constant 0 : index
    %234 = vector.load %arg5[%c0_109, %c0_110, %c8_111, %c0_112] : memref<1x4x16x16xf32, #tpu.memory_space<vmem>>, vector<1x4x1x16xf32>
    %235 = vector.shape_cast %234 : vector<1x4x1x16xf32> to vector<4x16xf32>
    %236 = vector.shape_cast %233 : vector<4x16xf32> to vector<1x4x1x16xf32>
    tpu.vector_store %arg5[%c0_109, %c0_110, %c8_111, %c0_112], %236 {strides = array<i32>} : memref<1x4x16x16xf32, #tpu.memory_space<vmem>>, vector<1x4x1x16xf32>,
    %c0_113 = arith.constant 0 : index
    %c0_114 = arith.constant 0 : index
    %c9 = arith.constant 9 : index
    %c0_115 = arith.constant 0 : index
    %237 = vector.load %arg4[%c0_113, %c0_114, %c9, %c0_115] : memref<1x4x16x16xf32, #tpu.memory_space<vmem>>, vector<1x4x1x16xf32>
    %238 = vector.shape_cast %237 : vector<1x4x1x16xf32> to vector<4x16xf32>
    %cst_116 = arith.constant dense<0.000000e+00> : vector<20x16xf32>
    %239 = tpu.matmul %0, %238, %cst_116 {dimension_numbers = #tpu.dot_dimension_numbers<[1], [0], [0], [1], [0, 0, 1, 1], [], []>} : vector<20x4xf32>, vector<4x16xf32>, vector<20x16xf32> -> vector<20x16xf32>
    %240 = vector.broadcast %1 : vector<20x1xf32> to vector<20x16xf32>
    %241 = arith.addf %239, %240 : vector<20x16xf32>
    %242 = vector.extract_strided_slice %241 {offsets = [0, 0], sizes = [8, 16], strides = [1, 1]} : vector<20x16xf32> to vector<8x16xf32>
    %243 = vector.extract_strided_slice %241 {offsets = [8, 0], sizes = [8, 16], strides = [1, 1]} : vector<20x16xf32> to vector<8x16xf32>
    %244 = vector.extract_strided_slice %241 {offsets = [16, 0], sizes = [4, 16], strides = [1, 1]} : vector<20x16xf32> to vector<4x16xf32>
    %cst_117 = arith.constant dense<0.000000e+00> : vector<16x16xf32>
    %245 = tpu.matmul %242, %243, %cst_117 {dimension_numbers = #tpu.dot_dimension_numbers<[0], [0], [1], [1], [0, 1, 1, 1], [], []>} : vector<8x16xf32>, vector<8x16xf32>, vector<16x16xf32> -> vector<16x16xf32>
    %cst_118 = arith.constant dense<0xFF800000> : vector<16xf32>
    %246 = vector.multi_reduction <maximumf>, %245, %cst_118 [1] : vector<16x16xf32> to vector<16xf32>
    %247 = vector.shape_cast %246 : vector<16xf32> to vector<16x1xf32>
    %248 = vector.broadcast %247 : vector<16x1xf32> to vector<16x16xf32>
    %249 = arith.subf %245, %248 : vector<16x16xf32>
    %250 = math.exp %249 : vector<16x16xf32>
    %cst_119 = arith.constant dense<0.000000e+00> : vector<16xf32>
    %251 = vector.multi_reduction <add>, %250, %cst_119 [1] : vector<16x16xf32> to vector<16xf32>
    %252 = vector.shape_cast %251 : vector<16xf32> to vector<16x1xf32>
    %253 = tpu.reciprocal %252 : vector<16x1xf32> -> vector<16x1xf32>
    %254 = vector.broadcast %253 : vector<16x1xf32> to vector<16x16xf32>
    %255 = arith.mulf %250, %254 : vector<16x16xf32>
    %cst_120 = arith.constant dense<0.000000e+00> : vector<4x16xf32>
    %256 = tpu.matmul %244, %255, %cst_120 {dimension_numbers = #tpu.dot_dimension_numbers<[1], [1], [0], [0], [0, 0, 1, 0], [], []>} : vector<4x16xf32>, vector<16x16xf32>, vector<4x16xf32> -> vector<4x16xf32>
    %257 = vector.broadcast %2 : f32 to vector<4x16xf32>
    %258 = arith.mulf %257, %256 : vector<4x16xf32>
    %259 = arith.addf %258, %238 : vector<4x16xf32>
    %c0_121 = arith.constant 0 : index
    %c0_122 = arith.constant 0 : index
    %c9_123 = arith.constant 9 : index
    %c0_124 = arith.constant 0 : index
    %260 = vector.load %arg5[%c0_121, %c0_122, %c9_123, %c0_124] : memref<1x4x16x16xf32, #tpu.memory_space<vmem>>, vector<1x4x1x16xf32>
    %261 = vector.shape_cast %260 : vector<1x4x1x16xf32> to vector<4x16xf32>
    %262 = vector.shape_cast %259 : vector<4x16xf32> to vector<1x4x1x16xf32>
    tpu.vector_store %arg5[%c0_121, %c0_122, %c9_123, %c0_124], %262 {strides = array<i32>} : memref<1x4x16x16xf32, #tpu.memory_space<vmem>>, vector<1x4x1x16xf32>,
    %c0_125 = arith.constant 0 : index
    %c0_126 = arith.constant 0 : index
    %c10 = arith.constant 10 : index
    %c0_127 = arith.constant 0 : index
    %263 = vector.load %arg4[%c0_125, %c0_126, %c10, %c0_127] : memref<1x4x16x16xf32, #tpu.memory_space<vmem>>, vector<1x4x1x16xf32>
    %264 = vector.shape_cast %263 : vector<1x4x1x16xf32> to vector<4x16xf32>
    %cst_128 = arith.constant dense<0.000000e+00> : vector<20x16xf32>
    %265 = tpu.matmul %0, %264, %cst_128 {dimension_numbers = #tpu.dot_dimension_numbers<[1], [0], [0], [1], [0, 0, 1, 1], [], []>} : vector<20x4xf32>, vector<4x16xf32>, vector<20x16xf32> -> vector<20x16xf32>
    %266 = vector.broadcast %1 : vector<20x1xf32> to vector<20x16xf32>
    %267 = arith.addf %265, %266 : vector<20x16xf32>
    %268 = vector.extract_strided_slice %267 {offsets = [0, 0], sizes = [8, 16], strides = [1, 1]} : vector<20x16xf32> to vector<8x16xf32>
    %269 = vector.extract_strided_slice %267 {offsets = [8, 0], sizes = [8, 16], strides = [1, 1]} : vector<20x16xf32> to vector<8x16xf32>
    %270 = vector.extract_strided_slice %267 {offsets = [16, 0], sizes = [4, 16], strides = [1, 1]} : vector<20x16xf32> to vector<4x16xf32>
    %cst_129 = arith.constant dense<0.000000e+00> : vector<16x16xf32>
    %271 = tpu.matmul %268, %269, %cst_129 {dimension_numbers = #tpu.dot_dimension_numbers<[0], [0], [1], [1], [0, 1, 1, 1], [], []>} : vector<8x16xf32>, vector<8x16xf32>, vector<16x16xf32> -> vector<16x16xf32>
    %cst_130 = arith.constant dense<0xFF800000> : vector<16xf32>
    %272 = vector.multi_reduction <maximumf>, %271, %cst_130 [1] : vector<16x16xf32> to vector<16xf32>
    %273 = vector.shape_cast %272 : vector<16xf32> to vector<16x1xf32>
    %274 = vector.broadcast %273 : vector<16x1xf32> to vector<16x16xf32>
    %275 = arith.subf %271, %274 : vector<16x16xf32>
    %276 = math.exp %275 : vector<16x16xf32>
    %cst_131 = arith.constant dense<0.000000e+00> : vector<16xf32>
    %277 = vector.multi_reduction <add>, %276, %cst_131 [1] : vector<16x16xf32> to vector<16xf32>
    %278 = vector.shape_cast %277 : vector<16xf32> to vector<16x1xf32>
    %279 = tpu.reciprocal %278 : vector<16x1xf32> -> vector<16x1xf32>
    %280 = vector.broadcast %279 : vector<16x1xf32> to vector<16x16xf32>
    %281 = arith.mulf %276, %280 : vector<16x16xf32>
    %cst_132 = arith.constant dense<0.000000e+00> : vector<4x16xf32>
    %282 = tpu.matmul %270, %281, %cst_132 {dimension_numbers = #tpu.dot_dimension_numbers<[1], [1], [0], [0], [0, 0, 1, 0], [], []>} : vector<4x16xf32>, vector<16x16xf32>, vector<4x16xf32> -> vector<4x16xf32>
    %283 = vector.broadcast %2 : f32 to vector<4x16xf32>
    %284 = arith.mulf %283, %282 : vector<4x16xf32>
    %285 = arith.addf %284, %264 : vector<4x16xf32>
    %c0_133 = arith.constant 0 : index
    %c0_134 = arith.constant 0 : index
    %c10_135 = arith.constant 10 : index
    %c0_136 = arith.constant 0 : index
    %286 = vector.load %arg5[%c0_133, %c0_134, %c10_135, %c0_136] : memref<1x4x16x16xf32, #tpu.memory_space<vmem>>, vector<1x4x1x16xf32>
    %287 = vector.shape_cast %286 : vector<1x4x1x16xf32> to vector<4x16xf32>
    %288 = vector.shape_cast %285 : vector<4x16xf32> to vector<1x4x1x16xf32>
    tpu.vector_store %arg5[%c0_133, %c0_134, %c10_135, %c0_136], %288 {strides = array<i32>} : memref<1x4x16x16xf32, #tpu.memory_space<vmem>>, vector<1x4x1x16xf32>,
    %c0_137 = arith.constant 0 : index
    %c0_138 = arith.constant 0 : index
    %c11 = arith.constant 11 : index
    %c0_139 = arith.constant 0 : index
    %289 = vector.load %arg4[%c0_137, %c0_138, %c11, %c0_139] : memref<1x4x16x16xf32, #tpu.memory_space<vmem>>, vector<1x4x1x16xf32>
    %290 = vector.shape_cast %289 : vector<1x4x1x16xf32> to vector<4x16xf32>
    %cst_140 = arith.constant dense<0.000000e+00> : vector<20x16xf32>
    %291 = tpu.matmul %0, %290, %cst_140 {dimension_numbers = #tpu.dot_dimension_numbers<[1], [0], [0], [1], [0, 0, 1, 1], [], []>} : vector<20x4xf32>, vector<4x16xf32>, vector<20x16xf32> -> vector<20x16xf32>
    %292 = vector.broadcast %1 : vector<20x1xf32> to vector<20x16xf32>
    %293 = arith.addf %291, %292 : vector<20x16xf32>
    %294 = vector.extract_strided_slice %293 {offsets = [0, 0], sizes = [8, 16], strides = [1, 1]} : vector<20x16xf32> to vector<8x16xf32>
    %295 = vector.extract_strided_slice %293 {offsets = [8, 0], sizes = [8, 16], strides = [1, 1]} : vector<20x16xf32> to vector<8x16xf32>
    %296 = vector.extract_strided_slice %293 {offsets = [16, 0], sizes = [4, 16], strides = [1, 1]} : vector<20x16xf32> to vector<4x16xf32>
    %cst_141 = arith.constant dense<0.000000e+00> : vector<16x16xf32>
    %297 = tpu.matmul %294, %295, %cst_141 {dimension_numbers = #tpu.dot_dimension_numbers<[0], [0], [1], [1], [0, 1, 1, 1], [], []>} : vector<8x16xf32>, vector<8x16xf32>, vector<16x16xf32> -> vector<16x16xf32>
    %cst_142 = arith.constant dense<0xFF800000> : vector<16xf32>
    %298 = vector.multi_reduction <maximumf>, %297, %cst_142 [1] : vector<16x16xf32> to vector<16xf32>
    %299 = vector.shape_cast %298 : vector<16xf32> to vector<16x1xf32>
    %300 = vector.broadcast %299 : vector<16x1xf32> to vector<16x16xf32>
    %301 = arith.subf %297, %300 : vector<16x16xf32>
    %302 = math.exp %301 : vector<16x16xf32>
    %cst_143 = arith.constant dense<0.000000e+00> : vector<16xf32>
    %303 = vector.multi_reduction <add>, %302, %cst_143 [1] : vector<16x16xf32> to vector<16xf32>
    %304 = vector.shape_cast %303 : vector<16xf32> to vector<16x1xf32>
    %305 = tpu.reciprocal %304 : vector<16x1xf32> -> vector<16x1xf32>
    %306 = vector.broadcast %305 : vector<16x1xf32> to vector<16x16xf32>
    %307 = arith.mulf %302, %306 : vector<16x16xf32>
    %cst_144 = arith.constant dense<0.000000e+00> : vector<4x16xf32>
    %308 = tpu.matmul %296, %307, %cst_144 {dimension_numbers = #tpu.dot_dimension_numbers<[1], [1], [0], [0], [0, 0, 1, 0], [], []>} : vector<4x16xf32>, vector<16x16xf32>, vector<4x16xf32> -> vector<4x16xf32>
    %309 = vector.broadcast %2 : f32 to vector<4x16xf32>
    %310 = arith.mulf %309, %308 : vector<4x16xf32>
    %311 = arith.addf %310, %290 : vector<4x16xf32>
    %c0_145 = arith.constant 0 : index
    %c0_146 = arith.constant 0 : index
    %c11_147 = arith.constant 11 : index
    %c0_148 = arith.constant 0 : index
    %312 = vector.load %arg5[%c0_145, %c0_146, %c11_147, %c0_148] : memref<1x4x16x16xf32, #tpu.memory_space<vmem>>, vector<1x4x1x16xf32>
    %313 = vector.shape_cast %312 : vector<1x4x1x16xf32> to vector<4x16xf32>
    %314 = vector.shape_cast %311 : vector<4x16xf32> to vector<1x4x1x16xf32>
    tpu.vector_store %arg5[%c0_145, %c0_146, %c11_147, %c0_148], %314 {strides = array<i32>} : memref<1x4x16x16xf32, #tpu.memory_space<vmem>>, vector<1x4x1x16xf32>,
    %c0_149 = arith.constant 0 : index
    %c0_150 = arith.constant 0 : index
    %c12 = arith.constant 12 : index
    %c0_151 = arith.constant 0 : index
    %315 = vector.load %arg4[%c0_149, %c0_150, %c12, %c0_151] : memref<1x4x16x16xf32, #tpu.memory_space<vmem>>, vector<1x4x1x16xf32>
    %316 = vector.shape_cast %315 : vector<1x4x1x16xf32> to vector<4x16xf32>
    %cst_152 = arith.constant dense<0.000000e+00> : vector<20x16xf32>
    %317 = tpu.matmul %0, %316, %cst_152 {dimension_numbers = #tpu.dot_dimension_numbers<[1], [0], [0], [1], [0, 0, 1, 1], [], []>} : vector<20x4xf32>, vector<4x16xf32>, vector<20x16xf32> -> vector<20x16xf32>
    %318 = vector.broadcast %1 : vector<20x1xf32> to vector<20x16xf32>
    %319 = arith.addf %317, %318 : vector<20x16xf32>
    %320 = vector.extract_strided_slice %319 {offsets = [0, 0], sizes = [8, 16], strides = [1, 1]} : vector<20x16xf32> to vector<8x16xf32>
    %321 = vector.extract_strided_slice %319 {offsets = [8, 0], sizes = [8, 16], strides = [1, 1]} : vector<20x16xf32> to vector<8x16xf32>
    %322 = vector.extract_strided_slice %319 {offsets = [16, 0], sizes = [4, 16], strides = [1, 1]} : vector<20x16xf32> to vector<4x16xf32>
    %cst_153 = arith.constant dense<0.000000e+00> : vector<16x16xf32>
    %323 = tpu.matmul %320, %321, %cst_153 {dimension_numbers = #tpu.dot_dimension_numbers<[0], [0], [1], [1], [0, 1, 1, 1], [], []>} : vector<8x16xf32>, vector<8x16xf32>, vector<16x16xf32> -> vector<16x16xf32>
    %cst_154 = arith.constant dense<0xFF800000> : vector<16xf32>
    %324 = vector.multi_reduction <maximumf>, %323, %cst_154 [1] : vector<16x16xf32> to vector<16xf32>
    %325 = vector.shape_cast %324 : vector<16xf32> to vector<16x1xf32>
    %326 = vector.broadcast %325 : vector<16x1xf32> to vector<16x16xf32>
    %327 = arith.subf %323, %326 : vector<16x16xf32>
    %328 = math.exp %327 : vector<16x16xf32>
    %cst_155 = arith.constant dense<0.000000e+00> : vector<16xf32>
    %329 = vector.multi_reduction <add>, %328, %cst_155 [1] : vector<16x16xf32> to vector<16xf32>
    %330 = vector.shape_cast %329 : vector<16xf32> to vector<16x1xf32>
    %331 = tpu.reciprocal %330 : vector<16x1xf32> -> vector<16x1xf32>
    %332 = vector.broadcast %331 : vector<16x1xf32> to vector<16x16xf32>
    %333 = arith.mulf %328, %332 : vector<16x16xf32>
    %cst_156 = arith.constant dense<0.000000e+00> : vector<4x16xf32>
    %334 = tpu.matmul %322, %333, %cst_156 {dimension_numbers = #tpu.dot_dimension_numbers<[1], [1], [0], [0], [0, 0, 1, 0], [], []>} : vector<4x16xf32>, vector<16x16xf32>, vector<4x16xf32> -> vector<4x16xf32>
    %335 = vector.broadcast %2 : f32 to vector<4x16xf32>
    %336 = arith.mulf %335, %334 : vector<4x16xf32>
    %337 = arith.addf %336, %316 : vector<4x16xf32>
    %c0_157 = arith.constant 0 : index
    %c0_158 = arith.constant 0 : index
    %c12_159 = arith.constant 12 : index
    %c0_160 = arith.constant 0 : index
    %338 = vector.load %arg5[%c0_157, %c0_158, %c12_159, %c0_160] : memref<1x4x16x16xf32, #tpu.memory_space<vmem>>, vector<1x4x1x16xf32>
    %339 = vector.shape_cast %338 : vector<1x4x1x16xf32> to vector<4x16xf32>
    %340 = vector.shape_cast %337 : vector<4x16xf32> to vector<1x4x1x16xf32>
    tpu.vector_store %arg5[%c0_157, %c0_158, %c12_159, %c0_160], %340 {strides = array<i32>} : memref<1x4x16x16xf32, #tpu.memory_space<vmem>>, vector<1x4x1x16xf32>,
    %c0_161 = arith.constant 0 : index
    %c0_162 = arith.constant 0 : index
    %c13 = arith.constant 13 : index
    %c0_163 = arith.constant 0 : index
    %341 = vector.load %arg4[%c0_161, %c0_162, %c13, %c0_163] : memref<1x4x16x16xf32, #tpu.memory_space<vmem>>, vector<1x4x1x16xf32>
    %342 = vector.shape_cast %341 : vector<1x4x1x16xf32> to vector<4x16xf32>
    %cst_164 = arith.constant dense<0.000000e+00> : vector<20x16xf32>
    %343 = tpu.matmul %0, %342, %cst_164 {dimension_numbers = #tpu.dot_dimension_numbers<[1], [0], [0], [1], [0, 0, 1, 1], [], []>} : vector<20x4xf32>, vector<4x16xf32>, vector<20x16xf32> -> vector<20x16xf32>
    %344 = vector.broadcast %1 : vector<20x1xf32> to vector<20x16xf32>
    %345 = arith.addf %343, %344 : vector<20x16xf32>
    %346 = vector.extract_strided_slice %345 {offsets = [0, 0], sizes = [8, 16], strides = [1, 1]} : vector<20x16xf32> to vector<8x16xf32>
    %347 = vector.extract_strided_slice %345 {offsets = [8, 0], sizes = [8, 16], strides = [1, 1]} : vector<20x16xf32> to vector<8x16xf32>
    %348 = vector.extract_strided_slice %345 {offsets = [16, 0], sizes = [4, 16], strides = [1, 1]} : vector<20x16xf32> to vector<4x16xf32>
    %cst_165 = arith.constant dense<0.000000e+00> : vector<16x16xf32>
    %349 = tpu.matmul %346, %347, %cst_165 {dimension_numbers = #tpu.dot_dimension_numbers<[0], [0], [1], [1], [0, 1, 1, 1], [], []>} : vector<8x16xf32>, vector<8x16xf32>, vector<16x16xf32> -> vector<16x16xf32>
    %cst_166 = arith.constant dense<0xFF800000> : vector<16xf32>
    %350 = vector.multi_reduction <maximumf>, %349, %cst_166 [1] : vector<16x16xf32> to vector<16xf32>
    %351 = vector.shape_cast %350 : vector<16xf32> to vector<16x1xf32>
    %352 = vector.broadcast %351 : vector<16x1xf32> to vector<16x16xf32>
    %353 = arith.subf %349, %352 : vector<16x16xf32>
    %354 = math.exp %353 : vector<16x16xf32>
    %cst_167 = arith.constant dense<0.000000e+00> : vector<16xf32>
    %355 = vector.multi_reduction <add>, %354, %cst_167 [1] : vector<16x16xf32> to vector<16xf32>
    %356 = vector.shape_cast %355 : vector<16xf32> to vector<16x1xf32>
    %357 = tpu.reciprocal %356 : vector<16x1xf32> -> vector<16x1xf32>
    %358 = vector.broadcast %357 : vector<16x1xf32> to vector<16x16xf32>
    %359 = arith.mulf %354, %358 : vector<16x16xf32>
    %cst_168 = arith.constant dense<0.000000e+00> : vector<4x16xf32>
    %360 = tpu.matmul %348, %359, %cst_168 {dimension_numbers = #tpu.dot_dimension_numbers<[1], [1], [0], [0], [0, 0, 1, 0], [], []>} : vector<4x16xf32>, vector<16x16xf32>, vector<4x16xf32> -> vector<4x16xf32>
    %361 = vector.broadcast %2 : f32 to vector<4x16xf32>
    %362 = arith.mulf %361, %360 : vector<4x16xf32>
    %363 = arith.addf %362, %342 : vector<4x16xf32>
    %c0_169 = arith.constant 0 : index
    %c0_170 = arith.constant 0 : index
    %c13_171 = arith.constant 13 : index
    %c0_172 = arith.constant 0 : index
    %364 = vector.load %arg5[%c0_169, %c0_170, %c13_171, %c0_172] : memref<1x4x16x16xf32, #tpu.memory_space<vmem>>, vector<1x4x1x16xf32>
    %365 = vector.shape_cast %364 : vector<1x4x1x16xf32> to vector<4x16xf32>
    %366 = vector.shape_cast %363 : vector<4x16xf32> to vector<1x4x1x16xf32>
    tpu.vector_store %arg5[%c0_169, %c0_170, %c13_171, %c0_172], %366 {strides = array<i32>} : memref<1x4x16x16xf32, #tpu.memory_space<vmem>>, vector<1x4x1x16xf32>,
    %c0_173 = arith.constant 0 : index
    %c0_174 = arith.constant 0 : index
    %c14 = arith.constant 14 : index
    %c0_175 = arith.constant 0 : index
    %367 = vector.load %arg4[%c0_173, %c0_174, %c14, %c0_175] : memref<1x4x16x16xf32, #tpu.memory_space<vmem>>, vector<1x4x1x16xf32>
    %368 = vector.shape_cast %367 : vector<1x4x1x16xf32> to vector<4x16xf32>
    %cst_176 = arith.constant dense<0.000000e+00> : vector<20x16xf32>
    %369 = tpu.matmul %0, %368, %cst_176 {dimension_numbers = #tpu.dot_dimension_numbers<[1], [0], [0], [1], [0, 0, 1, 1], [], []>} : vector<20x4xf32>, vector<4x16xf32>, vector<20x16xf32> -> vector<20x16xf32>
    %370 = vector.broadcast %1 : vector<20x1xf32> to vector<20x16xf32>
    %371 = arith.addf %369, %370 : vector<20x16xf32>
    %372 = vector.extract_strided_slice %371 {offsets = [0, 0], sizes = [8, 16], strides = [1, 1]} : vector<20x16xf32> to vector<8x16xf32>
    %373 = vector.extract_strided_slice %371 {offsets = [8, 0], sizes = [8, 16], strides = [1, 1]} : vector<20x16xf32> to vector<8x16xf32>
    %374 = vector.extract_strided_slice %371 {offsets = [16, 0], sizes = [4, 16], strides = [1, 1]} : vector<20x16xf32> to vector<4x16xf32>
    %cst_177 = arith.constant dense<0.000000e+00> : vector<16x16xf32>
    %375 = tpu.matmul %372, %373, %cst_177 {dimension_numbers = #tpu.dot_dimension_numbers<[0], [0], [1], [1], [0, 1, 1, 1], [], []>} : vector<8x16xf32>, vector<8x16xf32>, vector<16x16xf32> -> vector<16x16xf32>
    %cst_178 = arith.constant dense<0xFF800000> : vector<16xf32>
    %376 = vector.multi_reduction <maximumf>, %375, %cst_178 [1] : vector<16x16xf32> to vector<16xf32>
    %377 = vector.shape_cast %376 : vector<16xf32> to vector<16x1xf32>
    %378 = vector.broadcast %377 : vector<16x1xf32> to vector<16x16xf32>
    %379 = arith.subf %375, %378 : vector<16x16xf32>
    %380 = math.exp %379 : vector<16x16xf32>
    %cst_179 = arith.constant dense<0.000000e+00> : vector<16xf32>
    %381 = vector.multi_reduction <add>, %380, %cst_179 [1] : vector<16x16xf32> to vector<16xf32>
    %382 = vector.shape_cast %381 : vector<16xf32> to vector<16x1xf32>
    %383 = tpu.reciprocal %382 : vector<16x1xf32> -> vector<16x1xf32>
    %384 = vector.broadcast %383 : vector<16x1xf32> to vector<16x16xf32>
    %385 = arith.mulf %380, %384 : vector<16x16xf32>
    %cst_180 = arith.constant dense<0.000000e+00> : vector<4x16xf32>
    %386 = tpu.matmul %374, %385, %cst_180 {dimension_numbers = #tpu.dot_dimension_numbers<[1], [1], [0], [0], [0, 0, 1, 0], [], []>} : vector<4x16xf32>, vector<16x16xf32>, vector<4x16xf32> -> vector<4x16xf32>
    %387 = vector.broadcast %2 : f32 to vector<4x16xf32>
    %388 = arith.mulf %387, %386 : vector<4x16xf32>
    %389 = arith.addf %388, %368 : vector<4x16xf32>
    %c0_181 = arith.constant 0 : index
    %c0_182 = arith.constant 0 : index
    %c14_183 = arith.constant 14 : index
    %c0_184 = arith.constant 0 : index
    %390 = vector.load %arg5[%c0_181, %c0_182, %c14_183, %c0_184] : memref<1x4x16x16xf32, #tpu.memory_space<vmem>>, vector<1x4x1x16xf32>
    %391 = vector.shape_cast %390 : vector<1x4x1x16xf32> to vector<4x16xf32>
    %392 = vector.shape_cast %389 : vector<4x16xf32> to vector<1x4x1x16xf32>
    tpu.vector_store %arg5[%c0_181, %c0_182, %c14_183, %c0_184], %392 {strides = array<i32>} : memref<1x4x16x16xf32, #tpu.memory_space<vmem>>, vector<1x4x1x16xf32>,
    %c0_185 = arith.constant 0 : index
    %c0_186 = arith.constant 0 : index
    %c15 = arith.constant 15 : index
    %c0_187 = arith.constant 0 : index
    %393 = vector.load %arg4[%c0_185, %c0_186, %c15, %c0_187] : memref<1x4x16x16xf32, #tpu.memory_space<vmem>>, vector<1x4x1x16xf32>
    %394 = vector.shape_cast %393 : vector<1x4x1x16xf32> to vector<4x16xf32>
    %cst_188 = arith.constant dense<0.000000e+00> : vector<20x16xf32>
    %395 = tpu.matmul %0, %394, %cst_188 {dimension_numbers = #tpu.dot_dimension_numbers<[1], [0], [0], [1], [0, 0, 1, 1], [], []>} : vector<20x4xf32>, vector<4x16xf32>, vector<20x16xf32> -> vector<20x16xf32>
    %396 = vector.broadcast %1 : vector<20x1xf32> to vector<20x16xf32>
    %397 = arith.addf %395, %396 : vector<20x16xf32>
    %398 = vector.extract_strided_slice %397 {offsets = [0, 0], sizes = [8, 16], strides = [1, 1]} : vector<20x16xf32> to vector<8x16xf32>
    %399 = vector.extract_strided_slice %397 {offsets = [8, 0], sizes = [8, 16], strides = [1, 1]} : vector<20x16xf32> to vector<8x16xf32>
    %400 = vector.extract_strided_slice %397 {offsets = [16, 0], sizes = [4, 16], strides = [1, 1]} : vector<20x16xf32> to vector<4x16xf32>
    %cst_189 = arith.constant dense<0.000000e+00> : vector<16x16xf32>
    %401 = tpu.matmul %398, %399, %cst_189 {dimension_numbers = #tpu.dot_dimension_numbers<[0], [0], [1], [1], [0, 1, 1, 1], [], []>} : vector<8x16xf32>, vector<8x16xf32>, vector<16x16xf32> -> vector<16x16xf32>
    %cst_190 = arith.constant dense<0xFF800000> : vector<16xf32>
    %402 = vector.multi_reduction <maximumf>, %401, %cst_190 [1] : vector<16x16xf32> to vector<16xf32>
    %403 = vector.shape_cast %402 : vector<16xf32> to vector<16x1xf32>
    %404 = vector.broadcast %403 : vector<16x1xf32> to vector<16x16xf32>
    %405 = arith.subf %401, %404 : vector<16x16xf32>
    %406 = math.exp %405 : vector<16x16xf32>
    %cst_191 = arith.constant dense<0.000000e+00> : vector<16xf32>
    %407 = vector.multi_reduction <add>, %406, %cst_191 [1] : vector<16x16xf32> to vector<16xf32>
    %408 = vector.shape_cast %407 : vector<16xf32> to vector<16x1xf32>
    %409 = tpu.reciprocal %408 : vector<16x1xf32> -> vector<16x1xf32>
    %410 = vector.broadcast %409 : vector<16x1xf32> to vector<16x16xf32>
    %411 = arith.mulf %406, %410 : vector<16x16xf32>
    %cst_192 = arith.constant dense<0.000000e+00> : vector<4x16xf32>
    %412 = tpu.matmul %400, %411, %cst_192 {dimension_numbers = #tpu.dot_dimension_numbers<[1], [1], [0], [0], [0, 0, 1, 0], [], []>} : vector<4x16xf32>, vector<16x16xf32>, vector<4x16xf32> -> vector<4x16xf32>
    %413 = vector.broadcast %2 : f32 to vector<4x16xf32>
    %414 = arith.mulf %413, %412 : vector<4x16xf32>
    %415 = arith.addf %414, %394 : vector<4x16xf32>
    %c0_193 = arith.constant 0 : index
    %c0_194 = arith.constant 0 : index
    %c15_195 = arith.constant 15 : index
    %c0_196 = arith.constant 0 : index
    %416 = vector.load %arg5[%c0_193, %c0_194, %c15_195, %c0_196] : memref<1x4x16x16xf32, #tpu.memory_space<vmem>>, vector<1x4x1x16xf32>
    %417 = vector.shape_cast %416 : vector<1x4x1x16xf32> to vector<4x16xf32>
    %418 = vector.shape_cast %415 : vector<4x16xf32> to vector<1x4x1x16xf32>
    tpu.vector_store %arg5[%c0_193, %c0_194, %c15_195, %c0_196], %418 {strides = array<i32>} : memref<1x4x16x16xf32, #tpu.memory_space<vmem>>, vector<1x4x1x16xf32>,
    return
  }
  func.func @transform_0(%arg0: i32) -> (i32, i32) {
    %c0_i32 = arith.constant 0 : i32
    %c0_i32_0 = arith.constant 0 : i32
    %c0_i32_1 = arith.constant 0 : i32
    return %c0_i32, %c0_i32_0 : i32, i32
  }
  func.func @transform_1(%arg0: i32) -> (i32, i32) {
    %c0_i32 = arith.constant 0 : i32
    %c0_i32_0 = arith.constant 0 : i32
    %c0_i32_1 = arith.constant 0 : i32
    return %c0_i32, %c0_i32_0 : i32, i32
  }
  func.func @transform_2(%arg0: i32) -> (i32, i32) {
    %c0_i32 = arith.constant 0 : i32
    %c0_i32_0 = arith.constant 0 : i32
    %c0_i32_1 = arith.constant 0 : i32
    return %c0_i32, %c0_i32_0 : i32, i32
  }
  func.func @transform_3(%arg0: i32) -> (i32, i32, i32, i32) {
    %c0_i32 = arith.constant 0 : i32
    %c0_i32_0 = arith.constant 0 : i32
    %c0_i32_1 = arith.constant 0 : i32
    %c0_i32_2 = arith.constant 0 : i32
    return %arg0, %c0_i32, %c0_i32_0, %c0_i32_1 : i32, i32, i32, i32
  }
  func.func @transform_4(%arg0: i32) -> (i32, i32, i32, i32) {
    %c0_i32 = arith.constant 0 : i32
    %c0_i32_0 = arith.constant 0 : i32
    %c0_i32_1 = arith.constant 0 : i32
    %c0_i32_2 = arith.constant 0 : i32
    return %arg0, %c0_i32, %c0_i32_0, %c0_i32_1 : i32, i32, i32, i32
  }
}

</mosaic_0001>

<bundles_post_ra>
// kernel: tpu_custom_call.1
= control target key start
LH: loop header
LB: loop body
LE: loop exit
PB: predicated region body
PF: predicated region fallthrough
CT: control target
= control target key end

     0   :  { %s4717_s0 = inlined_call_operand.vmem [shape: f32[20,4], index: 0, kind: input, shape index: {}]   ;;  %s4718_s1 = inlined_call_operand.vmem [shape: f32[20,1], index: 1, kind: input, shape index: {}]   ;;  %s4719_s2 = inlined_call_operand.<no memory space> [shape: f32[1,1], index: 2, kind: input, shape index: {}]   ;;  %s4720_s3 = inlined_call_operand.hbm [shape: f32[2,4,16,16], index: 3, kind: input, shape index: {}]   ;;  %s4721_s4 = inlined_call_operand.hbm [shape: f32[2,4,16,16], index: 4, kind: output, shape index: {}]  }
   0x1   :  { %9 = sst [smem:[#allocation2]] %s4719_s2 }
   0x2   :  { %10 = vsyncpa [#allocation4], 0 }
   0x3   :  { %12 = vsyncpa [#allocation4 + $0x1], 0 }
   0x4   :  { %13 = vsyncpa [#allocation5], 0 }
   0x5   :  { %15 = vsyncpa [#allocation5 + $0x1], 0  ;;  %s3925_s17 = smov 0   ;;  %s3927_s18 = smov 0  }
   0x6   :  { %s3929_s19 = smov 0   ;;  %s3931_s20 = smov 0  }
   0x7 LB: > { %s3946_s2 = sadd.s32 4294967295, %s3890_s20   ;;  %s3452_s21 = sadd.s32 4294967294, %s3890_s20   ;;  %s3890_s20 = sphi %s3931_s20, %s4731_s20   ;;  %s3886_s19 = sphi %s3929_s19, %s4730_s19   ;;  %s3882_s18 = sphi %s3927_s18, %s4729_s18   ;;  %s3878_s17 = sphi %s3925_s17, %s4728_s17  }
   0x8   : > { %s3950_s22 = sadd.s32 1, %s3890_s20   ;;  %s91_s23 = sadd.s32 1, %s3886_s19 }
   0x9   : > { %s88_s24 = ssub.s32 %s3890_s20, %s3950_s22  ;;  %p98_p0 = scmp.ne.s32.totalorder %s3886_s19, %s3882_s18 }
   0xa   : > { %p89_p1 = scmp.eq.s32.totalorder %s88_s24, 0  ;;  %p99_p2 = scmp.eq.s32.totalorder %s3890_s20, 0 }
   0xb   : > { %p104_p3 = scmp.ne.s32.totalorder %s3882_s18, %s3878_s17  ;;  %p105_p4 = scmp.eq.s32.totalorder %s3946_s2, 0 }
   0xc   : > { %s3962_s25 = scalar_select %p89_p1, %s3886_s19, %s91_s23  }
   0xd   : > { %p3964_p5 = por %p99_p2, %p98_p0  ;;  %p3968_p6 = por %p105_p4, %p104_p3 }
   0xe   : > { %p128_p7 = scmp.eq.s32.totalorder %s3946_s2, 1  ;;  %p134_p8 = scmp.eq.s32.totalorder %s3452_s21, 1 }
   0xf   : > { %p3624_p10 = scmp.lt.s32.totalorder %s3890_s20, 2  ;;  %s163_s30 = sand.u32 1, %s3886_s19  }
  0x10   : > { %p3975_p11 = por %p128_p7, %p98_p0  ;;  %p3979_p12 = por %p134_p8, %p104_p3 }
  0x11   : > { %s3610_s5 = sshll.u32 %s3890_s20, 6  ;;  %s3455_s6 = sshll.u32 %s163_s30, 6 }
  0x12   : > { %s172_s9 = scalar_lea.hbm %s4720_s3, %s3610_s5  ;;  %s167_s11 = scalar_lea.vmem [#allocation3], %s3455_s6 }
  0x13   : > { %s173_s10 = sshll.u32 %s172_s9, 4  ;;  %s175_s12 = sshll.u32 %s167_s11, 4  ;;  %s174_s10 = int_to_ptr.hbm [resolvable:$true] %s173_s10  ;;  %s176_s12 = int_to_ptr.vmem [resolvable:$true] %s175_s12 }
  0x14   : > { %p3990_p13 = pnand %p3624_p10, %p3964_p5  ;;  %p3458_p0 = scmp.ge.s32.totalorder %s3890_s20, 1 }
  0x15   : > { %p183_p1 = scmp.lt.s32.totalorder %s3890_s20, 3  ;;  %s164_s14 = scalar_lea.sflag [#allocation4], %s163_s30 }
  0x16   : > { %s3794_s15 = sshra.s32 %s174_s10, 4  ;;  %p3798_p3 = pneg %p3990_p13  ;;  %s3795_s15 = int_to_ptr.hbm [resolvable:$true] %s3794_s15 }
  0x17   : > { %s3796_s16 = scalar_lea.hbm %s3795_s15, 64  ;;  %s3801_s24 = scalar_lea.hbm %s4720_s3, 128 }
  0x18   : > { %p3797_p2 = scmp.ne.s32.totalorder %s3795_s15, %s3796_s16  ;;  %p3802_p5 = scmp.lt.s32.totalorder %s3795_s15, %s4720_s3 }
  0x19   : > { %p3803_p8 = scmp.lt.s32.totalorder %s3801_s24, %s3796_s16 }
  0x1a   : > { %p3799_p4 = pnand %p3798_p3, %p3797_p2 }
  0x1b   : > { %p3804_p10 = por %p3803_p8, %p3802_p5 }
  0x1c   : > { %p3800_p7 = pneg %p3799_p4 }
  0x1e   : > { %p3805_p9 = pnand %p3804_p10, %p3800_p7 }
  0x20   : > { %3808 = shalt.err (!%p3805_p9)
}
  0x21   : > { %s3892_s30 = smov 128   ;;  %s3893_s6 = smov 8  }
  0x22   : > { %3619 = dma.hbm_to_vmem [thread:$0]  (!%p3990_p13), %s174_s10, 1024, %s176_s12, %s164_s14, %s3892_s30, %s3892_s30, %s3893_s6  }
  0x23   : > { %p184_p2 = pnand %p3458_p0, %p183_p1 }
  0x24   : > { %s4011_s7 = sand.u32 (!%p184_p2), 1, %s3882_s18  }
  0x25   : > { %187 = sbr.rel (%p184_p2) target bundleno = 8097 (0x1fa1), region = 36  ;;  %s3459_s8 = sshll.u32 (!%p184_p2), %s4011_s7, 6 }
  0x26   : > { %s190_s9 = scalar_lea.sflag (!%p184_p2), [#allocation4], %s4011_s7  ;;  %s4017_s11 = scalar_lea.vmem (!%p184_p2), [#allocation3], %s3459_s8 }
  0x2a   : > { %3869 = dma.done.wait (%p3968_p6), %s190_s9, 1024  }
  0x2b   : > { %3871 = vsyncadd (%p3968_p6), %s190_s9, 4294966272  ;;  %v3894_v0 = vmov 0   ;;  %vm250_vm0 = vcmask 1041409   ;;  %vm253_vm1 = vcmask 1042434   ;;  %v226_v1 = vld [vmem:[%s4017_s11] sm:$0x1] }
  0x2c   : > { %3664 = vset.pattern.permute.xlu0 %v3894_v0  ;;  %3665 = vset.pattern.permute.xlu2 %v3894_v0  ;;  %v227_v2 = vld [vmem:[%s4017_s11 + $0x10] sm:$0x1]  ;;  %v228_v3 = vld [vmem:[%s4017_s11 + $0x20] sm:$0x1]  ;;  %v453_v7 = vld [vmem:[%s4017_s11 + $0x1] sm:$0x1] }
  0x2d   : > { %v229_v4 = vld [vmem:[%s4017_s11 + $0x30] sm:$0x1]  ;;  %v249_v5 = vrot.slane %v227_v2, 7  ;;  %v252_v6 = vrot.slane %v228_v3, 6  ;;  %vm256_vm2 = vcmask 1043459   ;;  %vm268_vm3 = vcmask 1043456  }
  0x2e   : > { %v255_v8 = vrot.slane %v229_v4, 5  ;;  %v454_v9 = vld [vmem:[%s4017_s11 + $0x11] sm:$0x1]  ;;  %v455_v10 = vld [vmem:[%s4017_s11 + $0x21] sm:$0x1]  ;;  %vm258_vm4 = vcmask 31744  }
  0x2f   : > { %v251_v11 = vsel %vm250_vm0, %v249_v5, %v226_v1  ;;  %v456_v12 = vld [vmem:[%s4017_s11 + $0x31] sm:$0x1]  ;;  %v461_v13 = vrot.slane %v454_v9, 7  ;;  %v463_v14 = vrot.slane %v455_v10, 6  ;;  %v222_v15 = vld [vmem:[%s4718_s1] sm:$0xff]  ;;  %v223_v31 = vld [vmem:[%s4718_s1 + $0x8] sm:$0xff] }
  0x30   : > { %v254_v16 = vsel %vm253_vm1, %v252_v6, %v251_v11  ;;  %v465_v17 = vrot.slane %v456_v12, 5  ;;  %v4039_v18 = vld [vmem:[%s4717_s0] sm:$0xff]  ;;  %232 = vperm.xlu0 %3664, %v222_v15   ;;  %v648_v22 = vld [vmem:[%s4017_s11 + $0x12] sm:$0x1]  ;;  %v4074_v34 = vld [vmem:[%s4717_s0 + $0x8] sm:$0xff]  ;;  %vm329_vm5 = vcmask 64512  }
  0x31   : > { %v647_v19 = vld [vmem:[%s4017_s11 + $0x2] sm:$0x1]  ;;  %v4043_v20 = vsel %vm256_vm2, %v255_v8, %v254_v16  ;;  %v462_v21 = vsel %vm250_vm0, %v461_v13, %v453_v7  ;;  %v650_v24 = vld [vmem:[%s4017_s11 + $0x32] sm:$0x1]  ;;  %v655_v26 = vrot.slane %v648_v22, 7  ;;  %vm359_vm6 = vcmask 130048  }
  0x32   : > { %v649_v23 = vld [vmem:[%s4017_s11 + $0x22] sm:$0x1]  ;;  %3461 = vmatpush.msk.msra.mxu0 %vm268_vm3, %v4043_v20  ;;  %v464_v25 = vsel %vm253_vm1, %v463_v14, %v462_v21  ;;  %v659_v28 = vrot.slane %v650_v24, 5  ;;  %v1035_v35 = vld [vmem:[%s4017_s11 + $0x4] sm:$0x1]  ;;  %s225_s30 = sld [smem:[#allocation2]] }
  0x33   : > { %v657_v27 = vrot.slane %v649_v23, 6  ;;  %v4053_v29 = vsel %vm256_vm2, %v465_v17, %v464_v25  ;;  %3462 = vmatmul.msk.f32.vlgmr.msra.gmra.mxu0 %vm258_vm4, %v4039_v18  ;;  %v656_v30 = vsel %vm250_vm0, %v655_v26, %v647_v19  ;;  %v1036_v36 = vld [vmem:[%s4017_s11 + $0x14] sm:$0x1]  ;;  %v1037_v37 = vld [vmem:[%s4017_s11 + $0x24] sm:$0x1]  ;;  %vm448_vm15 = vcmask 122880  }
  0x34   : > { %3470 = vmatpush.msk.msra.mxu3 %vm268_vm3, %v4053_v29  ;;  %v1038_v38 = vld [vmem:[%s4017_s11 + $0x34] sm:$0x1]  ;;  %v1043_v39 = vrot.slane %v1036_v36, 7  ;;  %v1045_v40 = vrot.slane %v1037_v37, 6  ;;  %v4089_v44 = vld [vmem:[%s4717_s0 + $0x10] sm:$0xf] }
  0x35   : > { %3471 = vmatmul.msk.f32.vlgmr.msra.gmra.mxu3 %vm258_vm4, %v4039_v18  ;;  %v658_v32 = vsel %vm253_vm1, %v657_v27, %v656_v30  ;;  %v1047_v41 = vrot.slane %v1038_v38, 5  ;;  %v1423_v46 = vld [vmem:[%s4017_s11 + $0x6] sm:$0x1]  ;;  %v1424_v47 = vld [vmem:[%s4017_s11 + $0x16] sm:$0x1]  ;;  %s4284_s6 = scalar_lea.vmem [#allocation6], %s3459_s8 }
  0x36   : > { %v4067_v33 = vsel %vm256_vm2, %v659_v28, %v658_v32  ;;  %v1044_v42 = vsel %vm250_vm0, %v1043_v39, %v1035_v35  ;;  %v1425_v48 = vld [vmem:[%s4017_s11 + $0x26] sm:$0x1]  ;;  %v1426_v49 = vld [vmem:[%s4017_s11 + $0x36] sm:$0x1]  ;;  %v1431_v50 = vrot.slane %v1424_v47, 7  ;;  %s3611_s8 = sshll.u32 %s3946_s2, 6 }
  0x37   : > { %3479 = vmatpush.msk.msrb.mxu0 %vm268_vm3, %v4067_v33  ;;  %v1046_v43 = vsel %vm253_vm1, %v1045_v40, %v1044_v42  ;;  %v1433_v51 = vrot.slane %v1425_v48, 6  ;;  %v1435_v52 = vrot.slane %v1426_v49, 5  ;;  %v1811_v56 = vld [vmem:[%s4017_s11 + $0x8] sm:$0x1]  ;;  %v1812_v57 = vld [vmem:[%s4017_s11 + $0x18] sm:$0x1]  ;;  %s3375_s27 = scalar_lea.hbm %s4721_s4, %s3611_s8 }
  0x38   : > { %237 = vperm.xlu0 %3664, %v223_v31   ;;  %v4092_v45 = vsel %vm256_vm2, %v1047_v41, %v1046_v43  ;;  %v1432_v53 = vsel %vm250_vm0, %v1431_v50, %v1423_v46  ;;  %v1813_v58 = vld [vmem:[%s4017_s11 + $0x28] sm:$0x1]  ;;  %v1814_v59 = vld [vmem:[%s4017_s11 + $0x38] sm:$0x1]  ;;  %v1819_v60 = vrot.slane %v1812_v57, 7  ;;  %s3376_s10 = sshll.u32 %s4284_s6, 4  ;;  %s3377_s10 = int_to_ptr.vmem [resolvable:$true] %s3376_s10 }
  0x39   : > { %3497 = vmatpush.msk.msra.mxu0 %vm268_vm3, %v4092_v45  ;;  %v1434_v54 = vsel %vm253_vm1, %v1433_v51, %v1432_v53  ;;  %v1821_v61 = vrot.slane %v1813_v58, 6  ;;  %v1823_v62 = vrot.slane %v1814_v59, 5  ;;  %v2199_v2 = vld [vmem:[%s4017_s11 + $0xa] sm:$0x1]  ;;  %v2200_v3 = vld [vmem:[%s4017_s11 + $0x1a] sm:$0x1] }
  0x3a   : > { %v4111_v55 = vsel %vm256_vm2, %v1435_v52, %v1434_v54  ;;  %v1820_v63 = vsel %vm250_vm0, %v1819_v60, %v1811_v56  ;;  %v2201_v4 = vld [vmem:[%s4017_s11 + $0x2a] sm:$0x1]  ;;  %v2202_v5 = vld [vmem:[%s4017_s11 + $0x3a] sm:$0x1]  ;;  %v2207_v6 = vrot.slane %v2200_v3, 7  ;;  %s3378_s12 = sshll.u32 %s3375_s27, 4  ;;  %s3379_s12 = int_to_ptr.hbm [resolvable:$true] %s3378_s12 }
  0x3b   : > { %3463 = vmatmul.msk.f32.gmra.mxu0 %vm258_vm4, %v4074_v34  ;;  %v1822_v0 = vsel %vm253_vm1, %v1821_v61, %v1820_v63  ;;  %v2209_v7 = vrot.slane %v2201_v4, 6  ;;  %v2211_v8 = vrot.slane %v2202_v5, 5  ;;  %v2588_v12 = vld [vmem:[%s4017_s11 + $0x1c] sm:$0x1]  ;;  %v2589_v13 = vld [vmem:[%s4017_s11 + $0x2c] sm:$0x1] }
  0x3c   : > { %v4128_v1 = vsel %vm256_vm2, %v1823_v62, %v1822_v0  ;;  %v2208_v9 = vsel %vm250_vm0, %v2207_v6, %v2199_v2  ;;  %v2595_v14 = vrot.slane %v2588_v12, 7  ;;  %v2587_v15 = vld [vmem:[%s4017_s11 + $0xc] sm:$0x1]  ;;  %v2590_v16 = vld [vmem:[%s4017_s11 + $0x3c] sm:$0x1]  ;;  %v2597_v17 = vrot.slane %v2589_v13, 6 }
  0x3d   : > { %3472 = vmatmul.msk.f32.gmra.mxu3 %vm258_vm4, %v4074_v34  ;;  %v2210_v10 = vsel %vm253_vm1, %v2209_v7, %v2208_v9  ;;  %v2599_v21 = vrot.slane %v2590_v16, 5  ;;  %v2976_v27 = vld [vmem:[%s4017_s11 + $0x1e] sm:$0x1]  ;;  %v2977_v28 = vld [vmem:[%s4017_s11 + $0x2e] sm:$0x1]  ;;  %s3364_s2 = scalar_lea.sflag [#allocation5], %s4011_s7 }
  0x3e   : > { %v4145_v11 = vsel %vm256_vm2, %v2211_v8, %v2210_v10  ;;  %v2596_v19 = vsel %vm250_vm0, %v2595_v14, %v2587_v15  ;;  %v2983_v30 = vrot.slane %v2976_v27, 7  ;;  %v2975_v35 = vld [vmem:[%s4017_s11 + $0xe] sm:$0x1]  ;;  %v2978_v36 = vld [vmem:[%s4017_s11 + $0x3e] sm:$0x1]  ;;  %v2985_v37 = vrot.slane %v2977_v28, 6 }
  0x3f   : > { %v2598_v22 = vsel %vm253_vm1, %v2597_v17, %v2596_v19  ;;  %v2987_v40 = vrot.slane %v2978_v36, 5  ;;  %v224_v62 = vld [vmem:[%s4718_s1 + $0x10] sm:$0xf]  ;;  %s3838_s13 = sshra.s32 %s3379_s12, 4  ;;  %s3844_s21 = scalar_lea.hbm %s4721_s4, 128  ;;  %s3839_s13 = int_to_ptr.hbm [resolvable:$true] %s3838_s13 }
  0x40   : > { %v4164_v23 = vsel %vm256_vm2, %v2599_v21, %v2598_v22  ;;  %v2984_v39 = vsel %vm250_vm0, %v2983_v30, %v2975_v35  ;;  %s3840_s14 = scalar_lea.hbm %s3839_s13, 64  ;;  %p3845_p0 = scmp.lt.s32.totalorder %s3839_s13, %s4721_s4 }
  0x41   : > { %v2986_v41 = vsel %vm253_vm1, %v2985_v37, %v2984_v39  ;;  %p3841_p6 = scmp.ne.s32.totalorder %s3839_s13, %s3840_s14  ;;  %p3846_p1 = scmp.lt.s32.totalorder %s3844_s21, %s3840_s14 }
  0x42   : > { %v4187_v42 = vsel %vm256_vm2, %v2987_v40, %v2986_v41  ;;  %v841_v40 = vld [vmem:[%s4017_s11 + $0x3] sm:$0x1]  ;;  %v842_v41 = vld [vmem:[%s4017_s11 + $0x13] sm:$0x1] }
  0x43   : > { %3464 = vmatmul.msk.f32.gmra.mxu0 %vm258_vm4, %v4089_v44  ;;  %p3842_p9 = pnand %p3841_p6, %p3975_p11  ;;  %p3847_p3 = por %p3846_p1, %p3845_p0 }
  0x45   : > { %3473 = vmatmul.msk.f32.gmra.mxu3 %vm258_vm4, %v4089_v44  ;;  %p3843_p13 = pneg %p3842_p9 }
  0x47   : > { %p3848_p4 = pnand %p3847_p3, %p3843_p13 }
  0x4b   : > { %3480 = vmatmul.msk.f32.vlgmr.msrb.gmra.mxu0 %vm258_vm4, %v4039_v18 }
  0x4c   : > { %3515 = vmatpush.msk.msrb.mxu0 %vm268_vm3, %v4111_v55 }
  0x53   : > { %3481 = vmatmul.msk.f32.gmra.mxu0 %vm258_vm4, %v4074_v34 }
  0x5b   : > { %3482 = vmatmul.msk.f32.gmra.mxu0 %vm258_vm4, %v4089_v44 }
  0x63   : > { %3498 = vmatmul.msk.f32.vlgmr.msra.gmra.mxu0 %vm258_vm4, %v4039_v18 }
  0x64   : > { %3533 = vmatpush.msk.msra.mxu0 %vm268_vm3, %v4128_v1 }
  0x6b   : > { %3499 = vmatmul.msk.f32.gmra.mxu0 %vm258_vm4, %v4074_v34 }
  0x73   : > { %3500 = vmatmul.msk.f32.gmra.mxu0 %vm258_vm4, %v4089_v44 }
  0x7b   : > { %3516 = vmatmul.msk.f32.vlgmr.msrb.gmra.mxu0 %vm258_vm4, %v4039_v18 }
  0x7c   : > { %3551 = vmatpush.msk.msrb.mxu0 %vm268_vm3, %v4145_v11 }
  0x83   : > { %3517 = vmatmul.msk.f32.gmra.mxu0 %vm258_vm4, %v4074_v34 }
  0x8b   : > { %3518 = vmatmul.msk.f32.gmra.mxu0 %vm258_vm4, %v4089_v44 }
  0x93   : > { %3534 = vmatmul.msk.f32.vlgmr.msra.gmra.mxu0 %vm258_vm4, %v4039_v18 }
  0x94   : > { %3569 = vmatpush.msk.msra.mxu0 %vm268_vm3, %v4164_v23 }
  0x9b   : > { %3535 = vmatmul.msk.f32.gmra.mxu0 %vm258_vm4, %v4074_v34 }
  0xa2   : > { %v4170_v24 = vpop.permute.xlu0 %232 }
  0xa3   : > { %3536 = vmatmul.msk.f32.gmra.mxu0 %vm258_vm4, %v4089_v44 }
  0xaa   : > { %v4177_v31 = vpop.permute.xlu0 %237 }
  0xab   : > { %3552 = vmatmul.msk.f32.vlgmr.msrb.gmra.mxu0 %vm258_vm4, %v4039_v18 }
  0xac   : > { %3587 = vmatpush.msk.msrb.mxu0 %vm268_vm3, %v4187_v42 }
  0xb0   : > { %v288_v25 = vpop.f32.mrf.mxu0 }
  0xb1   : > { %v289_v26 = vadd.f32 %v288_v25, %v4170_v24 }
  0xb3   : > { %3553 = vmatmul.msk.f32.gmra.mxu0 %vm258_vm4, %v4074_v34  ;;  %297 = vxpose.xlu1.b32.start.end [1/1] (short) (narrow) %v289_v26, 16 }
  0xb8   : > { %v291_v32 = vpop.f32.mrf.mxu0  ;;  %v486_v63 = vpop.f32.mrf.mxu3 }
  0xb9   : > { %v292_v38 = vadd.f32 %v291_v32, %v4177_v31  ;;  %v487_v0 = vadd.f32 %v486_v63, %v4170_v24 }
  0xbb   : > { %351 = vmatpush.msra.mxu1 %v292_v38  ;;  %3554 = vmatmul.msk.f32.gmra.mxu0 %vm258_vm4, %v4089_v44 }
  0xc0   : > { %v489_v32 = vpop.f32.mrf.mxu3  ;;  %v294_v38 = vpop.f32.mrf.mxu0 }
  0xc1   : > { %v490_v37 = vadd.f32 %v489_v32, %v4177_v31 }
  0xc3   : > { %3570 = vmatmul.msk.f32.vlgmr.msra.gmra.mxu0 %vm258_vm4, %v4039_v18 }
  0xcb   : > { %3571 = vmatmul.msk.f32.gmra.mxu0 %vm258_vm4, %v4074_v34 }
  0xd3   : > { %3572 = vmatmul.msk.f32.gmra.mxu0 %vm258_vm4, %v4089_v44 }
  0xdb   : > { %3588 = vmatmul.msk.f32.vlgmr.msrb.gmra.mxu0 %vm258_vm4, %v4039_v18 }
  0xe3   : > { %3589 = vmatmul.msk.f32.gmra.mxu0 %vm258_vm4, %v4074_v34 }
  0xeb   : > { %3590 = vmatmul.msk.f32.gmra.mxu0 %vm258_vm4, %v4089_v44 }
 0x157   : > { %v313_v43 = vpop.trf.xlu1 }
 0x158   : > { %3465 = vmatmul.msk.f32.vlgmr.msra.gmra.mxu1 %vm329_vm5, %v313_v43  ;;  %v843_v43 = vld [vmem:[%s4017_s11 + $0x23] sm:$0x1] }
 0x15f   : > { %v314_v46 = vpop.trf.xlu1 }
 0x160   : > { %3466 = vmatmul.msk.f32.gmra.mxu1 %vm329_vm5, %v314_v46  ;;  %v844_v46 = vld [vmem:[%s4017_s11 + $0x33] sm:$0x1] }
 0x1d5   : > { %v353_v47 = vpop.f32.mrf.mxu1 }
 0x1d6   : > { %v360_v48 = vsel %vm359_vm6, %v353_v47, -inf }
 0x1d7   : > { %361 = vmax.xlane.f32.xlu2 %v360_v48  ;;  %v851_v48 = vrot.slane %v843_v43, 6  ;;  %v2396_v43 = vld [vmem:[%s4017_s11 + $0x3b] sm:$0x1] }
 0x1dd   : > { %v356_v49 = vpop.f32.mrf.mxu1 }
 0x1de   : > { %v363_v50 = vsel %vm359_vm6, %v356_v49, -inf }
 0x1df   : > { %364 = vmax.xlane.f32.xlu1 %v363_v50 }
 0x24a   : > { %v362_v51 = vpop.xlane.xlu2 %361 }
 0x24b   : > { %v366_v52 = vsub.f32 %v353_v47, %v362_v51  ;;  %v849_v47 = vrot.slane %v842_v41, 7  ;;  %v2395_v41 = vld [vmem:[%s4017_s11 + $0x2b] sm:$0x1] }
 0x24d   : > { %v368_v53 = vmul.f32 1.442695, %v366_v52  ;;  %v850_v50 = vsel %vm250_vm0, %v849_v47, %v841_v40  ;;  %v2394_v40 = vld [vmem:[%s4017_s11 + $0x1b] sm:$0x1]  ;;  %v2403_v47 = vrot.slane %v2395_v41, 6 }
 0x24e   : > { %v852_v51 = vsel %vm253_vm1, %v851_v48, %v850_v50  ;;  %v2405_v48 = vrot.slane %v2396_v43, 5 }
 0x24f   : > { %3666 = vpow2.f32 %v368_v53 }
 0x252   : > { %v365_v54 = vpop.xlane.xlu1 %364 }
 0x253   : > { %v367_v56 = vsub.f32 %v356_v49, %v365_v54  ;;  %v853_v49 = vrot.slane %v844_v46, 5  ;;  %v1229_v54 = vld [vmem:[%s4017_s11 + $0x5] sm:$0x1]  ;;  %v2401_v46 = vrot.slane %v2394_v40, 7 }
 0x255   : > { %v3667_v57 = vpop.eup %3666  ;;  %v370_v58 = vmul.f32 1.442695, %v367_v56  ;;  %v4227_v52 = vsel %vm256_vm2, %v853_v49, %v852_v51  ;;  %v1230_v56 = vld [vmem:[%s4017_s11 + $0x15] sm:$0x1] }
 0x256   : > { %v372_v59 = vsel %vm359_vm6, %v3667_v57, 0.0 }
 0x257   : > { %3668 = vpow2.f32 %v370_v58  ;;  %373 = vadd.xlane.f32.xlu0 %v372_v59  ;;  %v1232_v58 = vld [vmem:[%s4017_s11 + $0x35] sm:$0x1]  ;;  %v1237_v59 = vrot.slane %v1230_v56, 7  ;;  %v2783_v56 = vld [vmem:[%s4017_s11 + $0x2d] sm:$0x1] }
 0x25d   : > { %v3669_v60 = vpop.eup %3668 }
 0x25e   : > { %v375_v61 = vsel %vm359_vm6, %v3669_v60, 0.0 }
 0x25f   : > { %376 = vadd.xlane.f32.xlu2 %v375_v61  ;;  %v1241_v61 = vrot.slane %v1232_v58, 5 }
 0x277   : > { %242 = vperm.xlu2 %3665, %v224_v62   ;;  %v1238_v62 = vsel %vm250_vm0, %v1237_v59, %v1229_v54  ;;  %v2782_v54 = vld [vmem:[%s4017_s11 + $0x1d] sm:$0x1]  ;;  %v2791_v59 = vrot.slane %v2783_v56, 6 }
 0x278   : > { %v2789_v58 = vrot.slane %v2782_v54, 7 }
 0x29d   : > { %495 = vxpose.xlu2.b32.start.end [1/1] (short) (narrow) %v487_v0, 16 }
 0x2ca   : > { %v374_v2 = vpop.xlane.xlu0 %373 }
 0x2cb   : > { %3670 = vrcp.f32 %v374_v2  ;;  %vm383_vm9 = vweird.f32 %v374_v2  ;;  %v389_v16 = vand.u32 2147483648, %v374_v2  ;;  %v387_v19 = vand.u32 2147483647, %v374_v2 }
 0x2cd   : > { %v390_v26 = vor.u32 1.1754944e-38, %v389_v16  ;;  %vm388_vm14 = vcmp.eq.f32.partialorder %v387_v19, 8.507059e+37  ;;  %v2007_v16 = vld [vmem:[%s4017_s11 + $0x29] sm:$0x1] }
 0x2d1   : > { %v3671_v3 = vpop.eup %3670 }
 0x2d2   : > { %v379_v4 = vmul.f32 %v3671_v3, %v374_v2  ;;  %v377_v5 = vpop.xlane.xlu2 %376  ;;  %vm384_vm7 = vweird.f32 %v3671_v3 }
 0x2d3   : > { %3672 = vrcp.f32 %v377_v5  ;;  %v403_v12 = vand.u32 2147483648, %v377_v5  ;;  %v401_v14 = vand.u32 2147483647, %v377_v5  ;;  %vm397_vm10 = vweird.f32 %v377_v5  ;;  %vm385_vm11 = vmor %vm383_vm9, %vm384_vm7 }
 0x2d4   : > { %v380_v6 = vsub.f32 1.0, %v379_v4  ;;  %v1619_v4 = vld [vmem:[%s4017_s11 + $0x27] sm:$0x1] }
 0x2d5   : > { %v404_v21 = vor.u32 1.1754944e-38, %v403_v12  ;;  %vm402_vm13 = vcmp.eq.f32.partialorder %v401_v14, 8.507059e+37  ;;  %v2005_v14 = vld [vmem:[%s4017_s11 + $0x9] sm:$0x1] }
 0x2d6   : > { %v381_v8 = vmul.f32 %v3671_v3, %v380_v6  ;;  %v1617_v6 = vld [vmem:[%s4017_s11 + $0x7] sm:$0x1] }
 0x2d8   : > { %v382_v15 = vadd.f32 %v3671_v3, %v381_v8  ;;  %v1627_v8 = vrot.slane %v1619_v4, 6  ;;  %v3171_v4 = vld [vmem:[%s4017_s11 + $0x2f] sm:$0x1] }
 0x2d9   : > { %v3673_v7 = vpop.eup %3672 }
 0x2da   : > { %v393_v9 = vmul.f32 %v3673_v7, %v377_v5  ;;  %vm398_vm8 = vweird.f32 %v3673_v7  ;;  %v386_v25 = vsel %vm385_vm11, %v3671_v3, %v382_v15  ;;  %v4214_v35 = vpop.permute.xlu2 %242  ;;  %v1618_v3 = vld [vmem:[%s4017_s11 + $0x17] sm:$0x1]  ;;  %v2006_v15 = vld [vmem:[%s4017_s11 + $0x19] sm:$0x1] }
 0x2db   : > { %vm399_vm12 = vmor %vm397_vm10, %vm398_vm8  ;;  %v391_v30 = vsel %vm388_vm14, %v390_v26, %v386_v25  ;;  %v295_v39 = vadd.f32 %v294_v38, %v4214_v35  ;;  %v1625_v5 = vrot.slane %v1618_v3, 7  ;;  %v2013_v19 = vrot.slane %v2006_v15, 7  ;;  %v3169_v3 = vld [vmem:[%s4017_s11 + $0xf] sm:$0x1] }
 0x2dc   : > { %v394_v10 = vsub.f32 1.0, %v393_v9  ;;  %v406_v36 = vmul.f32 %v3667_v57, %v391_v30  ;;  %v1231_v57 = vld [vmem:[%s4017_s11 + $0x25] sm:$0x1] }
 0x2dd   : > { %v1626_v9 = vsel %vm250_vm0, %v1625_v5, %v1617_v6  ;;  %v2014_v25 = vsel %vm250_vm0, %v2013_v19, %v2005_v14  ;;  %v3172_v5 = vld [vmem:[%s4017_s11 + $0x3f] sm:$0x1] }
 0x2de   : > { %v395_v13 = vmul.f32 %v3673_v7, %v394_v10  ;;  %v1628_v12 = vsel %vm253_vm1, %v1627_v8, %v1626_v9  ;;  %v3181_v8 = vrot.slane %v3172_v5, 5 }
 0x2e0   : > { %v396_v17 = vadd.f32 %v3673_v7, %v395_v13 }
 0x2e2   : > { %v400_v22 = vsel %vm399_vm12, %v3673_v7, %v396_v17  ;;  %v1620_v7 = vld [vmem:[%s4017_s11 + $0x37] sm:$0x1]  ;;  %v2008_v17 = vld [vmem:[%s4017_s11 + $0x39] sm:$0x1] }
 0x2e3   : > { %v405_v27 = vsel %vm402_vm13, %v404_v21, %v400_v22  ;;  %v1629_v10 = vrot.slane %v1620_v7, 5  ;;  %v2015_v21 = vrot.slane %v2007_v16, 6  ;;  %v2017_v22 = vrot.slane %v2008_v17, 5 }
 0x2e4   : > { %v407_v28 = vmul.f32 %v3669_v60, %v405_v27  ;;  %v1239_v60 = vrot.slane %v1231_v57, 6  ;;  %v2784_v57 = vld [vmem:[%s4017_s11 + $0x3d] sm:$0x1]  ;;  %v3179_v7 = vrot.slane %v3171_v4, 6 }
 0x2e5   : > { %v4257_v13 = vsel %vm256_vm2, %v1629_v10, %v1628_v12  ;;  %v2016_v26 = vsel %vm253_vm1, %v2015_v21, %v2014_v25 }
 0x2e6   : > { %3467 = vmatpush.xpose.msk.msra.mxu2 %vm359_vm6, %v407_v28  ;;  %v1240_v63 = vsel %vm253_vm1, %v1239_v60, %v1238_v62  ;;  %v4272_v27 = vsel %vm256_vm2, %v2017_v22, %v2016_v26  ;;  %v4276_v28 = vstv %s225_s30  ;;  %v2793_v60 = vrot.slane %v2784_v57, 5 }
 0x2e7   : > { %v4239_v0 = vsel %vm256_vm2, %v1241_v61, %v1240_v63 }
 0x2ea   : > { %3468 = vmatpush.xpose.msk.msra.mxu2 %vm359_vm6, %v406_v36 }
 0x2ed   : > { %3469 = vmatmul.msk.f32.vlgmr.msra.gmra.mxu2 %vm359_vm6, %v295_v39 }
 0x2ee   : > { %548 = vmatpush.msrb.mxu2 %v490_v37 }
 0x2f0   : > { %3488 = vmatpush.msk.msra.mxu2 %vm268_vm3, %v4227_v52 }
 0x336   : > { %v511_v53 = vpop.trf.xlu2 }
 0x337   : > { %3474 = vmatmul.msk.f32.vlgmr.msrb.gmra.mxu2 %vm329_vm5, %v511_v53  ;;  %v2781_v53 = vld [vmem:[%s4017_s11 + $0xd] sm:$0x1] }
 0x338   : > { %3506 = vmatpush.msk.msrb.mxu2 %vm268_vm3, %v4239_v0  ;;  %v2790_v61 = vsel %vm250_vm0, %v2789_v58, %v2781_v53 }
 0x339   : > { %v2792_v62 = vsel %vm253_vm1, %v2791_v59, %v2790_v61 }
 0x33a   : > { %v4324_v63 = vsel %vm256_vm2, %v2793_v60, %v2792_v62 }
 0x33e   : > { %v512_v2 = vpop.trf.xlu2 }
 0x33f   : > { %3475 = vmatmul.msk.f32.gmra.mxu2 %vm329_vm5, %v512_v2  ;;  %v3170_v2 = vld [vmem:[%s4017_s11 + $0x1f] sm:$0x1] }
 0x340   : > { %v3177_v6 = vrot.slane %v3170_v2, 7 }
 0x342   : > { %v3178_v9 = vsel %vm250_vm0, %v3177_v6, %v3169_v3  ;;  %v492_v6 = vpop.f32.mrf.mxu3 }
 0x343   : > { %v3180_v10 = vsel %vm253_vm1, %v3179_v7, %v3178_v9  ;;  %v493_v9 = vadd.f32 %v492_v6, %v4214_v35 }
 0x344   : > { %v4341_v12 = vsel %vm256_vm2, %v3181_v8, %v3180_v10 }
 0x347   : > { %3489 = vmatmul.msk.f32.vlgmr.msra.gmra.mxu2 %vm258_vm4, %v4039_v18 }
 0x348   : > { %3524 = vmatpush.msk.msra.mxu2 %vm268_vm3, %v4257_v13 }
 0x34f   : > { %3490 = vmatmul.msk.f32.gmra.mxu2 %vm258_vm4, %v4074_v34 }
 0x357   : > { %3491 = vmatmul.msk.f32.gmra.mxu2 %vm258_vm4, %v4089_v44 }
 0x35f   : > { %3507 = vmatmul.msk.f32.vlgmr.msrb.gmra.mxu2 %vm258_vm4, %v4039_v18 }
 0x360   : > { %3542 = vmatpush.msk.msrb.mxu2 %vm268_vm3, %v4272_v27 }
 0x367   : > { %3508 = vmatmul.msk.f32.gmra.mxu2 %vm258_vm4, %v4074_v34 }
 0x36f   : > { %3509 = vmatmul.msk.f32.gmra.mxu2 %vm258_vm4, %v4089_v44 }
 0x370   : > { %v434_v30 = vpop.f32.mrf.mxu2 }
 0x371   : > { %v438_v32 = vmul.f32 %v4276_v28, %v434_v30 }
 0x373   : > { %v440_v36 = vadd.f32 %v438_v32, %v4043_v20  ;;  %v2393_v20 = vld [vmem:[%s4017_s11 + $0xb] sm:$0x1] }
 0x374   : > { %v2402_v49 = vsel %vm250_vm0, %v2401_v46, %v2393_v20 }
 0x375   : > { %v442_v37 = vrot.slane %v440_v36, 1  ;;  %v443_v38 = vrot.slane %v440_v36, 2  ;;  %v444_v39 = vrot.slane %v440_v36, 3  ;;  %449 = vst.msk [vmem:[%s4284_s6] sm:$0x1] %vm448_vm15, %v440_v36  ;;  %v2404_v50 = vsel %vm253_vm1, %v2403_v47, %v2402_v49 }
 0x376   : > { %v4305_v51 = vsel %vm256_vm2, %v2405_v48, %v2404_v50 }
 0x377   : > { %450 = vst.msk [vmem:[%s4284_s6 + $0x10] sm:$0x1] %vm448_vm15, %v442_v37  ;;  %3525 = vmatmul.msk.f32.vlgmr.msra.gmra.mxu2 %vm258_vm4, %v4039_v18 }
 0x378   : > { %451 = vst.msk [vmem:[%s4284_s6 + $0x20] sm:$0x1] %vm448_vm15, %v443_v38  ;;  %3560 = vmatpush.msk.msra.mxu2 %vm268_vm3, %v4305_v51 }
 0x379   : > { %452 = vst.msk [vmem:[%s4284_s6 + $0x30] sm:$0x1] %vm448_vm15, %v444_v39 }
 0x37f   : > { %3526 = vmatmul.msk.f32.gmra.mxu2 %vm258_vm4, %v4074_v34 }
 0x387   : > { %3527 = vmatmul.msk.f32.gmra.mxu2 %vm258_vm4, %v4089_v44 }
 0x38f   : > { %3543 = vmatmul.msk.f32.vlgmr.msrb.gmra.mxu2 %vm258_vm4, %v4039_v18 }
 0x390   : > { %3578 = vmatpush.msk.msrb.mxu2 %vm268_vm3, %v4324_v63 }
 0x397   : > { %3544 = vmatmul.msk.f32.gmra.mxu2 %vm258_vm4, %v4074_v34 }
 0x39f   : > { %3545 = vmatmul.msk.f32.gmra.mxu2 %vm258_vm4, %v4089_v44 }
 0x3a7   : > { %3561 = vmatmul.msk.f32.vlgmr.msra.gmra.mxu2 %vm258_vm4, %v4039_v18 }
 0x3a8   : > { %3596 = vmatpush.msk.msra.mxu2 %vm268_vm3, %v4341_v12 }
 0x3af   : > { %3562 = vmatmul.msk.f32.gmra.mxu2 %vm258_vm4, %v4074_v34 }
 0x3b7   : > { %3563 = vmatmul.msk.f32.gmra.mxu2 %vm258_vm4, %v4089_v44 }
 0x3ba   : > { %v550_v14 = vpop.f32.mrf.mxu2 }
 0x3bb   : > { %v556_v17 = vsel %vm359_vm6, %v550_v14, -inf }
 0x3bf   : > { %3579 = vmatmul.msk.f32.vlgmr.msrb.gmra.mxu2 %vm258_vm4, %v4039_v18 }
 0x3c2   : > { %v553_v15 = vpop.f32.mrf.mxu2 }
 0x3c3   : > { %v559_v16 = vsel %vm359_vm6, %v553_v15, -inf }
 0x3c4   : > { %560 = vmax.xlane.f32.xlu0 %v559_v16 }
 0x3c7   : > { %3580 = vmatmul.msk.f32.gmra.mxu2 %vm258_vm4, %v4074_v34 }
 0x3cc   : > { %557 = vmax.xlane.f32.xlu0 %v556_v17 }
 0x3cf   : > { %3581 = vmatmul.msk.f32.gmra.mxu2 %vm258_vm4, %v4089_v44 }
 0x3d7   : > { %3597 = vmatmul.msk.f32.vlgmr.msra.gmra.mxu2 %vm258_vm4, %v4039_v18 }
 0x3df   : > { %3598 = vmatmul.msk.f32.gmra.mxu2 %vm258_vm4, %v4074_v34  ;;  %v680_v34 = vpop.f32.mrf.mxu0 }
 0x3e0   : > { %v681_v38 = vadd.f32 %v680_v34, %v4170_v24 }
 0x3e7   : > { %3599 = vmatmul.msk.f32.gmra.mxu2 %vm258_vm4, %v4089_v44  ;;  %v683_v3 = vpop.f32.mrf.mxu0 }
 0x3e8   : > { %v684_v8 = vadd.f32 %v683_v3, %v4177_v31 }
 0x437   : > { %v561_v19 = vpop.xlane.xlu0 %560 }
 0x438   : > { %v563_v21 = vsub.f32 %v553_v15, %v561_v19 }
 0x43a   : > { %v566_v22 = vmul.f32 1.442695, %v563_v21 }
 0x43c   : > { %3674 = vpow2.f32 %v566_v22 }
 0x43f   : > { %v558_v25 = vpop.xlane.xlu0 %557 }
 0x440   : > { %v562_v26 = vsub.f32 %v550_v14, %v558_v25 }
 0x442   : > { %v3675_v30 = vpop.eup %3674  ;;  %v564_v32 = vmul.f32 1.442695, %v562_v26 }
 0x443   : > { %v571_v36 = vsel %vm359_vm6, %v3675_v30, 0.0 }
 0x444   : > { %3676 = vpow2.f32 %v564_v32  ;;  %572 = vadd.xlane.f32.xlu0 %v571_v36 }
 0x44a   : > { %v3677_v37 = vpop.eup %3676 }
 0x44b   : > { %v568_v18 = vsel %vm359_vm6, %v3677_v37, 0.0 }
 0x44c   : > { %569 = vadd.xlane.f32.xlu2 %v568_v18 }
 0x46d   : > { %689 = vxpose.xlu0.b32.start.end [1/1] (short) (narrow) %v681_v38, 16 }
 0x4b7   : > { %v573_v44 = vpop.xlane.xlu0 %572 }
 0x4b8   : > { %3678 = vrcp.f32 %v573_v44  ;;  %v599_v43 = vand.u32 2147483648, %v573_v44  ;;  %v597_v47 = vand.u32 2147483647, %v573_v44  ;;  %vm593_vm1 = vweird.f32 %v573_v44 }
 0x4ba   : > { %v600_v50 = vor.u32 1.1754944e-38, %v599_v43  ;;  %vm598_vm3 = vcmp.eq.f32.partialorder %v597_v47, 8.507059e+37 }
 0x4be   : > { %v3679_v39 = vpop.eup %3678 }
 0x4bf   : > { %v589_v20 = vmul.f32 %v3679_v39, %v573_v44  ;;  %v570_v40 = vpop.xlane.xlu2 %569  ;;  %vm594_vm0 = vweird.f32 %v3679_v39 }
 0x4c0   : > { %3680 = vrcp.f32 %v570_v40  ;;  %vm595_vm2 = vmor %vm593_vm1, %vm594_vm0  ;;  %v585_v59 = vand.u32 2147483648, %v570_v40  ;;  %v583_v61 = vand.u32 2147483647, %v570_v40  ;;  %vm579_vm7 = vweird.f32 %v570_v40 }
 0x4c1   : > { %v590_v41 = vsub.f32 1.0, %v589_v20 }
 0x4c2   : > { %v586_v2 = vor.u32 1.1754944e-38, %v585_v59  ;;  %vm584_vm9 = vcmp.eq.f32.partialorder %v583_v61, 8.507059e+37 }
 0x4c3   : > { %v591_v46 = vmul.f32 %v3679_v39, %v590_v41  ;;  %v874_v41 = vpop.f32.mrf.mxu2 }
 0x4c4   : > { %v875_v43 = vadd.f32 %v874_v41, %v4170_v24 }
 0x4c5   : > { %v592_v48 = vadd.f32 %v3679_v39, %v591_v46 }
 0x4c6   : > { %v3681_v49 = vpop.eup %3680 }
 0x4c7   : > { %v575_v53 = vmul.f32 %v3681_v49, %v570_v40  ;;  %v596_v54 = vsel %vm595_vm2, %v3679_v39, %v592_v48  ;;  %vm580_vm4 = vweird.f32 %v3681_v49 }
 0x4c8   : > { %v601_v56 = vsel %vm598_vm3, %v600_v50, %v596_v54  ;;  %vm581_vm8 = vmor %vm579_vm7, %vm580_vm4 }
 0x4c9   : > { %v576_v57 = vsub.f32 1.0, %v575_v53  ;;  %v603_v58 = vmul.f32 %v3675_v30, %v601_v56 }
 0x4cb   : > { %v577_v60 = vmul.f32 %v3681_v49, %v576_v57  ;;  %3476 = vmatpush.xpose.msk.msrb.mxu1 %vm359_vm6, %v603_v58 }
 0x4cd   : > { %v578_v62 = vadd.f32 %v3681_v49, %v577_v60 }
 0x4cf   : > { %v582_v4 = vsel %vm581_vm8, %v3681_v49, %v578_v62 }
 0x4d0   : > { %v587_v5 = vsel %vm584_vm9, %v586_v2, %v582_v4 }
 0x4d1   : > { %v602_v7 = vmul.f32 %v3677_v37, %v587_v5 }
 0x4d3   : > { %3477 = vmatpush.xpose.msk.msrb.mxu1 %vm359_vm6, %v602_v7 }
 0x4d6   : > { %3478 = vmatmul.msk.f32.vlgmr.msrb.gmra.mxu1 %vm359_vm6, %v493_v9  ;;  %v877_v9 = vpop.f32.mrf.mxu2 }
 0x4d7   : > { %742 = vmatpush.msra.mxu1 %v684_v8 }
 0x511   : > { %v705_v10 = vpop.trf.xlu0 }
 0x512   : > { %3483 = vmatmul.msk.f32.vlgmr.msra.gmra.mxu1 %vm329_vm5, %v705_v10 }
 0x519   : > { %v706_v14 = vpop.trf.xlu0 }
 0x51a   : > { %3484 = vmatmul.msk.f32.gmra.mxu1 %vm329_vm5, %v706_v14 }
 0x553   : > { %v630_v15 = vpop.f32.mrf.mxu1 }
 0x554   : > { %v633_v16 = vmul.f32 %v630_v15, %v4276_v28 }
 0x556   : > { %v635_v17 = vadd.f32 %v633_v16, %v4053_v29  ;;  %v878_v16 = vadd.f32 %v877_v9, %v4177_v31 }
 0x558   : > { %v637_v19 = vrot.slane %v635_v17, 1  ;;  %v638_v21 = vrot.slane %v635_v17, 2  ;;  %v639_v22 = vrot.slane %v635_v17, 3  ;;  %643 = vst.msk [vmem:[%s4284_s6 + $0x1] sm:$0x1] %vm448_vm15, %v635_v17  ;;  %v686_v17 = vpop.f32.mrf.mxu0 }
 0x55a   : > { %644 = vst.msk [vmem:[%s4284_s6 + $0x11] sm:$0x1] %vm448_vm15, %v637_v19  ;;  %v687_v19 = vadd.f32 %v686_v17, %v4214_v35 }
 0x55b   : > { %645 = vst.msk [vmem:[%s4284_s6 + $0x21] sm:$0x1] %vm448_vm15, %v638_v21 }
 0x55c   : > { %646 = vst.msk [vmem:[%s4284_s6 + $0x31] sm:$0x1] %vm448_vm15, %v639_v22 }
 0x58f   : > { %v744_v25 = vpop.f32.mrf.mxu1 }
 0x590   : > { %v750_v32 = vsel %vm359_vm6, %v744_v25, -inf }
 0x597   : > { %v747_v26 = vpop.f32.mrf.mxu1 }
 0x598   : > { %v753_v30 = vsel %vm359_vm6, %v747_v26, -inf }
 0x599   : > { %754 = vmax.xlane.f32.xlu1 %v753_v30 }
 0x5a1   : > { %751 = vmax.xlane.f32.xlu1 %v750_v32 }
 0x60c   : > { %v755_v29 = vpop.xlane.xlu1 %754 }
 0x60d   : > { %v757_v36 = vsub.f32 %v747_v26, %v755_v29 }
 0x60f   : > { %v760_v37 = vmul.f32 1.442695, %v757_v36 }
 0x611   : > { %3682 = vpow2.f32 %v760_v37 }
 0x614   : > { %v752_v18 = vpop.xlane.xlu1 %751 }
 0x615   : > { %v756_v34 = vsub.f32 %v744_v25, %v752_v18 }
 0x617   : > { %v3683_v38 = vpop.eup %3682  ;;  %v758_v44 = vmul.f32 1.442695, %v756_v34 }
 0x618   : > { %v765_v39 = vsel %vm359_vm6, %v3683_v38, 0.0 }
 0x619   : > { %3684 = vpow2.f32 %v758_v44  ;;  %766 = vadd.xlane.f32.xlu0 %v765_v39 }
 0x61f   : > { %v3685_v20 = vpop.eup %3684 }
 0x620   : > { %v762_v40 = vsel %vm359_vm6, %v3685_v20, 0.0 }
 0x621   : > { %763 = vadd.xlane.f32.xlu1 %v762_v40 }
 0x65b   : > { %883 = vxpose.xlu1.b32.start.end [1/1] (short) (narrow) %v875_v43, 16 }
 0x68c   : > { %v767_v46 = vpop.xlane.xlu0 %766 }
 0x68d   : > { %3686 = vrcp.f32 %v767_v46  ;;  %v793_v53 = vand.u32 2147483648, %v767_v46  ;;  %v791_v56 = vand.u32 2147483647, %v767_v46  ;;  %vm787_vm11 = vweird.f32 %v767_v46 }
 0x68f   : > { %v794_v59 = vor.u32 1.1754944e-38, %v793_v53  ;;  %vm792_vm13 = vcmp.eq.f32.partialorder %v791_v56, 8.507059e+37 }
 0x693   : > { %v3687_v47 = vpop.eup %3686 }
 0x694   : > { %v783_v48 = vmul.f32 %v3687_v47, %v767_v46  ;;  %v764_v49 = vpop.xlane.xlu1 %763  ;;  %vm788_vm10 = vweird.f32 %v3687_v47 }
 0x695   : > { %3688 = vrcp.f32 %v764_v49  ;;  %vm789_vm12 = vmor %vm787_vm11, %vm788_vm10  ;;  %v779_v4 = vand.u32 2147483648, %v764_v49  ;;  %v777_v6 = vand.u32 2147483647, %v764_v49  ;;  %vm773_vm0 = vweird.f32 %v764_v49 }
 0x696   : > { %v784_v50 = vsub.f32 1.0, %v783_v48 }
 0x697   : > { %v780_v8 = vor.u32 1.1754944e-38, %v779_v4  ;;  %vm778_vm2 = vcmp.eq.f32.partialorder %v777_v6, 8.507059e+37 }
 0x698   : > { %v785_v54 = vmul.f32 %v3687_v47, %v784_v50 }
 0x69a   : > { %v786_v57 = vadd.f32 %v3687_v47, %v785_v54 }
 0x69b   : > { %v3689_v58 = vpop.eup %3688 }
 0x69c   : > { %v769_v60 = vmul.f32 %v3689_v58, %v764_v49  ;;  %v790_v61 = vsel %vm789_vm12, %v3687_v47, %v786_v57  ;;  %vm774_vm14 = vweird.f32 %v3689_v58  ;;  %v1068_v49 = vpop.f32.mrf.mxu0 }
 0x69d   : > { %v795_v62 = vsel %vm792_vm13, %v794_v59, %v790_v61  ;;  %vm775_vm1 = vmor %vm773_vm0, %vm774_vm14  ;;  %v1069_v50 = vadd.f32 %v1068_v49, %v4170_v24 }
 0x69e   : > { %v770_v2 = vsub.f32 1.0, %v769_v60  ;;  %v797_v3 = vmul.f32 %v3683_v38, %v795_v62 }
 0x6a0   : > { %v771_v5 = vmul.f32 %v3689_v58, %v770_v2  ;;  %3485 = vmatpush.xpose.msk.msrb.mxu3 %vm359_vm6, %v797_v3 }
 0x6a2   : > { %v772_v7 = vadd.f32 %v3689_v58, %v771_v5 }
 0x6a4   : > { %v776_v10 = vsel %vm775_vm1, %v3689_v58, %v772_v7  ;;  %v1071_v17 = vpop.f32.mrf.mxu0 }
 0x6a5   : > { %v781_v14 = vsel %vm778_vm2, %v780_v8, %v776_v10 }
 0x6a6   : > { %v796_v15 = vmul.f32 %v3685_v20, %v781_v14 }
 0x6a8   : > { %3486 = vmatpush.xpose.msk.msrb.mxu3 %vm359_vm6, %v796_v15 }
 0x6ab   : > { %3487 = vmatmul.msk.f32.vlgmr.msrb.gmra.mxu3 %vm359_vm6, %v687_v19 }
 0x6ac   : > { %936 = vmatpush.msra.mxu3 %v878_v16 }
 0x6ff   : > { %v899_v21 = vpop.trf.xlu1 }
 0x700   : > { %3492 = vmatmul.msk.f32.vlgmr.msra.gmra.mxu3 %vm329_vm5, %v899_v21 }
 0x707   : > { %v900_v22 = vpop.trf.xlu1 }
 0x708   : > { %3493 = vmatmul.msk.f32.gmra.mxu3 %vm329_vm5, %v900_v22  ;;  %v880_v22 = vpop.f32.mrf.mxu2 }
 0x72e   : > { %v824_v25 = vpop.f32.mrf.mxu3 }
 0x72f   : > { %v827_v26 = vmul.f32 %v824_v25, %v4276_v28 }
 0x731   : > { %v829_v30 = vadd.f32 %v827_v26, %v4067_v33  ;;  %v1072_v26 = vadd.f32 %v1071_v17, %v4177_v31 }
 0x733   : > { %v831_v32 = vrot.slane %v829_v30, 1  ;;  %v832_v29 = vrot.slane %v829_v30, 2  ;;  %v833_v36 = vrot.slane %v829_v30, 3  ;;  %837 = vst.msk [vmem:[%s4284_s6 + $0x2] sm:$0x1] %vm448_vm15, %v829_v30  ;;  %v881_v30 = vadd.f32 %v880_v22, %v4214_v35 }
 0x735   : > { %838 = vst.msk [vmem:[%s4284_s6 + $0x12] sm:$0x1] %vm448_vm15, %v831_v32 }
 0x736   : > { %839 = vst.msk [vmem:[%s4284_s6 + $0x22] sm:$0x1] %vm448_vm15, %v832_v29 }
 0x737   : > { %840 = vst.msk [vmem:[%s4284_s6 + $0x32] sm:$0x1] %vm448_vm15, %v833_v36 }
 0x783   : > { %v938_v37 = vpop.f32.mrf.mxu3 }
 0x784   : > { %v944_v18 = vsel %vm359_vm6, %v938_v37, -inf }
 0x785   : > { %945 = vmax.xlane.f32.xlu2 %v944_v18 }
 0x78b   : > { %v941_v34 = vpop.f32.mrf.mxu3 }
 0x78c   : > { %v947_v38 = vsel %vm359_vm6, %v941_v34, -inf }
 0x78d   : > { %948 = vmax.xlane.f32.xlu1 %v947_v38 }
 0x7f8   : > { %v946_v33 = vpop.xlane.xlu2 %945 }
 0x7f9   : > { %v950_v20 = vsub.f32 %v938_v37, %v946_v33 }
 0x7fb   : > { %v952_v41 = vmul.f32 1.442695, %v950_v20 }
 0x800   : > { %v949_v44 = vpop.xlane.xlu1 %948 }
 0x801   : > { %v951_v39 = vsub.f32 %v941_v34, %v949_v44 }
 0x803   : > { %v954_v40 = vmul.f32 1.442695, %v951_v39 }
 0x805   : > { %3690 = vpow2.f32 %v954_v40 }
 0x806   : > { %3692 = vpow2.f32 %v952_v41 }
 0x80b   : > { %v3691_v43 = vpop.eup %3690 }
 0x80c   : > { %v959_v46 = vsel %vm359_vm6, %v3691_v43, 0.0  ;;  %v3693_v47 = vpop.eup %3692 }
 0x80d   : > { %960 = vadd.xlane.f32.xlu2 %v959_v46  ;;  %v956_v48 = vsel %vm359_vm6, %v3693_v47, 0.0 }
 0x815   : > { %957 = vadd.xlane.f32.xlu2 %v956_v48 }
 0x83e   : > { %1077 = vxpose.xlu2.b32.start.end [1/1] (short) (narrow) %v1069_v50, 16 }
 0x880   : > { %v961_v53 = vpop.xlane.xlu2 %960 }
 0x881   : > { %3694 = vrcp.f32 %v961_v53  ;;  %v987_v59 = vand.u32 2147483648, %v961_v53  ;;  %v985_v61 = vand.u32 2147483647, %v961_v53  ;;  %vm981_vm4 = vweird.f32 %v961_v53 }
 0x883   : > { %v988_v3 = vor.u32 1.1754944e-38, %v987_v59  ;;  %vm986_vm8 = vcmp.eq.f32.partialorder %v985_v61, 8.507059e+37 }
 0x887   : > { %v3695_v54 = vpop.eup %3694 }
 0x888   : > { %v977_v56 = vmul.f32 %v3695_v54, %v961_v53  ;;  %v958_v57 = vpop.xlane.xlu2 %957  ;;  %vm982_vm3 = vweird.f32 %v3695_v54 }
 0x889   : > { %3696 = vrcp.f32 %v958_v57  ;;  %vm983_vm7 = vmor %vm981_vm4, %vm982_vm3  ;;  %v973_v9 = vand.u32 2147483648, %v958_v57  ;;  %v971_v14 = vand.u32 2147483647, %v958_v57  ;;  %vm967_vm10 = vweird.f32 %v958_v57 }
 0x88a   : > { %v978_v58 = vsub.f32 1.0, %v977_v56  ;;  %v1262_v56 = vpop.f32.mrf.mxu2 }
 0x88b   : > { %v974_v16 = vor.u32 1.1754944e-38, %v973_v9  ;;  %vm972_vm12 = vcmp.eq.f32.partialorder %v971_v14, 8.507059e+37 }
 0x88c   : > { %v979_v60 = vmul.f32 %v3695_v54, %v978_v58 }
 0x88e   : > { %v980_v62 = vadd.f32 %v3695_v54, %v979_v60 }
 0x88f   : > { %v3697_v2 = vpop.eup %3696 }
 0x890   : > { %v984_v4 = vsel %vm983_vm7, %v3695_v54, %v980_v62  ;;  %v963_v5 = vmul.f32 %v3697_v2, %v958_v57  ;;  %vm968_vm9 = vweird.f32 %v3697_v2  ;;  %v1263_v57 = vadd.f32 %v1262_v56, %v4170_v24 }
 0x891   : > { %v989_v6 = vsel %vm986_vm8, %v988_v3, %v984_v4  ;;  %vm969_vm11 = vmor %vm967_vm10, %vm968_vm9 }
 0x892   : > { %v964_v7 = vsub.f32 1.0, %v963_v5  ;;  %v991_v8 = vmul.f32 %v3691_v43, %v989_v6 }
 0x894   : > { %v965_v10 = vmul.f32 %v3697_v2, %v964_v7  ;;  %3494 = vmatpush.xpose.msk.msrb.mxu1 %vm359_vm6, %v991_v8 }
 0x896   : > { %v966_v15 = vadd.f32 %v3697_v2, %v965_v10 }
 0x898   : > { %v970_v19 = vsel %vm969_vm11, %v3697_v2, %v966_v15 }
 0x899   : > { %v975_v21 = vsel %vm972_vm12, %v974_v16, %v970_v19 }
 0x89a   : > { %v990_v25 = vmul.f32 %v3693_v47, %v975_v21 }
 0x89c   : > { %3495 = vmatpush.xpose.msk.msrb.mxu1 %vm359_vm6, %v990_v25  ;;  %v1265_v25 = vpop.f32.mrf.mxu2 }
 0x89f   : > { %3496 = vmatmul.msk.f32.vlgmr.msrb.gmra.mxu1 %vm359_vm6, %v881_v30 }
 0x8a0   : > { %1130 = vmatpush.msra.mxu1 %v1072_v26 }
 0x8d7   : > { %v1093_v32 = vpop.trf.xlu2 }
 0x8d8   : > { %3501 = vmatmul.msk.f32.vlgmr.msra.gmra.mxu1 %vm329_vm5, %v1093_v32 }
 0x8df   : > { %v1094_v29 = vpop.trf.xlu2 }
 0x8e0   : > { %3502 = vmatmul.msk.f32.gmra.mxu1 %vm329_vm5, %v1094_v29  ;;  %v1266_v29 = vadd.f32 %v1265_v25, %v4177_v31 }
 0x91c   : > { %v1018_v36 = vpop.f32.mrf.mxu1 }
 0x91d   : > { %v1021_v37 = vmul.f32 %v1018_v36, %v4276_v28  ;;  %v1074_v36 = vpop.f32.mrf.mxu0 }
 0x91f   : > { %v1023_v18 = vadd.f32 %v1021_v37, %v4227_v52  ;;  %v1075_v37 = vadd.f32 %v1074_v36, %v4214_v35 }
 0x921   : > { %v1025_v34 = vrot.slane %v1023_v18, 1  ;;  %v1026_v38 = vrot.slane %v1023_v18, 2  ;;  %v1027_v33 = vrot.slane %v1023_v18, 3  ;;  %1031 = vst.msk [vmem:[%s4284_s6 + $0x3] sm:$0x1] %vm448_vm15, %v1023_v18 }
 0x923   : > { %1032 = vst.msk [vmem:[%s4284_s6 + $0x13] sm:$0x1] %vm448_vm15, %v1025_v34 }
 0x924   : > { %1033 = vst.msk [vmem:[%s4284_s6 + $0x23] sm:$0x1] %vm448_vm15, %v1026_v38 }
 0x925   : > { %1034 = vst.msk [vmem:[%s4284_s6 + $0x33] sm:$0x1] %vm448_vm15, %v1027_v33 }
 0x955   : > { %v1132_v44 = vpop.f32.mrf.mxu1 }
 0x956   : > { %v1138_v40 = vsel %vm359_vm6, %v1132_v44, -inf }
 0x95d   : > { %v1135_v39 = vpop.f32.mrf.mxu1 }
 0x95e   : > { %v1141_v20 = vsel %vm359_vm6, %v1135_v39, -inf }
 0x95f   : > { %1142 = vmax.xlane.f32.xlu0 %v1141_v20 }
 0x967   : > { %1139 = vmax.xlane.f32.xlu0 %v1138_v40 }
 0x9d2   : > { %v1143_v52 = vpop.xlane.xlu0 %1142 }
 0x9d3   : > { %v1145_v41 = vsub.f32 %v1135_v39, %v1143_v52 }
 0x9d5   : > { %v1148_v43 = vmul.f32 1.442695, %v1145_v41 }
 0x9d7   : > { %3698 = vpow2.f32 %v1148_v43 }
 0x9da   : > { %v1140_v46 = vpop.xlane.xlu0 %1139 }
 0x9db   : > { %v1144_v47 = vsub.f32 %v1132_v44, %v1140_v46 }
 0x9dd   : > { %v3699_v48 = vpop.eup %3698  ;;  %v1146_v49 = vmul.f32 1.442695, %v1144_v47 }
 0x9de   : > { %v1153_v50 = vsel %vm359_vm6, %v3699_v48, 0.0 }
 0x9df   : > { %3700 = vpow2.f32 %v1146_v49  ;;  %1154 = vadd.xlane.f32.xlu0 %v1153_v50 }
 0x9e5   : > { %v3701_v53 = vpop.eup %3700 }
 0x9e6   : > { %v1150_v54 = vsel %vm359_vm6, %v3701_v53, 0.0 }
 0x9e7   : > { %1151 = vadd.xlane.f32.xlu2 %v1150_v54 }
 0xa08   : > { %1271 = vxpose.xlu0.b32.start.end [1/1] (short) (narrow) %v1263_v57, 16 }
 0xa52   : > { %v1155_v58 = vpop.xlane.xlu0 %1154 }
 0xa53   : > { %3702 = vrcp.f32 %v1155_v58  ;;  %v1181_v2 = vand.u32 2147483648, %v1155_v58  ;;  %v1179_v4 = vand.u32 2147483647, %v1155_v58  ;;  %vm1175_vm14 = vweird.f32 %v1155_v58 }
 0xa55   : > { %v1182_v7 = vor.u32 1.1754944e-38, %v1181_v2  ;;  %vm1180_vm1 = vcmp.eq.f32.partialorder %v1179_v4, 8.507059e+37 }
 0xa59   : > { %v3703_v59 = vpop.eup %3702 }
 0xa5a   : > { %v1171_v60 = vmul.f32 %v3703_v59, %v1155_v58  ;;  %v1152_v61 = vpop.xlane.xlu2 %1151  ;;  %vm1176_vm13 = vweird.f32 %v3703_v59 }
 0xa5b   : > { %3704 = vrcp.f32 %v1152_v61  ;;  %vm1177_vm0 = vmor %vm1175_vm14, %vm1176_vm13  ;;  %v1167_v16 = vand.u32 2147483648, %v1152_v61  ;;  %v1165_v19 = vand.u32 2147483647, %v1152_v61  ;;  %vm1161_vm3 = vweird.f32 %v1152_v61 }
 0xa5c   : > { %v1172_v62 = vsub.f32 1.0, %v1171_v60 }
 0xa5d   : > { %v1168_v22 = vor.u32 1.1754944e-38, %v1167_v16  ;;  %vm1166_vm7 = vcmp.eq.f32.partialorder %v1165_v19, 8.507059e+37 }
 0xa5e   : > { %v1173_v3 = vmul.f32 %v3703_v59, %v1172_v62 }
 0xa60   : > { %v1174_v5 = vadd.f32 %v3703_v59, %v1173_v3 }
 0xa61   : > { %v3705_v6 = vpop.eup %3704 }
 0xa62   : > { %v1178_v8 = vsel %vm1177_vm0, %v3703_v59, %v1174_v5  ;;  %v1157_v9 = vmul.f32 %v3705_v6, %v1152_v61  ;;  %vm1162_vm2 = vweird.f32 %v3705_v6  ;;  %v1456_v59 = vpop.f32.mrf.mxu0 }
 0xa63   : > { %v1183_v10 = vsel %vm1180_vm1, %v1182_v7, %v1178_v8  ;;  %vm1163_vm4 = vmor %vm1161_vm3, %vm1162_vm2  ;;  %v1457_v60 = vadd.f32 %v1456_v59, %v4170_v24 }
 0xa64   : > { %v1158_v14 = vsub.f32 1.0, %v1157_v9  ;;  %v1185_v15 = vmul.f32 %v3699_v48, %v1183_v10 }
 0xa66   : > { %v1159_v17 = vmul.f32 %v3705_v6, %v1158_v14  ;;  %3503 = vmatpush.xpose.msk.msrb.mxu3 %vm359_vm6, %v1185_v15 }
 0xa68   : > { %v1160_v21 = vadd.f32 %v3705_v6, %v1159_v17 }
 0xa6a   : > { %v1164_v26 = vsel %vm1163_vm4, %v3705_v6, %v1160_v21 }
 0xa6b   : > { %v1169_v30 = vsel %vm1166_vm7, %v1168_v22, %v1164_v26 }
 0xa6c   : > { %v1184_v32 = vmul.f32 %v3701_v53, %v1169_v30 }
 0xa6e   : > { %3504 = vmatpush.xpose.msk.msrb.mxu3 %vm359_vm6, %v1184_v32  ;;  %v1459_v32 = vpop.f32.mrf.mxu0 }
 0xa71   : > { %3505 = vmatmul.msk.f32.vlgmr.msrb.gmra.mxu3 %vm359_vm6, %v1075_v37  ;;  %v1268_v37 = vpop.f32.mrf.mxu2 }
 0xa72   : > { %1324 = vmatpush.msra.mxu3 %v1266_v29 }
 0xaac   : > { %v1287_v18 = vpop.trf.xlu0 }
 0xaad   : > { %3510 = vmatmul.msk.f32.vlgmr.msra.gmra.mxu3 %vm329_vm5, %v1287_v18 }
 0xab4   : > { %v1288_v34 = vpop.trf.xlu0 }
 0xab5   : > { %3511 = vmatmul.msk.f32.gmra.mxu3 %vm329_vm5, %v1288_v34  ;;  %v1460_v34 = vadd.f32 %v1459_v32, %v4177_v31 }
 0xaf4   : > { %v1212_v38 = vpop.f32.mrf.mxu3 }
 0xaf5   : > { %v1215_v33 = vmul.f32 %v1212_v38, %v4276_v28  ;;  %v1269_v38 = vadd.f32 %v1268_v37, %v4214_v35 }
 0xaf7   : > { %v1217_v44 = vadd.f32 %v1215_v33, %v4092_v45 }
 0xaf9   : > { %v1219_v39 = vrot.slane %v1217_v44, 1  ;;  %v1220_v20 = vrot.slane %v1217_v44, 2  ;;  %v1221_v40 = vrot.slane %v1217_v44, 3  ;;  %1225 = vst.msk [vmem:[%s4284_s6 + $0x4] sm:$0x1] %vm448_vm15, %v1217_v44 }
 0xafb   : > { %1226 = vst.msk [vmem:[%s4284_s6 + $0x14] sm:$0x1] %vm448_vm15, %v1219_v39 }
 0xafc   : > { %1227 = vst.msk [vmem:[%s4284_s6 + $0x24] sm:$0x1] %vm448_vm15, %v1220_v20 }
 0xafd   : > { %1228 = vst.msk [vmem:[%s4284_s6 + $0x34] sm:$0x1] %vm448_vm15, %v1221_v40 }
 0xb30   : > { %v1326_v52 = vpop.f32.mrf.mxu3 }
 0xb31   : > { %v1332_v46 = vsel %vm359_vm6, %v1326_v52, -inf }
 0xb38   : > { %v1329_v41 = vpop.f32.mrf.mxu3 }
 0xb39   : > { %v1335_v43 = vsel %vm359_vm6, %v1329_v41, -inf }
 0xb3a   : > { %1336 = vmax.xlane.f32.xlu1 %v1335_v43 }
 0xb42   : > { %1333 = vmax.xlane.f32.xlu1 %v1332_v46 }
 0xbad   : > { %v1337_v45 = vpop.xlane.xlu1 %1336 }
 0xbae   : > { %v1339_v47 = vsub.f32 %v1329_v41, %v1337_v45 }
 0xbb0   : > { %v1342_v48 = vmul.f32 1.442695, %v1339_v47 }
 0xbb2   : > { %3706 = vpow2.f32 %v1342_v48 }
 0xbb5   : > { %v1334_v49 = vpop.xlane.xlu1 %1333 }
 0xbb6   : > { %v1338_v50 = vsub.f32 %v1326_v52, %v1334_v49 }
 0xbb8   : > { %v3707_v53 = vpop.eup %3706  ;;  %v1340_v54 = vmul.f32 1.442695, %v1338_v50 }
 0xbb9   : > { %v1347_v56 = vsel %vm359_vm6, %v3707_v53, 0.0 }
 0xbba   : > { %3708 = vpow2.f32 %v1340_v54  ;;  %1348 = vadd.xlane.f32.xlu0 %v1347_v56 }
 0xbc0   : > { %v3709_v57 = vpop.eup %3708 }
 0xbc1   : > { %v1344_v58 = vsel %vm359_vm6, %v3709_v57, 0.0 }
 0xbc2   : > { %1345 = vadd.xlane.f32.xlu1 %v1344_v58 }
 0xbfc   : > { %1465 = vxpose.xlu1.b32.start.end [1/1] (short) (narrow) %v1457_v60, 16 }
 0xc2d   : > { %v1349_v61 = vpop.xlane.xlu0 %1348 }
 0xc2e   : > { %3710 = vrcp.f32 %v1349_v61  ;;  %v1375_v5 = vand.u32 2147483648, %v1349_v61  ;;  %v1373_v7 = vand.u32 2147483647, %v1349_v61  ;;  %vm1369_vm9 = vweird.f32 %v1349_v61 }
 0xc30   : > { %v1376_v10 = vor.u32 1.1754944e-38, %v1375_v5  ;;  %vm1374_vm11 = vcmp.eq.f32.partialorder %v1373_v7, 8.507059e+37 }
 0xc34   : > { %v3711_v62 = vpop.eup %3710 }
 0xc35   : > { %v1365_v2 = vmul.f32 %v3711_v62, %v1349_v61  ;;  %v1346_v3 = vpop.xlane.xlu1 %1345  ;;  %vm1370_vm8 = vweird.f32 %v3711_v62  ;;  %v1650_v61 = vpop.f32.mrf.mxu2 }
 0xc36   : > { %3712 = vrcp.f32 %v1346_v3  ;;  %vm1371_vm10 = vmor %vm1369_vm9, %vm1370_vm8  ;;  %v1361_v21 = vand.u32 2147483648, %v1346_v3  ;;  %v1359_v25 = vand.u32 2147483647, %v1346_v3  ;;  %vm1355_vm13 = vweird.f32 %v1346_v3 }
 0xc37   : > { %v1366_v4 = vsub.f32 1.0, %v1365_v2 }
 0xc38   : > { %v1362_v30 = vor.u32 1.1754944e-38, %v1361_v21  ;;  %vm1360_vm0 = vcmp.eq.f32.partialorder %v1359_v25, 8.507059e+37 }
 0xc39   : > { %v1367_v6 = vmul.f32 %v3711_v62, %v1366_v4 }
 0xc3b   : > { %v1368_v8 = vadd.f32 %v3711_v62, %v1367_v6 }
 0xc3c   : > { %v3713_v9 = vpop.eup %3712 }
 0xc3d   : > { %v1372_v14 = vsel %vm1371_vm10, %v3711_v62, %v1368_v8  ;;  %v1351_v15 = vmul.f32 %v3713_v9, %v1346_v3  ;;  %vm1356_vm12 = vweird.f32 %v3713_v9  ;;  %v1651_v62 = vadd.f32 %v1650_v61, %v4170_v24 }
 0xc3e   : > { %v1377_v16 = vsel %vm1374_vm11, %v1376_v10, %v1372_v14  ;;  %vm1357_vm14 = vmor %vm1355_vm13, %vm1356_vm12 }
 0xc3f   : > { %v1352_v17 = vsub.f32 1.0, %v1351_v15  ;;  %v1379_v19 = vmul.f32 %v3707_v53, %v1377_v16 }
 0xc41   : > { %v1353_v22 = vmul.f32 %v3713_v9, %v1352_v17  ;;  %3512 = vmatpush.xpose.msk.msrb.mxu1 %vm359_vm6, %v1379_v19 }
 0xc43   : > { %v1354_v26 = vadd.f32 %v3713_v9, %v1353_v22 }
 0xc45   : > { %v1358_v29 = vsel %vm1357_vm14, %v3713_v9, %v1354_v26 }
 0xc46   : > { %v1363_v36 = vsel %vm1360_vm0, %v1362_v30, %v1358_v29 }
 0xc47   : > { %v1378_v18 = vmul.f32 %v3709_v57, %v1363_v36  ;;  %v1653_v36 = vpop.f32.mrf.mxu2 }
 0xc49   : > { %3513 = vmatpush.xpose.msk.msrb.mxu1 %vm359_vm6, %v1378_v18 }
 0xc4c   : > { %3514 = vmatmul.msk.f32.vlgmr.msrb.gmra.mxu1 %vm359_vm6, %v1269_v38  ;;  %v1654_v38 = vadd.f32 %v1653_v36, %v4177_v31 }
 0xc4d   : > { %1518 = vmatpush.msra.mxu1 %v1460_v34 }
 0xca0   : > { %v1481_v33 = vpop.trf.xlu1 }
 0xca1   : > { %3519 = vmatmul.msk.f32.vlgmr.msra.gmra.mxu1 %vm329_vm5, %v1481_v33  ;;  %v1462_v33 = vpop.f32.mrf.mxu0 }
 0xca8   : > { %v1482_v44 = vpop.trf.xlu1 }
 0xca9   : > { %3520 = vmatmul.msk.f32.gmra.mxu1 %vm329_vm5, %v1482_v44  ;;  %v1463_v44 = vadd.f32 %v1462_v33, %v4214_v35 }
 0xcc9   : > { %v1406_v39 = vpop.f32.mrf.mxu1 }
 0xcca   : > { %v1409_v20 = vmul.f32 %v1406_v39, %v4276_v28 }
 0xccc   : > { %v1411_v40 = vadd.f32 %v1409_v20, %v4239_v0 }
 0xcce   : > { %v1413_v52 = vrot.slane %v1411_v40, 1  ;;  %v1414_v41 = vrot.slane %v1411_v40, 2  ;;  %v1415_v43 = vrot.slane %v1411_v40, 3  ;;  %1419 = vst.msk [vmem:[%s4284_s6 + $0x5] sm:$0x1] %vm448_vm15, %v1411_v40 }
 0xcd0   : > { %1420 = vst.msk [vmem:[%s4284_s6 + $0x15] sm:$0x1] %vm448_vm15, %v1413_v52 }
 0xcd1   : > { %1421 = vst.msk [vmem:[%s4284_s6 + $0x25] sm:$0x1] %vm448_vm15, %v1414_v41 }
 0xcd2   : > { %1422 = vst.msk [vmem:[%s4284_s6 + $0x35] sm:$0x1] %vm448_vm15, %v1415_v43 }
 0xd1e   : > { %v1520_v46 = vpop.f32.mrf.mxu1 }
 0xd1f   : > { %v1526_v45 = vsel %vm359_vm6, %v1520_v46, -inf }
 0xd20   : > { %1527 = vmax.xlane.f32.xlu2 %v1526_v45 }
 0xd26   : > { %v1523_v47 = vpop.f32.mrf.mxu1 }
 0xd27   : > { %v1529_v48 = vsel %vm359_vm6, %v1523_v47, -inf }
 0xd28   : > { %1530 = vmax.xlane.f32.xlu1 %v1529_v48 }
 0xd93   : > { %v1528_v0 = vpop.xlane.xlu2 %1527 }
 0xd94   : > { %v1532_v53 = vsub.f32 %v1520_v46, %v1528_v0 }
 0xd96   : > { %v1534_v56 = vmul.f32 1.442695, %v1532_v53 }
 0xd9b   : > { %v1531_v49 = vpop.xlane.xlu1 %1530 }
 0xd9c   : > { %v1533_v50 = vsub.f32 %v1523_v47, %v1531_v49 }
 0xd9e   : > { %v1536_v54 = vmul.f32 1.442695, %v1533_v50 }
 0xda0   : > { %3714 = vpow2.f32 %v1536_v54 }
 0xda1   : > { %3716 = vpow2.f32 %v1534_v56 }
 0xda6   : > { %v3715_v57 = vpop.eup %3714 }
 0xda7   : > { %v1541_v58 = vsel %vm359_vm6, %v3715_v57, 0.0  ;;  %v3717_v59 = vpop.eup %3716 }
 0xda8   : > { %1542 = vadd.xlane.f32.xlu2 %v1541_v58  ;;  %v1538_v60 = vsel %vm359_vm6, %v3717_v59, 0.0 }
 0xdb0   : > { %1539 = vadd.xlane.f32.xlu2 %v1538_v60 }
 0xdd9   : > { %1659 = vxpose.xlu2.b32.start.end [1/1] (short) (narrow) %v1651_v62, 16  ;;  %v1844_v62 = vpop.f32.mrf.mxu0 }
 0xe1b   : > { %v1543_v2 = vpop.xlane.xlu2 %1542 }
 0xe1c   : > { %3718 = vrcp.f32 %v1543_v2  ;;  %v1569_v7 = vand.u32 2147483648, %v1543_v2  ;;  %v1567_v9 = vand.u32 2147483647, %v1543_v2  ;;  %vm1563_vm2 = vweird.f32 %v1543_v2 }
 0xe1e   : > { %v1570_v15 = vor.u32 1.1754944e-38, %v1569_v7  ;;  %vm1568_vm4 = vcmp.eq.f32.partialorder %v1567_v9, 8.507059e+37 }
 0xe22   : > { %v3719_v3 = vpop.eup %3718 }
 0xe23   : > { %v1559_v4 = vmul.f32 %v3719_v3, %v1543_v2  ;;  %v1540_v5 = vpop.xlane.xlu2 %1539  ;;  %vm1564_vm1 = vweird.f32 %v3719_v3  ;;  %v1845_v2 = vadd.f32 %v1844_v62, %v4170_v24 }
 0xe24   : > { %3720 = vrcp.f32 %v1540_v5  ;;  %vm1565_vm3 = vmor %vm1563_vm2, %vm1564_vm1  ;;  %v1555_v25 = vand.u32 2147483648, %v1540_v5  ;;  %v1553_v30 = vand.u32 2147483647, %v1540_v5  ;;  %vm1549_vm8 = vweird.f32 %v1540_v5 }
 0xe25   : > { %v1560_v6 = vsub.f32 1.0, %v1559_v4 }
 0xe26   : > { %v1556_v29 = vor.u32 1.1754944e-38, %v1555_v25  ;;  %vm1554_vm10 = vcmp.eq.f32.partialorder %v1553_v30, 8.507059e+37 }
 0xe27   : > { %v1561_v8 = vmul.f32 %v3719_v3, %v1560_v6 }
 0xe29   : > { %v1562_v10 = vadd.f32 %v3719_v3, %v1561_v8 }
 0xe2a   : > { %v3721_v14 = vpop.eup %3720 }
 0xe2b   : > { %v1566_v16 = vsel %vm1565_vm3, %v3719_v3, %v1562_v10  ;;  %v1545_v17 = vmul.f32 %v3721_v14, %v1540_v5  ;;  %vm1550_vm7 = vweird.f32 %v3721_v14 }
 0xe2c   : > { %v1571_v19 = vsel %vm1568_vm4, %v1570_v15, %v1566_v16  ;;  %vm1551_vm9 = vmor %vm1549_vm8, %vm1550_vm7 }
 0xe2d   : > { %v1546_v21 = vsub.f32 1.0, %v1545_v17  ;;  %v1573_v22 = vmul.f32 %v3715_v57, %v1571_v19 }
 0xe2f   : > { %v1547_v26 = vmul.f32 %v3721_v14, %v1546_v21  ;;  %3521 = vmatpush.xpose.msk.msrb.mxu3 %vm359_vm6, %v1573_v22 }
 0xe31   : > { %v1548_v32 = vadd.f32 %v3721_v14, %v1547_v26 }
 0xe33   : > { %v1552_v37 = vsel %vm1551_vm9, %v3721_v14, %v1548_v32 }
 0xe34   : > { %v1557_v18 = vsel %vm1554_vm10, %v1556_v29, %v1552_v37  ;;  %v1847_v37 = vpop.f32.mrf.mxu0 }
 0xe35   : > { %v1572_v34 = vmul.f32 %v3717_v59, %v1557_v18 }
 0xe37   : > { %3522 = vmatpush.xpose.msk.msrb.mxu3 %vm359_vm6, %v1572_v34 }
 0xe3a   : > { %3523 = vmatmul.msk.f32.vlgmr.msrb.gmra.mxu3 %vm359_vm6, %v1463_v44  ;;  %v1848_v44 = vadd.f32 %v1847_v37, %v4177_v31 }
 0xe3b   : > { %1712 = vmatpush.msra.mxu3 %v1654_v38  ;;  %v1656_v38 = vpop.f32.mrf.mxu2 }
 0xe43   : > { %v2038_v62 = vpop.f32.mrf.mxu2 }
 0xe4b   : > { %v2041_v37 = vpop.f32.mrf.mxu2 }
 0xe72   : > { %v1675_v39 = vpop.trf.xlu2 }
 0xe73   : > { %3528 = vmatmul.msk.f32.vlgmr.msra.gmra.mxu3 %vm329_vm5, %v1675_v39  ;;  %v1657_v39 = vadd.f32 %v1656_v38, %v4214_v35 }
 0xe7a   : > { %v1676_v20 = vpop.trf.xlu2 }
 0xe7b   : > { %3529 = vmatmul.msk.f32.gmra.mxu3 %vm329_vm5, %v1676_v20 }
 0xebd   : > { %v1600_v40 = vpop.f32.mrf.mxu3 }
 0xebe   : > { %v1603_v52 = vmul.f32 %v1600_v40, %v4276_v28 }
 0xec0   : > { %v1605_v41 = vadd.f32 %v1603_v52, %v4111_v55 }
 0xec2   : > { %v1607_v43 = vrot.slane %v1605_v41, 1  ;;  %v1608_v46 = vrot.slane %v1605_v41, 2  ;;  %v1609_v45 = vrot.slane %v1605_v41, 3  ;;  %1613 = vst.msk [vmem:[%s4284_s6 + $0x6] sm:$0x1] %vm448_vm15, %v1605_v41 }
 0xec4   : > { %1614 = vst.msk [vmem:[%s4284_s6 + $0x16] sm:$0x1] %vm448_vm15, %v1607_v43 }
 0xec5   : > { %1615 = vst.msk [vmem:[%s4284_s6 + $0x26] sm:$0x1] %vm448_vm15, %v1608_v46 }
 0xec6   : > { %1616 = vst.msk [vmem:[%s4284_s6 + $0x36] sm:$0x1] %vm448_vm15, %v1609_v45 }
 0xef6   : > { %v1714_v47 = vpop.f32.mrf.mxu3 }
 0xef7   : > { %v1720_v49 = vsel %vm359_vm6, %v1714_v47, -inf }
 0xefe   : > { %v1717_v48 = vpop.f32.mrf.mxu3 }
 0xeff   : > { %v1723_v0 = vsel %vm359_vm6, %v1717_v48, -inf }
 0xf00   : > { %1724 = vmax.xlane.f32.xlu0 %v1723_v0 }
 0xf08   : > { %1721 = vmax.xlane.f32.xlu0 %v1720_v49 }
 0xf73   : > { %v1725_v55 = vpop.xlane.xlu0 %1724 }
 0xf74   : > { %v1727_v50 = vsub.f32 %v1717_v48, %v1725_v55 }
 0xf76   : > { %v1730_v53 = vmul.f32 1.442695, %v1727_v50 }
 0xf78   : > { %3722 = vpow2.f32 %v1730_v53 }
 0xf7b   : > { %v1722_v54 = vpop.xlane.xlu0 %1721 }
 0xf7c   : > { %v1726_v56 = vsub.f32 %v1714_v47, %v1722_v54 }
 0xf7e   : > { %v3723_v57 = vpop.eup %3722  ;;  %v1728_v58 = vmul.f32 1.442695, %v1726_v56 }
 0xf7f   : > { %v1735_v59 = vsel %vm359_vm6, %v3723_v57, 0.0 }
 0xf80   : > { %3724 = vpow2.f32 %v1728_v58  ;;  %1736 = vadd.xlane.f32.xlu0 %v1735_v59 }
 0xf86   : > { %v3725_v60 = vpop.eup %3724 }
 0xf87   : > { %v1732_v61 = vsel %vm359_vm6, %v3725_v60, 0.0 }
 0xf88   : > { %1733 = vadd.xlane.f32.xlu2 %v1732_v61 }
 0xfa9   : > { %1853 = vxpose.xlu0.b32.start.end [1/1] (short) (narrow) %v1845_v2, 16  ;;  %v2039_v2 = vadd.f32 %v2038_v62, %v4170_v24 }
 0xff3   : > { %v1737_v3 = vpop.xlane.xlu0 %1736 }
 0xff4   : > { %3726 = vrcp.f32 %v1737_v3  ;;  %v1763_v8 = vand.u32 2147483648, %v1737_v3  ;;  %v1761_v10 = vand.u32 2147483647, %v1737_v3  ;;  %vm1757_vm12 = vweird.f32 %v1737_v3 }
 0xff6   : > { %v1764_v16 = vor.u32 1.1754944e-38, %v1763_v8  ;;  %vm1762_vm14 = vcmp.eq.f32.partialorder %v1761_v10, 8.507059e+37 }
 0xffa   : > { %v3727_v4 = vpop.eup %3726 }
 0xffb   : > { %v1753_v5 = vmul.f32 %v3727_v4, %v1737_v3  ;;  %v1734_v6 = vpop.xlane.xlu2 %1733  ;;  %vm1758_vm11 = vweird.f32 %v3727_v4 }
 0xffc   : > { %3728 = vrcp.f32 %v1734_v6  ;;  %vm1759_vm13 = vmor %vm1757_vm12, %vm1758_vm11  ;;  %v1749_v26 = vand.u32 2147483648, %v1734_v6  ;;  %v1747_v32 = vand.u32 2147483647, %v1734_v6  ;;  %vm1743_vm1 = vweird.f32 %v1734_v6 }
 0xffd   : > { %v1754_v7 = vsub.f32 1.0, %v1753_v5 }
 0xffe   : > { %v1750_v36 = vor.u32 1.1754944e-38, %v1749_v26  ;;  %vm1748_vm3 = vcmp.eq.f32.partialorder %v1747_v32, 8.507059e+37 }
 0xfff   : > { %v1755_v9 = vmul.f32 %v3727_v4, %v1754_v7 }
0x1001   : > { %v1756_v14 = vadd.f32 %v3727_v4, %v1755_v9 }
0x1002   : > { %v3729_v15 = vpop.eup %3728 }
0x1003   : > { %v1760_v17 = vsel %vm1759_vm13, %v3727_v4, %v1756_v14  ;;  %v1739_v19 = vmul.f32 %v3729_v15, %v1734_v6  ;;  %vm1744_vm0 = vweird.f32 %v3729_v15 }
0x1004   : > { %v1765_v21 = vsel %vm1762_vm14, %v1764_v16, %v1760_v17  ;;  %vm1745_vm2 = vmor %vm1743_vm1, %vm1744_vm0 }
0x1005   : > { %v1740_v22 = vsub.f32 1.0, %v1739_v19  ;;  %v1767_v25 = vmul.f32 %v3723_v57, %v1765_v21 }
0x1007   : > { %v1741_v30 = vmul.f32 %v3729_v15, %v1740_v22  ;;  %3530 = vmatpush.xpose.msk.msrb.mxu1 %vm359_vm6, %v1767_v25 }
0x1009   : > { %v1742_v29 = vadd.f32 %v3729_v15, %v1741_v30 }
0x100b   : > { %v1746_v18 = vsel %vm1745_vm2, %v3729_v15, %v1742_v29 }
0x100c   : > { %v1751_v34 = vsel %vm1748_vm3, %v1750_v36, %v1746_v18 }
0x100d   : > { %v1766_v33 = vmul.f32 %v3725_v60, %v1751_v34 }
0x100f   : > { %3531 = vmatpush.xpose.msk.msrb.mxu1 %vm359_vm6, %v1766_v33  ;;  %v2042_v33 = vadd.f32 %v2041_v37, %v4177_v31 }
0x1012   : > { %3532 = vmatmul.msk.f32.vlgmr.msrb.gmra.mxu1 %vm359_vm6, %v1657_v39 }
0x1013   : > { %1906 = vmatpush.msra.mxu1 %v1848_v44  ;;  %v1850_v44 = vpop.f32.mrf.mxu0 }
0x1014   : > { %v1851_v39 = vadd.f32 %v1850_v44, %v4214_v35 }
0x104d   : > { %v1869_v20 = vpop.trf.xlu0 }
0x104e   : > { %3537 = vmatmul.msk.f32.vlgmr.msra.gmra.mxu1 %vm329_vm5, %v1869_v20 }
0x1055   : > { %v1870_v40 = vpop.trf.xlu0 }
0x1056   : > { %3538 = vmatmul.msk.f32.gmra.mxu1 %vm329_vm5, %v1870_v40 }
0x108f   : > { %v1794_v52 = vpop.f32.mrf.mxu1 }
0x1090   : > { %v1797_v41 = vmul.f32 %v1794_v52, %v4276_v28 }
0x1092   : > { %v1799_v43 = vadd.f32 %v1797_v41, %v4257_v13 }
0x1094   : > { %v1801_v46 = vrot.slane %v1799_v43, 1  ;;  %v1802_v45 = vrot.slane %v1799_v43, 2  ;;  %v1803_v47 = vrot.slane %v1799_v43, 3  ;;  %1807 = vst.msk [vmem:[%s4284_s6 + $0x7] sm:$0x1] %vm448_vm15, %v1799_v43 }
0x1096   : > { %1808 = vst.msk [vmem:[%s4284_s6 + $0x17] sm:$0x1] %vm448_vm15, %v1801_v46 }
0x1097   : > { %1809 = vst.msk [vmem:[%s4284_s6 + $0x27] sm:$0x1] %vm448_vm15, %v1802_v45 }
0x1098   : > { %1810 = vst.msk [vmem:[%s4284_s6 + $0x37] sm:$0x1] %vm448_vm15, %v1803_v47 }
0x10cb   : > { %v1908_v48 = vpop.f32.mrf.mxu1 }
0x10cc   : > { %v1914_v55 = vsel %vm359_vm6, %v1908_v48, -inf }
0x10d3   : > { %v1911_v0 = vpop.f32.mrf.mxu1 }
0x10d4   : > { %v1917_v49 = vsel %vm359_vm6, %v1911_v0, -inf }
0x10d5   : > { %1918 = vmax.xlane.f32.xlu1 %v1917_v49 }
0x10dd   : > { %1915 = vmax.xlane.f32.xlu1 %v1914_v55 }
0x1148   : > { %v1919_v13 = vpop.xlane.xlu1 %1918 }
0x1149   : > { %v1921_v50 = vsub.f32 %v1911_v0, %v1919_v13 }
0x114b   : > { %v1924_v53 = vmul.f32 1.442695, %v1921_v50 }
0x114d   : > { %3730 = vpow2.f32 %v1924_v53 }
0x1150   : > { %v1916_v54 = vpop.xlane.xlu1 %1915 }
0x1151   : > { %v1920_v56 = vsub.f32 %v1908_v48, %v1916_v54 }
0x1153   : > { %v3731_v57 = vpop.eup %3730  ;;  %v1922_v58 = vmul.f32 1.442695, %v1920_v56 }
0x1154   : > { %v1929_v59 = vsel %vm359_vm6, %v3731_v57, 0.0 }
0x1155   : > { %3732 = vpow2.f32 %v1922_v58  ;;  %1930 = vadd.xlane.f32.xlu0 %v1929_v59 }
0x115b   : > { %v3733_v60 = vpop.eup %3732 }
0x115c   : > { %v1926_v61 = vsel %vm359_vm6, %v3733_v60, 0.0 }
0x115d   : > { %1927 = vadd.xlane.f32.xlu1 %v1926_v61  ;;  %v2232_v61 = vpop.f32.mrf.mxu0 }
0x115e   : > { %v2233_v62 = vadd.f32 %v2232_v61, %v4170_v24 }
0x1197   : > { %2047 = vxpose.xlu1.b32.start.end [1/1] (short) (narrow) %v2039_v2, 16 }
0x11c8   : > { %v1931_v3 = vpop.xlane.xlu0 %1930 }
0x11c9   : > { %3734 = vrcp.f32 %v1931_v3  ;;  %v1957_v8 = vand.u32 2147483648, %v1931_v3  ;;  %v1955_v10 = vand.u32 2147483647, %v1931_v3  ;;  %vm1951_vm7 = vweird.f32 %v1931_v3 }
0x11cb   : > { %v1958_v16 = vor.u32 1.1754944e-38, %v1957_v8  ;;  %vm1956_vm9 = vcmp.eq.f32.partialorder %v1955_v10, 8.507059e+37 }
0x11cf   : > { %v3735_v4 = vpop.eup %3734 }
0x11d0   : > { %v1947_v5 = vmul.f32 %v3735_v4, %v1931_v3  ;;  %v1928_v6 = vpop.xlane.xlu1 %1927  ;;  %vm1952_vm4 = vweird.f32 %v3735_v4 }
0x11d1   : > { %3736 = vrcp.f32 %v1928_v6  ;;  %vm1953_vm8 = vmor %vm1951_vm7, %vm1952_vm4  ;;  %v1943_v26 = vand.u32 2147483648, %v1928_v6  ;;  %v1941_v32 = vand.u32 2147483647, %v1928_v6  ;;  %vm1937_vm11 = vweird.f32 %v1928_v6 }
0x11d2   : > { %v1948_v7 = vsub.f32 1.0, %v1947_v5 }
0x11d3   : > { %v1944_v36 = vor.u32 1.1754944e-38, %v1943_v26  ;;  %vm1942_vm13 = vcmp.eq.f32.partialorder %v1941_v32, 8.507059e+37 }
0x11d4   : > { %v1949_v9 = vmul.f32 %v3735_v4, %v1948_v7 }
0x11d6   : > { %v1950_v14 = vadd.f32 %v3735_v4, %v1949_v9 }
0x11d7   : > { %v3737_v15 = vpop.eup %3736 }
0x11d8   : > { %v1954_v17 = vsel %vm1953_vm8, %v3735_v4, %v1950_v14  ;;  %v1933_v19 = vmul.f32 %v3737_v15, %v1928_v6  ;;  %vm1938_vm10 = vweird.f32 %v3737_v15 }
0x11d9   : > { %v1959_v21 = vsel %vm1956_vm9, %v1958_v16, %v1954_v17  ;;  %vm1939_vm12 = vmor %vm1937_vm11, %vm1938_vm10 }
0x11da   : > { %v1934_v22 = vsub.f32 1.0, %v1933_v19  ;;  %v1961_v25 = vmul.f32 %v3731_v57, %v1959_v21 }
0x11dc   : > { %v1935_v30 = vmul.f32 %v3737_v15, %v1934_v22  ;;  %3539 = vmatpush.xpose.msk.msrb.mxu3 %vm359_vm6, %v1961_v25 }
0x11de   : > { %v1936_v29 = vadd.f32 %v3737_v15, %v1935_v30 }
0x11e0   : > { %v1940_v18 = vsel %vm1939_vm12, %v3737_v15, %v1936_v29 }
0x11e1   : > { %v1945_v34 = vsel %vm1942_vm13, %v1944_v36, %v1940_v18  ;;  %v2235_v36 = vpop.f32.mrf.mxu0 }
0x11e2   : > { %v1960_v38 = vmul.f32 %v3733_v60, %v1945_v34  ;;  %v2044_v34 = vpop.f32.mrf.mxu2 }
0x11e3   : > { %v2045_v44 = vadd.f32 %v2044_v34, %v4214_v35 }
0x11e4   : > { %3540 = vmatpush.xpose.msk.msrb.mxu3 %vm359_vm6, %v1960_v38 }
0x11e7   : > { %3541 = vmatmul.msk.f32.vlgmr.msrb.gmra.mxu3 %vm359_vm6, %v1851_v39 }
0x11e8   : > { %2100 = vmatpush.msra.mxu3 %v2042_v33  ;;  %v2236_v33 = vadd.f32 %v2235_v36, %v4177_v31 }
0x11e9   : > { %v2238_v34 = vpop.f32.mrf.mxu0 }
0x123b   : > { %v2063_v20 = vpop.trf.xlu1 }
0x123c   : > { %3546 = vmatmul.msk.f32.vlgmr.msra.gmra.mxu3 %vm329_vm5, %v2063_v20 }
0x1243   : > { %v2064_v40 = vpop.trf.xlu1 }
0x1244   : > { %3547 = vmatmul.msk.f32.gmra.mxu3 %vm329_vm5, %v2064_v40 }
0x126a   : > { %v1988_v52 = vpop.f32.mrf.mxu3 }
0x126b   : > { %v1991_v41 = vmul.f32 %v1988_v52, %v4276_v28 }
0x126d   : > { %v1993_v43 = vadd.f32 %v1991_v41, %v4128_v1 }
0x126f   : > { %v1995_v46 = vrot.slane %v1993_v43, 1  ;;  %v1996_v45 = vrot.slane %v1993_v43, 2  ;;  %v1997_v47 = vrot.slane %v1993_v43, 3  ;;  %2001 = vst.msk [vmem:[%s4284_s6 + $0x8] sm:$0x1] %vm448_vm15, %v1993_v43 }
0x1271   : > { %2002 = vst.msk [vmem:[%s4284_s6 + $0x18] sm:$0x1] %vm448_vm15, %v1995_v46 }
0x1272   : > { %2003 = vst.msk [vmem:[%s4284_s6 + $0x28] sm:$0x1] %vm448_vm15, %v1996_v45 }
0x1273   : > { %2004 = vst.msk [vmem:[%s4284_s6 + $0x38] sm:$0x1] %vm448_vm15, %v1997_v47 }
0x12bf   : > { %v2102_v48 = vpop.f32.mrf.mxu3 }
0x12c0   : > { %v2108_v0 = vsel %vm359_vm6, %v2102_v48, -inf }
0x12c1   : > { %2109 = vmax.xlane.f32.xlu2 %v2108_v0 }
0x12c7   : > { %v2105_v49 = vpop.f32.mrf.mxu3 }
0x12c8   : > { %v2111_v55 = vsel %vm359_vm6, %v2105_v49, -inf }
0x12c9   : > { %2112 = vmax.xlane.f32.xlu1 %v2111_v55 }
0x1334   : > { %v2110_v1 = vpop.xlane.xlu2 %2109 }
0x1335   : > { %v2114_v53 = vsub.f32 %v2102_v48, %v2110_v1 }
0x1337   : > { %v2116_v56 = vmul.f32 1.442695, %v2114_v53 }
0x133c   : > { %v2113_v13 = vpop.xlane.xlu1 %2112 }
0x133d   : > { %v2115_v50 = vsub.f32 %v2105_v49, %v2113_v13 }
0x133f   : > { %v2118_v54 = vmul.f32 1.442695, %v2115_v50 }
0x1341   : > { %3738 = vpow2.f32 %v2118_v54 }
0x1342   : > { %3740 = vpow2.f32 %v2116_v56 }
0x1347   : > { %v3739_v57 = vpop.eup %3738 }
0x1348   : > { %v2123_v58 = vsel %vm359_vm6, %v3739_v57, 0.0  ;;  %v3741_v59 = vpop.eup %3740 }
0x1349   : > { %2124 = vadd.xlane.f32.xlu2 %v2123_v58  ;;  %v2120_v60 = vsel %vm359_vm6, %v3741_v59, 0.0 }
0x1351   : > { %2121 = vadd.xlane.f32.xlu2 %v2120_v60 }
0x137a   : > { %2241 = vxpose.xlu2.b32.start.end [1/1] (short) (narrow) %v2233_v62, 16 }
0x13bc   : > { %v2125_v2 = vpop.xlane.xlu2 %2124 }
0x13bd   : > { %3742 = vrcp.f32 %v2125_v2  ;;  %v2151_v7 = vand.u32 2147483648, %v2125_v2  ;;  %v2149_v9 = vand.u32 2147483647, %v2125_v2  ;;  %vm2145_vm0 = vweird.f32 %v2125_v2 }
0x13bf   : > { %v2152_v15 = vor.u32 1.1754944e-38, %v2151_v7  ;;  %vm2150_vm2 = vcmp.eq.f32.partialorder %v2149_v9, 8.507059e+37 }
0x13c3   : > { %v3743_v3 = vpop.eup %3742 }
0x13c4   : > { %v2141_v4 = vmul.f32 %v3743_v3, %v2125_v2  ;;  %v2122_v5 = vpop.xlane.xlu2 %2121  ;;  %vm2146_vm14 = vweird.f32 %v3743_v3 }
0x13c5   : > { %3744 = vrcp.f32 %v2122_v5  ;;  %vm2147_vm1 = vmor %vm2145_vm0, %vm2146_vm14  ;;  %v2137_v25 = vand.u32 2147483648, %v2122_v5  ;;  %v2135_v30 = vand.u32 2147483647, %v2122_v5  ;;  %vm2131_vm4 = vweird.f32 %v2122_v5 }
0x13c6   : > { %v2142_v6 = vsub.f32 1.0, %v2141_v4 }
0x13c7   : > { %v2138_v29 = vor.u32 1.1754944e-38, %v2137_v25  ;;  %vm2136_vm8 = vcmp.eq.f32.partialorder %v2135_v30, 8.507059e+37 }
0x13c8   : > { %v2143_v8 = vmul.f32 %v3743_v3, %v2142_v6 }
0x13ca   : > { %v2144_v10 = vadd.f32 %v3743_v3, %v2143_v8 }
0x13cb   : > { %v3745_v14 = vpop.eup %3744 }
0x13cc   : > { %v2148_v16 = vsel %vm2147_vm1, %v3743_v3, %v2144_v10  ;;  %v2127_v17 = vmul.f32 %v3745_v14, %v2122_v5  ;;  %vm2132_vm3 = vweird.f32 %v3745_v14 }
0x13cd   : > { %v2153_v19 = vsel %vm2150_vm2, %v2152_v15, %v2148_v16  ;;  %vm2133_vm7 = vmor %vm2131_vm4, %vm2132_vm3 }
0x13ce   : > { %v2128_v21 = vsub.f32 1.0, %v2127_v17  ;;  %v2155_v22 = vmul.f32 %v3739_v57, %v2153_v19 }
0x13d0   : > { %v2129_v26 = vmul.f32 %v3745_v14, %v2128_v21  ;;  %3548 = vmatpush.xpose.msk.msrb.mxu1 %vm359_vm6, %v2155_v22 }
0x13d2   : > { %v2130_v32 = vadd.f32 %v3745_v14, %v2129_v26 }
0x13d4   : > { %v2134_v37 = vsel %vm2133_vm7, %v3745_v14, %v2130_v32 }
0x13d5   : > { %v2139_v18 = vsel %vm2136_vm8, %v2138_v29, %v2134_v37 }
0x13d6   : > { %v2154_v38 = vmul.f32 %v3741_v59, %v2139_v18  ;;  %v2426_v59 = vpop.f32.mrf.mxu2 }
0x13d7   : > { %v2427_v60 = vadd.f32 %v2426_v59, %v4170_v24 }
0x13d8   : > { %3549 = vmatpush.xpose.msk.msrb.mxu1 %vm359_vm6, %v2154_v38  ;;  %v2239_v38 = vadd.f32 %v2238_v34, %v4214_v35 }
0x13db   : > { %3550 = vmatmul.msk.f32.vlgmr.msrb.gmra.mxu1 %vm359_vm6, %v2045_v44 }
0x13dc   : > { %2294 = vmatpush.msra.mxu1 %v2236_v33 }
0x13de   : > { %v2429_v32 = vpop.f32.mrf.mxu2 }
0x13df   : > { %v2430_v18 = vadd.f32 %v2429_v32, %v4177_v31 }
0x13e6   : > { %v2432_v32 = vpop.f32.mrf.mxu2 }
0x1413   : > { %v2257_v39 = vpop.trf.xlu2 }
0x1414   : > { %3555 = vmatmul.msk.f32.vlgmr.msra.gmra.mxu1 %vm329_vm5, %v2257_v39 }
0x141b   : > { %v2258_v20 = vpop.trf.xlu2 }
0x141c   : > { %3556 = vmatmul.msk.f32.gmra.mxu1 %vm329_vm5, %v2258_v20 }
0x1458   : > { %v2182_v40 = vpop.f32.mrf.mxu1 }
0x1459   : > { %v2185_v52 = vmul.f32 %v2182_v40, %v4276_v28 }
0x145b   : > { %v2187_v41 = vadd.f32 %v2185_v52, %v4272_v27 }
0x145d   : > { %v2189_v43 = vrot.slane %v2187_v41, 1  ;;  %v2190_v46 = vrot.slane %v2187_v41, 2  ;;  %v2191_v45 = vrot.slane %v2187_v41, 3  ;;  %2195 = vst.msk [vmem:[%s4284_s6 + $0x9] sm:$0x1] %vm448_vm15, %v2187_v41 }
0x145f   : > { %2196 = vst.msk [vmem:[%s4284_s6 + $0x19] sm:$0x1] %vm448_vm15, %v2189_v43 }
0x1460   : > { %2197 = vst.msk [vmem:[%s4284_s6 + $0x29] sm:$0x1] %vm448_vm15, %v2190_v46 }
0x1461   : > { %2198 = vst.msk [vmem:[%s4284_s6 + $0x39] sm:$0x1] %vm448_vm15, %v2191_v45 }
0x1491   : > { %v2296_v47 = vpop.f32.mrf.mxu1 }
0x1492   : > { %v2302_v49 = vsel %vm359_vm6, %v2296_v47, -inf }
0x1499   : > { %v2299_v48 = vpop.f32.mrf.mxu1 }
0x149a   : > { %v2305_v0 = vsel %vm359_vm6, %v2299_v48, -inf }
0x149b   : > { %2306 = vmax.xlane.f32.xlu0 %v2305_v0 }
0x14a3   : > { %2303 = vmax.xlane.f32.xlu0 %v2302_v49 }
0x150e   : > { %v2307_v27 = vpop.xlane.xlu0 %2306 }
0x150f   : > { %v2309_v55 = vsub.f32 %v2299_v48, %v2307_v27 }
0x1511   : > { %v2312_v1 = vmul.f32 1.442695, %v2309_v55 }
0x1513   : > { %3746 = vpow2.f32 %v2312_v1 }
0x1516   : > { %v2304_v13 = vpop.xlane.xlu0 %2303 }
0x1517   : > { %v2308_v50 = vsub.f32 %v2296_v47, %v2304_v13 }
0x1519   : > { %v3747_v53 = vpop.eup %3746  ;;  %v2310_v54 = vmul.f32 1.442695, %v2308_v50 }
0x151a   : > { %v2317_v56 = vsel %vm359_vm6, %v3747_v53, 0.0 }
0x151b   : > { %3748 = vpow2.f32 %v2310_v54  ;;  %2318 = vadd.xlane.f32.xlu0 %v2317_v56  ;;  %v2620_v56 = vpop.f32.mrf.mxu0 }
0x1521   : > { %v3749_v57 = vpop.eup %3748 }
0x1522   : > { %v2314_v58 = vsel %vm359_vm6, %v3749_v57, 0.0 }
0x1523   : > { %2315 = vadd.xlane.f32.xlu2 %v2314_v58 }
0x1544   : > { %2435 = vxpose.xlu0.b32.start.end [1/1] (short) (narrow) %v2427_v60, 16 }
0x158e   : > { %v2319_v61 = vpop.xlane.xlu0 %2318 }
0x158f   : > { %3750 = vrcp.f32 %v2319_v61  ;;  %v2345_v5 = vand.u32 2147483648, %v2319_v61  ;;  %v2343_v7 = vand.u32 2147483647, %v2319_v61  ;;  %vm2339_vm10 = vweird.f32 %v2319_v61 }
0x1591   : > { %v2346_v10 = vor.u32 1.1754944e-38, %v2345_v5  ;;  %vm2344_vm12 = vcmp.eq.f32.partialorder %v2343_v7, 8.507059e+37 }
0x1595   : > { %v3751_v62 = vpop.eup %3750 }
0x1596   : > { %v2335_v2 = vmul.f32 %v3751_v62, %v2319_v61  ;;  %v2316_v3 = vpop.xlane.xlu2 %2315  ;;  %vm2340_vm9 = vweird.f32 %v3751_v62 }
0x1597   : > { %3752 = vrcp.f32 %v2316_v3  ;;  %vm2341_vm11 = vmor %vm2339_vm10, %vm2340_vm9  ;;  %v2331_v21 = vand.u32 2147483648, %v2316_v3  ;;  %v2329_v25 = vand.u32 2147483647, %v2316_v3  ;;  %vm2325_vm14 = vweird.f32 %v2316_v3 }
0x1598   : > { %v2336_v4 = vsub.f32 1.0, %v2335_v2 }
0x1599   : > { %v2332_v30 = vor.u32 1.1754944e-38, %v2331_v21  ;;  %vm2330_vm1 = vcmp.eq.f32.partialorder %v2329_v25, 8.507059e+37  ;;  %v2623_v25 = vpop.f32.mrf.mxu0 }
0x159a   : > { %v2337_v6 = vmul.f32 %v3751_v62, %v2336_v4 }
0x159c   : > { %v2338_v8 = vadd.f32 %v3751_v62, %v2337_v6 }
0x159d   : > { %v3753_v9 = vpop.eup %3752 }
0x159e   : > { %v2342_v14 = vsel %vm2341_vm11, %v3751_v62, %v2338_v8  ;;  %v2321_v15 = vmul.f32 %v3753_v9, %v2316_v3  ;;  %vm2326_vm13 = vweird.f32 %v3753_v9 }
0x159f   : > { %v2347_v16 = vsel %vm2344_vm12, %v2346_v10, %v2342_v14  ;;  %vm2327_vm0 = vmor %vm2325_vm14, %vm2326_vm13 }
0x15a0   : > { %v2322_v17 = vsub.f32 1.0, %v2321_v15  ;;  %v2349_v19 = vmul.f32 %v3747_v53, %v2347_v16 }
0x15a2   : > { %v2323_v22 = vmul.f32 %v3753_v9, %v2322_v17  ;;  %3557 = vmatpush.xpose.msk.msrb.mxu3 %vm359_vm6, %v2349_v19 }
0x15a4   : > { %v2324_v26 = vadd.f32 %v3753_v9, %v2323_v22 }
0x15a6   : > { %v2328_v29 = vsel %vm2327_vm0, %v3753_v9, %v2324_v26 }
0x15a7   : > { %v2333_v36 = vsel %vm2330_vm1, %v2332_v30, %v2328_v29 }
0x15a8   : > { %v2348_v37 = vmul.f32 %v3749_v57, %v2333_v36  ;;  %v2621_v57 = vadd.f32 %v2620_v56, %v4170_v24  ;;  %v2624_v36 = vadd.f32 %v2623_v25, %v4177_v31 }
0x15aa   : > { %3558 = vmatpush.xpose.msk.msrb.mxu3 %vm359_vm6, %v2348_v37  ;;  %v2433_v37 = vadd.f32 %v2432_v32, %v4214_v35 }
0x15ad   : > { %3559 = vmatmul.msk.f32.vlgmr.msrb.gmra.mxu3 %vm359_vm6, %v2239_v38 }
0x15ae   : > { %2488 = vmatpush.msra.mxu3 %v2430_v18 }
0x15e8   : > { %v2451_v33 = vpop.trf.xlu0 }
0x15e9   : > { %3564 = vmatmul.msk.f32.vlgmr.msra.gmra.mxu3 %vm329_vm5, %v2451_v33 }
0x15f0   : > { %v2452_v44 = vpop.trf.xlu0 }
0x15f1   : > { %3565 = vmatmul.msk.f32.gmra.mxu3 %vm329_vm5, %v2452_v44 }
0x1630   : > { %v2376_v39 = vpop.f32.mrf.mxu3 }
0x1631   : > { %v2379_v20 = vmul.f32 %v2376_v39, %v4276_v28 }
0x1633   : > { %v2381_v40 = vadd.f32 %v2379_v20, %v4145_v11 }
0x1635   : > { %v2383_v52 = vrot.slane %v2381_v40, 1  ;;  %v2384_v41 = vrot.slane %v2381_v40, 2  ;;  %v2385_v43 = vrot.slane %v2381_v40, 3  ;;  %2389 = vst.msk [vmem:[%s4284_s6 + $0xa] sm:$0x1] %vm448_vm15, %v2381_v40 }
0x1637   : > { %2390 = vst.msk [vmem:[%s4284_s6 + $0x1a] sm:$0x1] %vm448_vm15, %v2383_v52 }
0x1638   : > { %2391 = vst.msk [vmem:[%s4284_s6 + $0x2a] sm:$0x1] %vm448_vm15, %v2384_v41 }
0x1639   : > { %2392 = vst.msk [vmem:[%s4284_s6 + $0x3a] sm:$0x1] %vm448_vm15, %v2385_v43 }
0x166c   : > { %v2490_v46 = vpop.f32.mrf.mxu3 }
0x166d   : > { %v2496_v48 = vsel %vm359_vm6, %v2490_v46, -inf }
0x1674   : > { %v2493_v45 = vpop.f32.mrf.mxu3 }
0x1675   : > { %v2499_v47 = vsel %vm359_vm6, %v2493_v45, -inf }
0x1676   : > { %2500 = vmax.xlane.f32.xlu1 %v2499_v47 }
0x167e   : > { %2497 = vmax.xlane.f32.xlu1 %v2496_v48 }
0x16e9   : > { %v2501_v11 = vpop.xlane.xlu1 %2500 }
0x16ea   : > { %v2503_v0 = vsub.f32 %v2493_v45, %v2501_v11 }
0x16ec   : > { %v2506_v49 = vmul.f32 1.442695, %v2503_v0 }
0x16ee   : > { %3754 = vpow2.f32 %v2506_v49 }
0x16f1   : > { %v2498_v27 = vpop.xlane.xlu1 %2497 }
0x16f2   : > { %v2502_v55 = vsub.f32 %v2490_v46, %v2498_v27 }
0x16f4   : > { %v3755_v1 = vpop.eup %3754  ;;  %v2504_v13 = vmul.f32 1.442695, %v2502_v55 }
0x16f5   : > { %v2511_v50 = vsel %vm359_vm6, %v3755_v1, 0.0 }
0x16f6   : > { %3756 = vpow2.f32 %v2504_v13  ;;  %2512 = vadd.xlane.f32.xlu0 %v2511_v50  ;;  %v2814_v13 = vpop.f32.mrf.mxu2 }
0x16f7   : > { %v2815_v50 = vadd.f32 %v2814_v13, %v4170_v24 }
0x16fc   : > { %v3757_v53 = vpop.eup %3756 }
0x16fd   : > { %v2508_v54 = vsel %vm359_vm6, %v3757_v53, 0.0 }
0x16fe   : > { %2509 = vadd.xlane.f32.xlu1 %v2508_v54 }
0x1738   : > { %2629 = vxpose.xlu1.b32.start.end [1/1] (short) (narrow) %v2621_v57, 16 }
0x1769   : > { %v2513_v58 = vpop.xlane.xlu0 %2512 }
0x176a   : > { %3758 = vrcp.f32 %v2513_v58  ;;  %v2539_v2 = vand.u32 2147483648, %v2513_v58  ;;  %v2537_v4 = vand.u32 2147483647, %v2513_v58  ;;  %vm2533_vm3 = vweird.f32 %v2513_v58 }
0x176c   : > { %v2540_v7 = vor.u32 1.1754944e-38, %v2539_v2  ;;  %vm2538_vm7 = vcmp.eq.f32.partialorder %v2537_v4, 8.507059e+37 }
0x1770   : > { %v3759_v59 = vpop.eup %3758 }
0x1771   : > { %v2529_v60 = vmul.f32 %v3759_v59, %v2513_v58  ;;  %v2510_v61 = vpop.xlane.xlu1 %2509  ;;  %vm2534_vm2 = vweird.f32 %v3759_v59 }
0x1772   : > { %3760 = vrcp.f32 %v2510_v61  ;;  %vm2535_vm4 = vmor %vm2533_vm3, %vm2534_vm2  ;;  %v2525_v16 = vand.u32 2147483648, %v2510_v61  ;;  %v2523_v19 = vand.u32 2147483647, %v2510_v61  ;;  %vm2519_vm9 = vweird.f32 %v2510_v61 }
0x1773   : > { %v2530_v62 = vsub.f32 1.0, %v2529_v60 }
0x1774   : > { %v2526_v22 = vor.u32 1.1754944e-38, %v2525_v16  ;;  %vm2524_vm11 = vcmp.eq.f32.partialorder %v2523_v19, 8.507059e+37 }
0x1775   : > { %v2531_v3 = vmul.f32 %v3759_v59, %v2530_v62 }
0x1777   : > { %v2532_v5 = vadd.f32 %v3759_v59, %v2531_v3 }
0x1778   : > { %v3761_v6 = vpop.eup %3760 }
0x1779   : > { %v2536_v8 = vsel %vm2535_vm4, %v3759_v59, %v2532_v5  ;;  %v2515_v9 = vmul.f32 %v3761_v6, %v2510_v61  ;;  %vm2520_vm8 = vweird.f32 %v3761_v6 }
0x177a   : > { %v2541_v10 = vsel %vm2538_vm7, %v2540_v7, %v2536_v8  ;;  %vm2521_vm10 = vmor %vm2519_vm9, %vm2520_vm8 }
0x177b   : > { %v2516_v14 = vsub.f32 1.0, %v2515_v9  ;;  %v2543_v15 = vmul.f32 %v3755_v1, %v2541_v10 }
0x177d   : > { %v2517_v17 = vmul.f32 %v3761_v6, %v2516_v14  ;;  %3566 = vmatpush.xpose.msk.msrb.mxu1 %vm359_vm6, %v2543_v15 }
0x177f   : > { %v2518_v21 = vadd.f32 %v3761_v6, %v2517_v17  ;;  %v2817_v17 = vpop.f32.mrf.mxu2 }
0x1780   : > { %v2818_v25 = vadd.f32 %v2817_v17, %v4177_v31 }
0x1781   : > { %v2522_v26 = vsel %vm2521_vm10, %v3761_v6, %v2518_v21 }
0x1782   : > { %v2527_v30 = vsel %vm2524_vm11, %v2526_v22, %v2522_v26  ;;  %v2626_v26 = vpop.f32.mrf.mxu0 }
0x1783   : > { %v2542_v29 = vmul.f32 %v3757_v53, %v2527_v30  ;;  %v2627_v30 = vadd.f32 %v2626_v26, %v4214_v35 }
0x1785   : > { %3567 = vmatpush.xpose.msk.msrb.mxu1 %vm359_vm6, %v2542_v29 }
0x1788   : > { %3568 = vmatmul.msk.f32.vlgmr.msrb.gmra.mxu1 %vm359_vm6, %v2433_v37 }
0x1789   : > { %2682 = vmatpush.msra.mxu1 %v2624_v36 }
0x17dc   : > { %v2645_v18 = vpop.trf.xlu1 }
0x17dd   : > { %3573 = vmatmul.msk.f32.vlgmr.msra.gmra.mxu1 %vm329_vm5, %v2645_v18 }
0x17e4   : > { %v2646_v34 = vpop.trf.xlu1 }
0x17e5   : > { %3574 = vmatmul.msk.f32.gmra.mxu1 %vm329_vm5, %v2646_v34 }
0x1805   : > { %v2570_v38 = vpop.f32.mrf.mxu1 }
0x1806   : > { %v2573_v33 = vmul.f32 %v2570_v38, %v4276_v28 }
0x1808   : > { %v2575_v44 = vadd.f32 %v2573_v33, %v4305_v51 }
0x180a   : > { %v2577_v39 = vrot.slane %v2575_v44, 1  ;;  %v2578_v20 = vrot.slane %v2575_v44, 2  ;;  %v2579_v40 = vrot.slane %v2575_v44, 3  ;;  %2583 = vst.msk [vmem:[%s4284_s6 + $0xb] sm:$0x1] %vm448_vm15, %v2575_v44 }
0x180c   : > { %2584 = vst.msk [vmem:[%s4284_s6 + $0x1b] sm:$0x1] %vm448_vm15, %v2577_v39 }
0x180d   : > { %2585 = vst.msk [vmem:[%s4284_s6 + $0x2b] sm:$0x1] %vm448_vm15, %v2578_v20 }
0x180e   : > { %2586 = vst.msk [vmem:[%s4284_s6 + $0x3b] sm:$0x1] %vm448_vm15, %v2579_v40 }
0x185a   : > { %v2684_v52 = vpop.f32.mrf.mxu1 }
0x185b   : > { %v2690_v41 = vsel %vm359_vm6, %v2684_v52, -inf }
0x185c   : > { %2691 = vmax.xlane.f32.xlu2 %v2690_v41 }
0x1862   : > { %v2687_v43 = vpop.f32.mrf.mxu1 }
0x1863   : > { %v2693_v46 = vsel %vm359_vm6, %v2687_v43, -inf }
0x1864   : > { %2694 = vmax.xlane.f32.xlu1 %v2693_v46 }
0x18cf   : > { %v2692_v51 = vpop.xlane.xlu2 %2691 }
0x18d0   : > { %v2696_v48 = vsub.f32 %v2684_v52, %v2692_v51 }
0x18d2   : > { %v2698_v0 = vmul.f32 1.442695, %v2696_v48 }
0x18d7   : > { %v2695_v45 = vpop.xlane.xlu1 %2694 }
0x18d8   : > { %v2697_v47 = vsub.f32 %v2687_v43, %v2695_v45 }
0x18da   : > { %v2700_v11 = vmul.f32 1.442695, %v2697_v47 }
0x18dc   : > { %3762 = vpow2.f32 %v2700_v11 }
0x18dd   : > { %3764 = vpow2.f32 %v2698_v0  ;;  %v3008_v0 = vpop.f32.mrf.mxu0 }
0x18e2   : > { %v3763_v49 = vpop.eup %3762 }
0x18e3   : > { %v2705_v27 = vsel %vm359_vm6, %v3763_v49, 0.0  ;;  %v3765_v55 = vpop.eup %3764 }
0x18e4   : > { %2706 = vadd.xlane.f32.xlu2 %v2705_v27  ;;  %v2702_v1 = vsel %vm359_vm6, %v3765_v55, 0.0 }
0x18ec   : > { %2703 = vadd.xlane.f32.xlu2 %v2702_v1 }
0x1915   : > { %2823 = vxpose.xlu2.b32.start.end [1/1] (short) (narrow) %v2815_v50, 16 }
0x1957   : > { %v2707_v53 = vpop.xlane.xlu2 %2706 }
0x1958   : > { %3766 = vrcp.f32 %v2707_v53  ;;  %v2733_v59 = vand.u32 2147483648, %v2707_v53  ;;  %v2731_v61 = vand.u32 2147483647, %v2707_v53  ;;  %vm2727_vm13 = vweird.f32 %v2707_v53 }
0x195a   : > { %v2734_v3 = vor.u32 1.1754944e-38, %v2733_v59  ;;  %vm2732_vm0 = vcmp.eq.f32.partialorder %v2731_v61, 8.507059e+37 }
0x195e   : > { %v3767_v54 = vpop.eup %3766 }
0x195f   : > { %v2723_v56 = vmul.f32 %v3767_v54, %v2707_v53  ;;  %v2704_v57 = vpop.xlane.xlu2 %2703  ;;  %vm2728_vm12 = vweird.f32 %v3767_v54 }
0x1960   : > { %3768 = vrcp.f32 %v2704_v57  ;;  %vm2729_vm14 = vmor %vm2727_vm13, %vm2728_vm12  ;;  %v2719_v9 = vand.u32 2147483648, %v2704_v57  ;;  %v2717_v14 = vand.u32 2147483647, %v2704_v57  ;;  %vm2713_vm2 = vweird.f32 %v2704_v57 }
0x1961   : > { %v2724_v58 = vsub.f32 1.0, %v2723_v56 }
0x1962   : > { %v2720_v16 = vor.u32 1.1754944e-38, %v2719_v9  ;;  %vm2718_vm4 = vcmp.eq.f32.partialorder %v2717_v14, 8.507059e+37  ;;  %v3011_v9 = vpop.f32.mrf.mxu0 }
0x1963   : > { %v2725_v60 = vmul.f32 %v3767_v54, %v2724_v58  ;;  %v3012_v17 = vadd.f32 %v3011_v9, %v4177_v31 }
0x1965   : > { %v2726_v62 = vadd.f32 %v3767_v54, %v2725_v60 }
0x1966   : > { %v3769_v2 = vpop.eup %3768 }
0x1967   : > { %v2730_v4 = vsel %vm2729_vm14, %v3767_v54, %v2726_v62  ;;  %v2709_v5 = vmul.f32 %v3769_v2, %v2704_v57  ;;  %vm2714_vm1 = vweird.f32 %v3769_v2 }
0x1968   : > { %v2735_v6 = vsel %vm2732_vm0, %v2734_v3, %v2730_v4  ;;  %vm2715_vm3 = vmor %vm2713_vm2, %vm2714_vm1 }
0x1969   : > { %v2710_v7 = vsub.f32 1.0, %v2709_v5  ;;  %v2737_v8 = vmul.f32 %v3763_v49, %v2735_v6  ;;  %v3009_v49 = vadd.f32 %v3008_v0, %v4170_v24 }
0x196b   : > { %v2711_v10 = vmul.f32 %v3769_v2, %v2710_v7  ;;  %3575 = vmatpush.xpose.msk.msrb.mxu3 %vm359_vm6, %v2737_v8 }
0x196d   : > { %v2712_v15 = vadd.f32 %v3769_v2, %v2711_v10 }
0x196f   : > { %v2716_v19 = vsel %vm2715_vm3, %v3769_v2, %v2712_v15  ;;  %v2820_v15 = vpop.f32.mrf.mxu2 }
0x1970   : > { %v2721_v21 = vsel %vm2718_vm4, %v2720_v16, %v2716_v19  ;;  %v2821_v19 = vadd.f32 %v2820_v15, %v4214_v35 }
0x1971   : > { %v2736_v22 = vmul.f32 %v3765_v55, %v2721_v21 }
0x1973   : > { %3576 = vmatpush.xpose.msk.msrb.mxu3 %vm359_vm6, %v2736_v22 }
0x1976   : > { %3577 = vmatmul.msk.f32.vlgmr.msrb.gmra.mxu3 %vm359_vm6, %v2627_v30 }
0x1977   : > { %2876 = vmatpush.msra.mxu3 %v2818_v25 }
0x19ae   : > { %v2839_v32 = vpop.trf.xlu2 }
0x19af   : > { %3582 = vmatmul.msk.f32.vlgmr.msra.gmra.mxu3 %vm329_vm5, %v2839_v32 }
0x19b6   : > { %v2840_v29 = vpop.trf.xlu2 }
0x19b7   : > { %3583 = vmatmul.msk.f32.gmra.mxu3 %vm329_vm5, %v2840_v29 }
0x19f9   : > { %v2764_v36 = vpop.f32.mrf.mxu3 }
0x19fa   : > { %v2767_v37 = vmul.f32 %v2764_v36, %v4276_v28 }
0x19fc   : > { %v2769_v18 = vadd.f32 %v2767_v37, %v4164_v23 }
0x19fe   : > { %v2771_v34 = vrot.slane %v2769_v18, 1  ;;  %v2772_v38 = vrot.slane %v2769_v18, 2  ;;  %v2773_v33 = vrot.slane %v2769_v18, 3  ;;  %2777 = vst.msk [vmem:[%s4284_s6 + $0xc] sm:$0x1] %vm448_vm15, %v2769_v18 }
0x1a00   : > { %2778 = vst.msk [vmem:[%s4284_s6 + $0x1c] sm:$0x1] %vm448_vm15, %v2771_v34 }
0x1a01   : > { %2779 = vst.msk [vmem:[%s4284_s6 + $0x2c] sm:$0x1] %vm448_vm15, %v2772_v38 }
0x1a02   : > { %2780 = vst.msk [vmem:[%s4284_s6 + $0x3c] sm:$0x1] %vm448_vm15, %v2773_v33 }
0x1a32   : > { %v2878_v44 = vpop.f32.mrf.mxu3 }
0x1a33   : > { %v2884_v40 = vsel %vm359_vm6, %v2878_v44, -inf }
0x1a3a   : > { %v2881_v39 = vpop.f32.mrf.mxu3 }
0x1a3b   : > { %v2887_v20 = vsel %vm359_vm6, %v2881_v39, -inf }
0x1a3c   : > { %2888 = vmax.xlane.f32.xlu0 %v2887_v20 }
0x1a44   : > { %2885 = vmax.xlane.f32.xlu0 %v2884_v40 }
0x1aaf   : > { %v2889_v23 = vpop.xlane.xlu0 %2888 }
0x1ab0   : > { %v2891_v52 = vsub.f32 %v2881_v39, %v2889_v23 }
0x1ab2   : > { %v2894_v41 = vmul.f32 1.442695, %v2891_v52 }
0x1ab4   : > { %3770 = vpow2.f32 %v2894_v41 }
0x1ab7   : > { %v2886_v43 = vpop.xlane.xlu0 %2885 }
0x1ab8   : > { %v2890_v46 = vsub.f32 %v2878_v44, %v2886_v43 }
0x1aba   : > { %v3771_v51 = vpop.eup %3770  ;;  %v2892_v45 = vmul.f32 1.442695, %v2890_v46  ;;  %v3202_v46 = vpop.f32.mrf.mxu2 }
0x1abb   : > { %v2899_v47 = vsel %vm359_vm6, %v3771_v51, 0.0 }
0x1abc   : > { %3772 = vpow2.f32 %v2892_v45  ;;  %2900 = vadd.xlane.f32.xlu0 %v2899_v47 }
0x1ac2   : > { %v3773_v48 = vpop.eup %3772 }
0x1ac3   : > { %v2896_v11 = vsel %vm359_vm6, %v3773_v48, 0.0 }
0x1ac4   : > { %2897 = vadd.xlane.f32.xlu2 %v2896_v11 }
0x1ae5   : > { %3017 = vxpose.xlu0.b32.start.end [1/1] (short) (narrow) %v3009_v49, 16 }
0x1b2f   : > { %v2901_v27 = vpop.xlane.xlu0 %2900 }
0x1b30   : > { %3774 = vrcp.f32 %v2901_v27  ;;  %v2927_v53 = vand.u32 2147483648, %v2901_v27  ;;  %v2925_v56 = vand.u32 2147483647, %v2901_v27  ;;  %vm2921_vm8 = vweird.f32 %v2901_v27 }
0x1b32   : > { %v2928_v59 = vor.u32 1.1754944e-38, %v2927_v53  ;;  %vm2926_vm10 = vcmp.eq.f32.partialorder %v2925_v56, 8.507059e+37 }
0x1b36   : > { %v3775_v55 = vpop.eup %3774 }
0x1b37   : > { %v2917_v1 = vmul.f32 %v3775_v55, %v2901_v27  ;;  %v2898_v13 = vpop.xlane.xlu2 %2897  ;;  %vm2922_vm7 = vweird.f32 %v3775_v55 }
0x1b38   : > { %3776 = vrcp.f32 %v2898_v13  ;;  %vm2923_vm9 = vmor %vm2921_vm8, %vm2922_vm7  ;;  %v2913_v4 = vand.u32 2147483648, %v2898_v13  ;;  %v2911_v6 = vand.u32 2147483647, %v2898_v13  ;;  %vm2907_vm12 = vweird.f32 %v2898_v13 }
0x1b39   : > { %v2918_v50 = vsub.f32 1.0, %v2917_v1 }
0x1b3a   : > { %v2914_v8 = vor.u32 1.1754944e-38, %v2913_v4  ;;  %vm2912_vm14 = vcmp.eq.f32.partialorder %v2911_v6, 8.507059e+37 }
0x1b3b   : > { %v2919_v54 = vmul.f32 %v3775_v55, %v2918_v50 }
0x1b3d   : > { %v2920_v57 = vadd.f32 %v3775_v55, %v2919_v54 }
0x1b3e   : > { %v3777_v58 = vpop.eup %3776 }
0x1b3f   : > { %v2924_v60 = vsel %vm2923_vm9, %v3775_v55, %v2920_v57  ;;  %v2903_v61 = vmul.f32 %v3777_v58, %v2898_v13  ;;  %vm2908_vm11 = vweird.f32 %v3777_v58 }
0x1b40   : > { %v2929_v62 = vsel %vm2926_vm10, %v2928_v59, %v2924_v60  ;;  %vm2909_vm13 = vmor %vm2907_vm12, %vm2908_vm11 }
0x1b41   : > { %v2904_v2 = vsub.f32 1.0, %v2903_v61  ;;  %v2931_v3 = vmul.f32 %v3771_v51, %v2929_v62  ;;  %v3203_v51 = vadd.f32 %v3202_v46, %v4170_v24 }
0x1b43   : > { %v2905_v5 = vmul.f32 %v3777_v58, %v2904_v2  ;;  %3584 = vmatpush.xpose.msk.msrb.mxu1 %vm359_vm6, %v2931_v3  ;;  %v3205_v2 = vpop.f32.mrf.mxu2 }
0x1b45   : > { %v2906_v7 = vadd.f32 %v3777_v58, %v2905_v5  ;;  %v3014_v5 = vpop.f32.mrf.mxu0 }
0x1b47   : > { %v2910_v10 = vsel %vm2909_vm13, %v3777_v58, %v2906_v7  ;;  %v3206_v7 = vadd.f32 %v3205_v2, %v4177_v31 }
0x1b48   : > { %v2915_v14 = vsel %vm2912_vm14, %v2914_v8, %v2910_v10  ;;  %v3015_v8 = vadd.f32 %v3014_v5, %v4214_v35 }
0x1b49   : > { %v2930_v16 = vmul.f32 %v3773_v48, %v2915_v14 }
0x1b4b   : > { %3585 = vmatpush.xpose.msk.msrb.mxu1 %vm359_vm6, %v2930_v16 }
0x1b4e   : > { %3586 = vmatmul.msk.f32.vlgmr.msrb.gmra.mxu1 %vm359_vm6, %v2821_v19 }
0x1b4f   : > { %3070 = vmatpush.msra.mxu1 %v3012_v17 }
0x1b89   : > { %v3033_v21 = vpop.trf.xlu0 }
0x1b8a   : > { %3591 = vmatmul.msk.f32.vlgmr.msra.gmra.mxu1 %vm329_vm5, %v3033_v21 }
0x1b91   : > { %v3034_v22 = vpop.trf.xlu0 }
0x1b92   : > { %3592 = vmatmul.msk.f32.gmra.mxu1 %vm329_vm5, %v3034_v22 }
0x1bcb   : > { %v2958_v25 = vpop.f32.mrf.mxu1 }
0x1bcc   : > { %v2961_v26 = vmul.f32 %v2958_v25, %v4276_v28 }
0x1bce   : > { %v2963_v30 = vadd.f32 %v2961_v26, %v4324_v63 }
0x1bd0   : > { %v2965_v32 = vrot.slane %v2963_v30, 1  ;;  %v2966_v29 = vrot.slane %v2963_v30, 2  ;;  %v2967_v36 = vrot.slane %v2963_v30, 3  ;;  %2971 = vst.msk [vmem:[%s4284_s6 + $0xd] sm:$0x1] %vm448_vm15, %v2963_v30 }
0x1bd2   : > { %2972 = vst.msk [vmem:[%s4284_s6 + $0x1d] sm:$0x1] %vm448_vm15, %v2965_v32 }
0x1bd3   : > { %2973 = vst.msk [vmem:[%s4284_s6 + $0x2d] sm:$0x1] %vm448_vm15, %v2966_v29 }
0x1bd4   : > { %2974 = vst.msk [vmem:[%s4284_s6 + $0x3d] sm:$0x1] %vm448_vm15, %v2967_v36 }
0x1c07   : > { %v3072_v37 = vpop.f32.mrf.mxu1 }
0x1c08   : > { %v3078_v38 = vsel %vm359_vm6, %v3072_v37, -inf }
0x1c0f   : > { %v3075_v18 = vpop.f32.mrf.mxu1 }
0x1c10   : > { %v3081_v34 = vsel %vm359_vm6, %v3075_v18, -inf }
0x1c11   : > { %3082 = vmax.xlane.f32.xlu1 %v3081_v34 }
0x1c19   : > { %3079 = vmax.xlane.f32.xlu1 %v3078_v38 }
0x1c84   : > { %v3083_v63 = vpop.xlane.xlu1 %3082 }
0x1c85   : > { %v3085_v33 = vsub.f32 %v3075_v18, %v3083_v63 }
0x1c87   : > { %v3088_v44 = vmul.f32 1.442695, %v3085_v33 }
0x1c89   : > { %3778 = vpow2.f32 %v3088_v44 }
0x1c8c   : > { %v3080_v39 = vpop.xlane.xlu1 %3079 }
0x1c8d   : > { %v3084_v20 = vsub.f32 %v3072_v37, %v3080_v39 }
0x1c8f   : > { %v3779_v40 = vpop.eup %3778  ;;  %v3086_v23 = vmul.f32 1.442695, %v3084_v20 }
0x1c90   : > { %v3093_v52 = vsel %vm359_vm6, %v3779_v40, 0.0 }
0x1c91   : > { %3780 = vpow2.f32 %v3086_v23  ;;  %3094 = vadd.xlane.f32.xlu0 %v3093_v52 }
0x1c97   : > { %v3781_v41 = vpop.eup %3780 }
0x1c98   : > { %v3090_v43 = vsel %vm359_vm6, %v3781_v41, 0.0 }
0x1c99   : > { %3091 = vadd.xlane.f32.xlu1 %v3090_v43 }
0x1cd3   : > { %3211 = vxpose.xlu1.b32.start.end [1/1] (short) (narrow) %v3203_v51, 16 }
0x1d04   : > { %v3095_v45 = vpop.xlane.xlu0 %3094 }
0x1d05   : > { %3782 = vrcp.f32 %v3095_v45  ;;  %v3121_v49 = vand.u32 2147483648, %v3095_v45  ;;  %v3119_v55 = vand.u32 2147483647, %v3095_v45  ;;  %vm3115_vm1 = vweird.f32 %v3095_v45 }
0x1d07   : > { %v3122_v50 = vor.u32 1.1754944e-38, %v3121_v49  ;;  %vm3120_vm3 = vcmp.eq.f32.partialorder %v3119_v55, 8.507059e+37 }
0x1d0b   : > { %v3783_v47 = vpop.eup %3782 }
0x1d0c   : > { %v3111_v48 = vmul.f32 %v3783_v47, %v3095_v45  ;;  %v3092_v11 = vpop.xlane.xlu1 %3091  ;;  %vm3116_vm0 = vweird.f32 %v3783_v47 }
0x1d0d   : > { %3784 = vrcp.f32 %v3092_v11  ;;  %vm3117_vm2 = vmor %vm3115_vm1, %vm3116_vm0  ;;  %v3107_v58 = vand.u32 2147483648, %v3092_v11  ;;  %v3105_v60 = vand.u32 2147483647, %v3092_v11  ;;  %vm3101_vm7 = vweird.f32 %v3092_v11 }
0x1d0e   : > { %v3112_v0 = vsub.f32 1.0, %v3111_v48 }
0x1d0f   : > { %v3108_v62 = vor.u32 1.1754944e-38, %v3107_v58  ;;  %vm3106_vm9 = vcmp.eq.f32.partialorder %v3105_v60, 8.507059e+37 }
0x1d10   : > { %v3113_v27 = vmul.f32 %v3783_v47, %v3112_v0 }
0x1d12   : > { %v3114_v1 = vadd.f32 %v3783_v47, %v3113_v27 }
0x1d13   : > { %v3785_v13 = vpop.eup %3784 }
0x1d14   : > { %v3118_v53 = vsel %vm3117_vm2, %v3783_v47, %v3114_v1  ;;  %v3097_v24 = vmul.f32 %v3785_v13, %v3092_v11  ;;  %vm3102_vm4 = vweird.f32 %v3785_v13 }
0x1d15   : > { %v3123_v54 = vsel %vm3120_vm3, %v3122_v50, %v3118_v53  ;;  %vm3103_vm8 = vmor %vm3101_vm7, %vm3102_vm4 }
0x1d16   : > { %v3125_v56 = vmul.f32 %v3779_v40, %v3123_v54  ;;  %v3098_v57 = vsub.f32 1.0, %v3097_v24  ;;  %v3208_v24 = vpop.f32.mrf.mxu2 }
0x1d18   : > { %v3099_v59 = vmul.f32 %v3785_v13, %v3098_v57  ;;  %3593 = vmatpush.xpose.msk.msrb.mxu3 %vm359_vm6, %v3125_v56  ;;  %v3209_v56 = vadd.f32 %v3208_v24, %v4214_v35 }
0x1d1a   : > { %v3100_v61 = vadd.f32 %v3785_v13, %v3099_v59 }
0x1d1c   : > { %v3104_v3 = vsel %vm3103_vm8, %v3785_v13, %v3100_v61 }
0x1d1d   : > { %v3109_v4 = vsel %vm3106_vm9, %v3108_v62, %v3104_v3 }
0x1d1e   : > { %v3124_v6 = vmul.f32 %v3781_v41, %v3109_v4 }
0x1d20   : > { %3594 = vmatpush.xpose.msk.msrb.mxu3 %vm359_vm6, %v3124_v6 }
0x1d23   : > { %3595 = vmatmul.msk.f32.vlgmr.msrb.gmra.mxu3 %vm359_vm6, %v3015_v8 }
0x1d24   : > { %3264 = vmatpush.msra.mxu3 %v3206_v7 }
0x1d77   : > { %v3227_v9 = vpop.trf.xlu1 }
0x1d78   : > { %3600 = vmatmul.msk.f32.vlgmr.msra.gmra.mxu3 %vm329_vm5, %v3227_v9 }
0x1d7f   : > { %v3228_v10 = vpop.trf.xlu1 }
0x1d80   : > { %3601 = vmatmul.msk.f32.gmra.mxu3 %vm329_vm5, %v3228_v10 }
0x1da6   : > { %v3152_v14 = vpop.f32.mrf.mxu3 }
0x1da7   : > { %v3155_v15 = vmul.f32 %v3152_v14, %v4276_v28 }
0x1da9   : > { %v3157_v31 = vadd.f32 %v3155_v15, %v4187_v42 }
0x1dab   : > { %v3159_v16 = vrot.slane %v3157_v31, 1  ;;  %v3160_v17 = vrot.slane %v3157_v31, 2  ;;  %v3161_v19 = vrot.slane %v3157_v31, 3  ;;  %3165 = vst.msk [vmem:[%s4284_s6 + $0xe] sm:$0x1] %vm448_vm15, %v3157_v31 }
0x1dad   : > { %3166 = vst.msk [vmem:[%s4284_s6 + $0x1e] sm:$0x1] %vm448_vm15, %v3159_v16 }
0x1dae   : > { %3167 = vst.msk [vmem:[%s4284_s6 + $0x2e] sm:$0x1] %vm448_vm15, %v3160_v17 }
0x1daf   : > { %3168 = vst.msk [vmem:[%s4284_s6 + $0x3e] sm:$0x1] %vm448_vm15, %v3161_v19 }
0x1dfb   : > { %v3266_v21 = vpop.f32.mrf.mxu3 }
0x1dfc   : > { %v3272_v22 = vsel %vm359_vm6, %v3266_v21, -inf }
0x1dfd   : > { %3273 = vmax.xlane.f32.xlu2 %v3272_v22 }
0x1e03   : > { %v3269_v25 = vpop.f32.mrf.mxu3 }
0x1e04   : > { %v3275_v26 = vsel %vm359_vm6, %v3269_v25, -inf }
0x1e05   : > { %3276 = vmax.xlane.f32.xlu1 %v3275_v26 }
0x1e70   : > { %v3274_v42 = vpop.xlane.xlu2 %3273 }
0x1e71   : > { %v3278_v29 = vsub.f32 %v3266_v21, %v3274_v42 }
0x1e73   : > { %v3280_v37 = vmul.f32 1.442695, %v3278_v29 }
0x1e78   : > { %v3277_v30 = vpop.xlane.xlu1 %3276 }
0x1e79   : > { %v3279_v32 = vsub.f32 %v3269_v25, %v3277_v30 }
0x1e7b   : > { %v3282_v36 = vmul.f32 1.442695, %v3279_v32 }
0x1e7d   : > { %3786 = vpow2.f32 %v3282_v36 }
0x1e7e   : > { %3788 = vpow2.f32 %v3280_v37 }
0x1e83   : > { %v3787_v18 = vpop.eup %3786 }
0x1e84   : > { %v3287_v34 = vsel %vm359_vm6, %v3787_v18, 0.0  ;;  %v3789_v38 = vpop.eup %3788 }
0x1e85   : > { %3288 = vadd.xlane.f32.xlu2 %v3287_v34  ;;  %v3284_v63 = vsel %vm359_vm6, %v3789_v38, 0.0 }
0x1e8d   : > { %3285 = vadd.xlane.f32.xlu2 %v3284_v63 }
0x1ef8   : > { %v3289_v33 = vpop.xlane.xlu2 %3288 }
0x1ef9   : > { %3790 = vrcp.f32 %v3289_v33  ;;  %v3315_v23 = vand.u32 2147483648, %v3289_v33  ;;  %v3313_v41 = vand.u32 2147483647, %v3289_v33  ;;  %vm3309_vm10 = vweird.f32 %v3289_v33 }
0x1efb   : > { %v3316_v51 = vor.u32 1.1754944e-38, %v3315_v23  ;;  %vm3314_vm12 = vcmp.eq.f32.partialorder %v3313_v41, 8.507059e+37 }
0x1eff   : > { %v3791_v44 = vpop.eup %3790 }
0x1f00   : > { %v3305_v39 = vmul.f32 %v3791_v44, %v3289_v33  ;;  %v3286_v20 = vpop.xlane.xlu2 %3285  ;;  %vm3310_vm5 = vweird.f32 %v3791_v44 }
0x1f01   : > { %3792 = vrcp.f32 %v3286_v20  ;;  %vm3311_vm11 = vmor %vm3309_vm10, %vm3310_vm5  ;;  %v3301_v49 = vand.u32 2147483648, %v3286_v20  ;;  %v3299_v55 = vand.u32 2147483647, %v3286_v20  ;;  %vm3295_vm14 = vweird.f32 %v3286_v20 }
0x1f02   : > { %v3306_v40 = vsub.f32 1.0, %v3305_v39 }
0x1f03   : > { %v3302_v13 = vor.u32 1.1754944e-38, %v3301_v49  ;;  %vm3300_vm1 = vcmp.eq.f32.partialorder %v3299_v55, 8.507059e+37 }
0x1f04   : > { %v3307_v52 = vmul.f32 %v3791_v44, %v3306_v40 }
0x1f06   : > { %v3308_v43 = vadd.f32 %v3791_v44, %v3307_v52 }
0x1f07   : > { %v3793_v46 = vpop.eup %3792 }
0x1f08   : > { %v3312_v45 = vsel %vm3311_vm11, %v3791_v44, %v3308_v43  ;;  %v3291_v47 = vmul.f32 %v3793_v46, %v3286_v20  ;;  %vm3296_vm13 = vweird.f32 %v3793_v46 }
0x1f09   : > { %v3317_v48 = vsel %vm3314_vm12, %v3316_v51, %v3312_v45  ;;  %vm3297_vm0 = vmor %vm3295_vm14, %vm3296_vm13 }
0x1f0a   : > { %v3292_v11 = vsub.f32 1.0, %v3291_v47  ;;  %v3319_v0 = vmul.f32 %v3787_v18, %v3317_v48 }
0x1f0c   : > { %v3293_v27 = vmul.f32 %v3793_v46, %v3292_v11  ;;  %3602 = vmatpush.xpose.msk.msrb.mxu1 %vm359_vm6, %v3319_v0 }
0x1f0e   : > { %v3294_v1 = vadd.f32 %v3793_v46, %v3293_v27 }
0x1f10   : > { %v3298_v50 = vsel %vm3297_vm0, %v3793_v46, %v3294_v1 }
0x1f11   : > { %v3303_v53 = vsel %vm3300_vm1, %v3302_v13, %v3298_v50 }
0x1f12   : > { %v3318_v54 = vmul.f32 %v3789_v38, %v3303_v53 }
0x1f14   : > { %3603 = vmatpush.xpose.msk.msrb.mxu1 %vm359_vm6, %v3318_v54 }
0x1f17   : > { %3604 = vmatmul.msk.f32.vlgmr.msrb.gmra.mxu1 %vm359_vm6, %v3209_v56 }
0x1f94   : > { %v3346_v57 = vpop.f32.mrf.mxu1 }
0x1f95   : > { %v3349_v58 = vmul.f32 %v3346_v57, %v4276_v28 }
0x1f97   : > { %v3351_v59 = vadd.f32 %v3349_v58, %v4341_v12 }
0x1f99   : > { %v3353_v60 = vrot.slane %v3351_v59, 1  ;;  %v3354_v35 = vrot.slane %v3351_v59, 2  ;;  %v3355_v61 = vrot.slane %v3351_v59, 3  ;;  %3359 = vst.msk [vmem:[%s4284_s6 + $0xf] sm:$0x1] %vm448_vm15, %v3351_v59 }
0x1f9b   : > { %3360 = vst.msk [vmem:[%s4284_s6 + $0x1f] sm:$0x1] %vm448_vm15, %v3353_v60 }
0x1f9c   : > { %3361 = vst.msk [vmem:[%s4284_s6 + $0x2f] sm:$0x1] %vm448_vm15, %v3354_v35 }
0x1f9d   : > { %3362 = vst.msk [vmem:[%s4284_s6 + $0x3f] sm:$0x1] %vm448_vm15, %v3355_v61 }
0x1f9e   : > { %3851 = shalt.err (!%p3848_p4)
}
0x1f9f   : > { %s3895_s7 = smov 128   ;;  %s3896_s26 = smov 8  }
0x1fa0   : > { %3614 = dma.vmem_to_hbm [thread:$0]  (%p3975_p11), %s3377_s10, 1024, %s3379_s12, %s3364_s2, %s3895_s7, %s3895_s7, %s3896_s26  }
0x1fa1 PF: > { %s3393_s5 = sand.u32 1, %s3878_s17   ;;  %p4727_p7 = scmp.ge.s32.totalorder %s3890_s20, 2 }
0x1fa2   : > { %s3394_s30 = scalar_lea.sflag [#allocation5], %s3393_s5 }
0x1fa3   : > { %p3621_p5 = pnand %p4727_p7, %p3979_p12 }
0x1fa5   : > { %p3622_p8 = pneg %p3621_p5 }
0x1fa7   : > { %3873 = dma.done.wait (%p3622_p8), %s3394_s30, 1024  }
0x1fa8   : > { %3875 = vsyncadd (%p3622_p8), %s3394_s30, 4294966272  ;;  %p18_p10 = scmp.ge.s32.totalorder %s3950_s22, 4   ;;  %s4728_s17 = smov %s3882_s18 }
0x1fa9   : > { %s4729_s18 = smov %s3886_s19  ;;  %s4730_s19 = smov %s3962_s25 }
0x1faa   : > { %s4731_s20 = smov %s3950_s22  ;;  %20 = sbr.rel (!%p18_p10) target bundleno = 7 (0x7), region = 81 }
0x1faf   :  { %3400 = vsyncpa [#allocation4], 1 }
0x1fb0   :  { %3402 = vsyncpa [#allocation4 + $0x1], 1 }
0x1fb1   :  { %3403 = vsyncpa [#allocation5], 1 }
0x1fb2   :  { %3405 = vsyncpa [#allocation5 + $0x1], 1 }

</bundles_post_ra>
